<compile_context>
chip_gen: v7x
topology: tpu7x:2x2x1
jax: 0.10.0
libtpu: 0.0.40
codegen_flags: <defaults>
</compile_context>

<pallas_src>
import functools

import numpy as np
import jax
import jax.numpy as jnp
from jax.experimental import pallas as pl
from jax.experimental.pallas import tpu as pltpu

LANES = 128   # all channel dims padded to this (lane-dense loads/stores/MXU N)
KSIZE = 3     # 3x3 convs


# ----------------------------------------------------------------------------
# Static layer plan
# ----------------------------------------------------------------------------
def _layer_plan(H, W, layer_strides):
    """Per conv layer: (stride, Hin, Win, Hout, Wout)."""
    plan = []
    for s in layer_strides:
        Ho = (H + 2 - KSIZE) // s + 1
        Wo = (W + 2 - KSIZE) // s + 1
        plan.append((s, H, W, Ho, Wo))
        H, W = Ho, Wo
    return tuple(plan)


def _phase_perm(Hsrc, Wsrc):
    """Row permutation that regroups a row-major (Hsrc*Wsrc, C) activation into
    parity-phase-major order:
        dst row (2p+q)*(h2*w2) + u*w2 + v  <-  src row (2u+p)*Wsrc + (2v+q)."""
    h2, w2 = Hsrc // 2, Wsrc // 2
    P = np.zeros((Hsrc * Wsrc, Hsrc * Wsrc), np.float32)
    for p in range(2):
        for q in range(2):
            for u in range(h2):
                for v in range(w2):
                    dst = (2 * p + q) * (h2 * w2) + u * w2 + v
                    src = (2 * u + p) * Wsrc + (2 * v + q)
                    P[dst, src] = 1.0
    return jnp.asarray(P, jnp.bfloat16)


# ----------------------------------------------------------------------------
# Fully fused kernel (one grid step = one image through the whole network)
# ----------------------------------------------------------------------------
def _make_fused_kernel(plan, perm_layers):
    """plan: tuple of (stride, Hin, Win, Ho, Wo) per conv layer.
    perm_layers: layer indices l > 0 with stride 2 (their producer's output is
    stored phase-split via a constant row-permutation matmul)."""
    L = len(plan)
    n_perm = len(perm_layers)

    def kernel(*refs):
        x_ref, w_ref, b_ref = refs[:3]
        perm_refs = dict(zip(perm_layers, refs[3:3 + n_perm]))
        o_ref = refs[3 + n_perm]
        bufs = refs[4 + n_perm:]            # bufs[l-1] = input buffer of layer l

        # Zero scratch once per image: provides the exact zero halo / borders.
        for buf in bufs:
            buf[...] = jnp.zeros_like(buf)

        def im2col(l):
            """Build the (Ho*Wo, 9*LANES) bf16 im2col tile for layer l using
            only static contiguous slices of VMEM."""
            stride, Hin, Win, Ho, Wo = plan[l]
            src = x_ref if l == 0 else bufs[l - 1]
            cols = []
            for kh in range(KSIZE):
                for kw in range(KSIZE):
                    if stride == 1:
                        if l == 0:
                            tap = src[0, kh:kh + Ho, kw:kw + Wo, :]
                        else:
                            tap = src[kh:kh + Ho, kw:kw + Wo, :]
                    else:
                        if l == 0:
                            # Wrapper-provided phase split of the PADDED input:
                            #   src[0, 2r+s, a, b] = xpad[2a+r, 2b+s]
                            p = 2 * (kh % 2) + (kw % 2)
                            r0, c0 = kh // 2, kw // 2
                            tap = src[0, p, r0:r0 + Ho, c0:c0 + Wo, :]
                        else:
                            # In-kernel phase split of the (unpadded) producer
                            # output: src[2p+q, 1+u, 1+v] = prev[2u+p, 2v+q]
                            ph, pw = (kh + 1) % 2, (kw + 1) % 2
                            r0 = 0 if kh == 0 else 1
                            c0 = 0 if kw == 0 else 1
                            tap = src[2 * ph + pw, r0:r0 + Ho, c0:c0 + Wo, :]
                    cols.append(
                        tap.reshape(Ho * Wo, LANES).astype(jnp.bfloat16))
            return jnp.concatenate(cols, axis=-1)       # (Ho*Wo, 9*LANES)

        def store(l, y16):
            """Store layer l's bf16 output (row-major (i,j) pixels) for the
            next layer (padded, or phase-split-padded if next stride == 2)."""
            stride, Hin, Win, Ho, Wo = plan[l]
            if l == L - 1:
                o_ref[...] = y16.reshape(1, Ho, Wo, LANES)
                return
            dst = bufs[l]
            if plan[l + 1][0] == 1:
                dst[1:1 + Ho, 1:1 + Wo, :] = (
                    y16.reshape(Ho, Wo, LANES).astype(dst.dtype))
            else:
                # Group output pixels by (row, col) parity with a constant
                # permutation matmul (exact: 0/1 matrix), then store each
                # phase block into its padded scratch plane.
                perm = perm_refs[l + 1][...]
                yp = jnp.dot(perm, y16,
                             preferred_element_type=jnp.float32
                             ).astype(jnp.bfloat16)
                h2, w2 = Ho // 2, Wo // 2
                for idx in range(4):
                    blk = yp[idx * h2 * w2:(idx + 1) * h2 * w2]
                    dst[idx, 1:1 + h2, 1:1 + w2, :] = (
                        blk.reshape(h2, w2, LANES).astype(dst.dtype))

        for l in range(L):
            xcol = im2col(l)                                     # (M, 1152)
            y = jnp.dot(xcol, w_ref[l],
                        preferred_element_type=jnp.float32)      # (M, 128) f32
            y = jnp.maximum(y + b_ref[l], 0.0)                   # bias + ReLU
            store(l, y.astype(jnp.bfloat16))

    return kernel


# ----------------------------------------------------------------------------
# Wrapper: one pallas_call for the whole network
# ----------------------------------------------------------------------------
def stagenet_forward(prepped, x_nchw, *, plan, perm_layers, out_channels):
    w_stack, b_stack, perms = prepped
    N, C, H, W = x_nchw.shape
    assert C <= LANES
    L = len(plan)

    # NCHW -> NHWC, pad channels to the lane width, bf16 for the MXU.
    x = jnp.transpose(x_nchw, (0, 2, 3, 1))
    x = jnp.pad(x, ((0, 0), (0, 0), (0, 0), (0, LANES - C))).astype(jnp.bfloat16)

    # One tiny wrapper-side pass over the raw input: halo pad (+ even/odd
    # phase split if the first conv is strided).  Everything downstream stays
    # in VMEM inside the fused kernel.
    xp = jnp.pad(x, ((0, 0), (1, 1), (1, 1), (0, 0)))
    if plan[0][0] == 2:
        Hp, Wp = xp.shape[1], xp.shape[2]
        xp = jnp.pad(xp, ((0, 0), (0, Hp % 2), (0, Wp % 2), (0, 0)))
        Hp, Wp = xp.shape[1], xp.shape[2]
        xin = (xp.reshape(N, Hp // 2, 2, Wp // 2, 2, LANES)
                 .transpose(0, 2, 4, 1, 3, 5)
                 .reshape(N, 4, Hp // 2, Wp // 2, LANES))
        in_block = (1, 4, Hp // 2, Wp // 2, LANES)
        in_map = lambda n: (n, 0, 0, 0, 0)
    else:
        xin = xp
        in_block = (1,) + xp.shape[1:]
        in_map = lambda n: (n, 0, 0, 0)

    _, _, _, Hl, Wl = plan[-1]

    in_specs = [
        pl.BlockSpec(in_block, in_map),
        pl.BlockSpec(w_stack.shape, lambda n: (0, 0, 0)),   # weights: resident
        pl.BlockSpec(b_stack.shape, lambda n: (0, 0, 0)),
    ] + [pl.BlockSpec(p.shape, lambda n: (0, 0)) for p in perms]

    # Scratch: layer l's input buffer (l >= 1).  Padded (halo) or phase-split
    # padded for stride-2 layers.  f32 scratch keeps all partial stores on
    # native 32-bit sublanes.
    scratch = []
    for l in range(1, L):
        s, Hin, Win, _, _ = plan[l]
        if s == 1:
            scratch.append(pltpu.VMEM((Hin + 2, Win + 2, LANES), jnp.float32))
        else:
            assert Hin % 2 == 0 and Win % 2 == 0
            scratch.append(
                pltpu.VMEM((4, Hin // 2 + 1, Win // 2 + 1, LANES), jnp.float32))

    kernel = _make_fused_kernel(plan, perm_layers)

    out = pl.pallas_call(
        kernel,
        out_shape=jax.ShapeDtypeStruct((N, Hl, Wl, LANES), jnp.bfloat16),
        grid_spec=pltpu.PrefetchScalarGridSpec(
            num_scalar_prefetch=0,
            grid=(N,),
            in_specs=in_specs,
            out_specs=pl.BlockSpec((1, Hl, Wl, LANES), lambda n: (n, 0, 0, 0)),
            scratch_shapes=scratch,
        ),
        compiler_params=pltpu.CompilerParams(
            dimension_semantics=("parallel",)),
    )(xin, w_stack, b_stack, *perms)

    out = out[..., :out_channels].astype(jnp.float32)
    return jnp.transpose(out, (0, 3, 1, 2))                     # back to NCHW


# ----------------------------------------------------------------------------
# StageNet params (HWIO conv weights; PyTorch OIHW checkpoints need transpose)
# ----------------------------------------------------------------------------
def _init_conv(key, cin, cout):
    kw_, kb = jax.random.split(key)
    fan_in = 9 * cin
    w = jax.random.normal(kw_, (3, 3, cin, cout), jnp.float32) * (2.0 / fan_in) ** 0.5
    b = jax.random.normal(kb, (cout,), jnp.float32) * 0.01
    return {"w": w, "b": b}


def init_stagenet_params(key, *, stem_inc, stem_outc, width, depth, strides):
    params = {"stem": None, "stages": []}
    key, k = jax.random.split(key)
    params["stem"] = _init_conv(k, stem_inc, stem_outc)
    inc = stem_outc
    for outc, d in zip(width, depth):
        blocks = []
        for j in range(d):
            key, k = jax.random.split(key)
            blocks.append(_init_conv(k, inc if j == 0 else outc, outc))
        params["stages"].append(blocks)
        inc = outc
    return params


def prepare_params(params, plan, perm_layers):
    """Stack all conv weights as (L, 9*LANES, LANES) bf16 (zero-padded
    channels), biases as (L, 1, LANES) f32, plus phase permutations."""
    blocks = [params["stem"]] + [b for stage in params["stages"] for b in stage]
    assert len(blocks) == len(plan)
    w_list, b_list = [], []
    for blk in blocks:
        w, b = blk["w"], blk["b"]
        cin, cout = w.shape[2], w.shape[3]
        wp = jnp.pad(w, ((0, 0), (0, 0), (0, LANES - cin), (0, LANES - cout)))
        w_list.append(wp.reshape(KSIZE * KSIZE * LANES, LANES).astype(jnp.bfloat16))
        b_list.append(jnp.pad(b, (0, LANES - cout)).reshape(1, LANES).astype(jnp.float32))
    perms = tuple(_phase_perm(plan[l][1], plan[l][2]) for l in perm_layers)
    return jnp.stack(w_list), jnp.stack(b_list), perms


# ----------------------------------------------------------------------------
# XLA reference (same bf16 rounding points as the kernel)
# ----------------------------------------------------------------------------
def _reference_forward(params, x_nchw, *, strides):
    x = jnp.transpose(x_nchw, (0, 2, 3, 1)).astype(jnp.bfloat16).astype(jnp.float32)

    def conv(x, blk, s):
        w = blk["w"].astype(jnp.bfloat16).astype(jnp.float32)
        b = blk["b"].reshape(1, 1, 1, -1)
        y = jax.lax.conv_general_dilated(
            x, w, window_strides=(s, s), padding=((1, 1), (1, 1)),
            dimension_numbers=("NHWC", "HWIO", "NHWC"),
            precision=jax.lax.Precision.HIGHEST)
        y = jnp.maximum(y + b, 0.0)
        return y.astype(jnp.bfloat16).astype(jnp.float32)

    x = conv(x, params["stem"], 2)
    for blocks, s in zip(params["stages"], strides):
        for j, blk in enumerate(blocks):
            x = conv(x, blk, s if j == 0 else 1)
    return jnp.transpose(x, (0, 3, 1, 2))


# ----------------------------------------------------------------------------
# Demo
# ----------------------------------------------------------------------------
if __name__ == "__main__":
    # StageNet config: 2 stages, widths [48, 64], depths [2, 2], strides [2, 1]
    stem_inc, stem_outc = 3, 32
    width, depth, strides = [48, 64], [2, 2], [2, 1]
    H = W = 16

    key = jax.random.PRNGKey(0)
    kparams, kx = jax.random.split(key)

    params = init_stagenet_params(
        kparams, stem_inc=stem_inc, stem_outc=stem_outc,
        width=width, depth=depth, strides=strides)

    # Static per-conv stride list: stem(s=2) + per stage [stride, 1, 1, ...]
    layer_strides = [2]
    for s, d in zip(strides, depth):
        layer_strides += [s] + [1] * (d - 1)
    plan = _layer_plan(H, W, layer_strides)                 # 16->8->4->4->4->4
    perm_layers = tuple(l for l in range(1, len(plan)) if plan[l][0] == 2)

    prepped = prepare_params(params, plan, perm_layers)

    # Input: NCHW, batch=2, channels=3, 16x16 (PyTorch convention).
    x = jax.random.normal(kx, (2, stem_inc, H, W), jnp.float32)

    fwd = jax.jit(functools.partial(
        stagenet_forward, plan=plan, perm_layers=perm_layers,
        out_channels=width[-1]))
    out = jax.block_until_ready(fwd(prepped, x))

    # 16x16 --stem(s=2)--> 8x8 --stage0(s=2)--> 4x4 --stage1(s=1)--> 4x4
    assert out.shape == (2, width[-1], 4, 4), out.shape
    assert bool(jnp.all(jnp.isfinite(out)))

    # Numerical sanity check vs XLA conv (same bf16 rounding, f32 accumulation).
    ref = _reference_forward(params, x, strides=strides)
    err = float(jnp.max(jnp.abs(out - ref)))
    assert bool(jnp.allclose(out, ref, atol=5e-2, rtol=5e-2)), err

    # TODO(synk): `extras` branch of StageNet is a no-op in the reference
    # (constructed with extras=None and _build_extras is `pass`), so skipped.
    print("KERNEL_OK")
</pallas_src>

<mosaic_0001>
module attributes {stable_mosaic.version = 11 : i64} {
  func.func @kernel(%arg0: i32, %arg1: memref<1x4x9x9x128xbf16, #tpu.memory_space<vmem>>, %arg2: memref<5x1152x128xbf16, #tpu.memory_space<vmem>>, %arg3: memref<5x1x128xf32, #tpu.memory_space<vmem>>, %arg4: memref<64x64xbf16, #tpu.memory_space<vmem>>, %arg5: memref<1x4x4x128xbf16, #tpu.memory_space<vmem>>, %arg6: memref<4x5x5x128xf32, #tpu.memory_space<vmem>>, %arg7: memref<6x6x128xf32, #tpu.memory_space<vmem>>, %arg8: memref<6x6x128xf32, #tpu.memory_space<vmem>>, %arg9: memref<6x6x128xf32, #tpu.memory_space<vmem>>) attributes {dimension_semantics = [#tpu.dimension_semantics<parallel>], iteration_bounds = array<i64: 2>, scalar_prefetch = 0 : i64, scratch_operands = 4 : i64, tpu.core_type = #tpu.core_type<tc>, window_params = [{transform_indices = @transform_0, window_bounds = array<i64: 1, 4, 9, 9, 128>}, {pipeline_mode = #tpu.pipeline_mode<synchronous>, transform_indices = @transform_1, window_bounds = array<i64: 5, 1152, 128>}, {pipeline_mode = #tpu.pipeline_mode<synchronous>, transform_indices = @transform_2, window_bounds = array<i64: 5, 1, 128>}, {pipeline_mode = #tpu.pipeline_mode<synchronous>, transform_indices = @transform_3, window_bounds = array<i64: 64, 64>}, {transform_indices = @transform_4, window_bounds = array<i64: 1, 4, 4, 128>}]} {
    %cst = arith.constant 0.000000e+00 : f32
    %0 = vector.broadcast %cst : f32 to vector<4x5x5x128xf32>
    %c0 = arith.constant 0 : index
    %c0_0 = arith.constant 0 : index
    %c0_1 = arith.constant 0 : index
    %c0_2 = arith.constant 0 : index
    %1 = vector.load %arg6[%c0, %c0_0, %c0_1, %c0_2] : memref<4x5x5x128xf32, #tpu.memory_space<vmem>>, vector<4x5x5x128xf32>
    tpu.vector_store %arg6[%c0, %c0_0, %c0_1, %c0_2], %0 {strides = array<i32>} : memref<4x5x5x128xf32, #tpu.memory_space<vmem>>, vector<4x5x5x128xf32>,
    %cst_3 = arith.constant 0.000000e+00 : f32
    %2 = vector.broadcast %cst_3 : f32 to vector<6x6x128xf32>
    %c0_4 = arith.constant 0 : index
    %c0_5 = arith.constant 0 : index
    %c0_6 = arith.constant 0 : index
    %3 = vector.load %arg7[%c0_4, %c0_5, %c0_6] : memref<6x6x128xf32, #tpu.memory_space<vmem>>, vector<6x6x128xf32>
    tpu.vector_store %arg7[%c0_4, %c0_5, %c0_6], %2 {strides = array<i32>} : memref<6x6x128xf32, #tpu.memory_space<vmem>>, vector<6x6x128xf32>,
    %cst_7 = arith.constant 0.000000e+00 : f32
    %4 = vector.broadcast %cst_7 : f32 to vector<6x6x128xf32>
    %c0_8 = arith.constant 0 : index
    %c0_9 = arith.constant 0 : index
    %c0_10 = arith.constant 0 : index
    %5 = vector.load %arg8[%c0_8, %c0_9, %c0_10] : memref<6x6x128xf32, #tpu.memory_space<vmem>>, vector<6x6x128xf32>
    tpu.vector_store %arg8[%c0_8, %c0_9, %c0_10], %4 {strides = array<i32>} : memref<6x6x128xf32, #tpu.memory_space<vmem>>, vector<6x6x128xf32>,
    %cst_11 = arith.constant 0.000000e+00 : f32
    %6 = vector.broadcast %cst_11 : f32 to vector<6x6x128xf32>
    %c0_12 = arith.constant 0 : index
    %c0_13 = arith.constant 0 : index
    %c0_14 = arith.constant 0 : index
    %7 = vector.load %arg9[%c0_12, %c0_13, %c0_14] : memref<6x6x128xf32, #tpu.memory_space<vmem>>, vector<6x6x128xf32>
    tpu.vector_store %arg9[%c0_12, %c0_13, %c0_14], %6 {strides = array<i32>} : memref<6x6x128xf32, #tpu.memory_space<vmem>>, vector<6x6x128xf32>,
    %c0_15 = arith.constant 0 : index
    %c0_16 = arith.constant 0 : index
    %c0_17 = arith.constant 0 : index
    %c0_18 = arith.constant 0 : index
    %c0_19 = arith.constant 0 : index
    %8 = vector.load %arg1[%c0_15, %c0_16, %c0_17, %c0_18, %c0_19] : memref<1x4x9x9x128xbf16, #tpu.memory_space<vmem>>, vector<1x1x8x8x128xbf16>
    %9 = vector.shape_cast %8 : vector<1x1x8x8x128xbf16> to vector<8x8x128xbf16>
    %10 = vector.shape_cast %9 : vector<8x8x128xbf16> to vector<64x128xbf16>
    %c0_20 = arith.constant 0 : index
    %c1 = arith.constant 1 : index
    %c0_21 = arith.constant 0 : index
    %c0_22 = arith.constant 0 : index
    %c0_23 = arith.constant 0 : index
    %11 = vector.load %arg1[%c0_20, %c1, %c0_21, %c0_22, %c0_23] : memref<1x4x9x9x128xbf16, #tpu.memory_space<vmem>>, vector<1x1x8x8x128xbf16>
    %12 = vector.shape_cast %11 : vector<1x1x8x8x128xbf16> to vector<8x8x128xbf16>
    %13 = vector.shape_cast %12 : vector<8x8x128xbf16> to vector<64x128xbf16>
    %c0_24 = arith.constant 0 : index
    %c0_25 = arith.constant 0 : index
    %c0_26 = arith.constant 0 : index
    %c1_27 = arith.constant 1 : index
    %c0_28 = arith.constant 0 : index
    %14 = vector.load %arg1[%c0_24, %c0_25, %c0_26, %c1_27, %c0_28] : memref<1x4x9x9x128xbf16, #tpu.memory_space<vmem>>, vector<1x1x8x8x128xbf16>
    %15 = vector.shape_cast %14 : vector<1x1x8x8x128xbf16> to vector<8x8x128xbf16>
    %16 = vector.shape_cast %15 : vector<8x8x128xbf16> to vector<64x128xbf16>
    %c0_29 = arith.constant 0 : index
    %c2 = arith.constant 2 : index
    %c0_30 = arith.constant 0 : index
    %c0_31 = arith.constant 0 : index
    %c0_32 = arith.constant 0 : index
    %17 = vector.load %arg1[%c0_29, %c2, %c0_30, %c0_31, %c0_32] : memref<1x4x9x9x128xbf16, #tpu.memory_space<vmem>>, vector<1x1x8x8x128xbf16>
    %18 = vector.shape_cast %17 : vector<1x1x8x8x128xbf16> to vector<8x8x128xbf16>
    %19 = vector.shape_cast %18 : vector<8x8x128xbf16> to vector<64x128xbf16>
    %c0_33 = arith.constant 0 : index
    %c3 = arith.constant 3 : index
    %c0_34 = arith.constant 0 : index
    %c0_35 = arith.constant 0 : index
    %c0_36 = arith.constant 0 : index
    %20 = vector.load %arg1[%c0_33, %c3, %c0_34, %c0_35, %c0_36] : memref<1x4x9x9x128xbf16, #tpu.memory_space<vmem>>, vector<1x1x8x8x128xbf16>
    %21 = vector.shape_cast %20 : vector<1x1x8x8x128xbf16> to vector<8x8x128xbf16>
    %22 = vector.shape_cast %21 : vector<8x8x128xbf16> to vector<64x128xbf16>
    %c0_37 = arith.constant 0 : index
    %c2_38 = arith.constant 2 : index
    %c0_39 = arith.constant 0 : index
    %c1_40 = arith.constant 1 : index
    %c0_41 = arith.constant 0 : index
    %23 = vector.load %arg1[%c0_37, %c2_38, %c0_39, %c1_40, %c0_41] : memref<1x4x9x9x128xbf16, #tpu.memory_space<vmem>>, vector<1x1x8x8x128xbf16>
    %24 = vector.shape_cast %23 : vector<1x1x8x8x128xbf16> to vector<8x8x128xbf16>
    %25 = vector.shape_cast %24 : vector<8x8x128xbf16> to vector<64x128xbf16>
    %c0_42 = arith.constant 0 : index
    %c0_43 = arith.constant 0 : index
    %c1_44 = arith.constant 1 : index
    %c0_45 = arith.constant 0 : index
    %c0_46 = arith.constant 0 : index
    %26 = vector.load %arg1[%c0_42, %c0_43, %c1_44, %c0_45, %c0_46] : memref<1x4x9x9x128xbf16, #tpu.memory_space<vmem>>, vector<1x1x8x8x128xbf16>
    %27 = vector.shape_cast %26 : vector<1x1x8x8x128xbf16> to vector<8x8x128xbf16>
    %28 = vector.shape_cast %27 : vector<8x8x128xbf16> to vector<64x128xbf16>
    %c0_47 = arith.constant 0 : index
    %c1_48 = arith.constant 1 : index
    %c1_49 = arith.constant 1 : index
    %c0_50 = arith.constant 0 : index
    %c0_51 = arith.constant 0 : index
    %29 = vector.load %arg1[%c0_47, %c1_48, %c1_49, %c0_50, %c0_51] : memref<1x4x9x9x128xbf16, #tpu.memory_space<vmem>>, vector<1x1x8x8x128xbf16>
    %30 = vector.shape_cast %29 : vector<1x1x8x8x128xbf16> to vector<8x8x128xbf16>
    %31 = vector.shape_cast %30 : vector<8x8x128xbf16> to vector<64x128xbf16>
    %c0_52 = arith.constant 0 : index
    %c0_53 = arith.constant 0 : index
    %c1_54 = arith.constant 1 : index
    %c1_55 = arith.constant 1 : index
    %c0_56 = arith.constant 0 : index
    %32 = vector.load %arg1[%c0_52, %c0_53, %c1_54, %c1_55, %c0_56] : memref<1x4x9x9x128xbf16, #tpu.memory_space<vmem>>, vector<1x1x8x8x128xbf16>
    %33 = vector.shape_cast %32 : vector<1x1x8x8x128xbf16> to vector<8x8x128xbf16>
    %34 = vector.shape_cast %33 : vector<8x8x128xbf16> to vector<64x128xbf16>
    %35 = tpu.concatenate %10, %13, %16, %19, %22, %25, %28, %31, %34 in 1 : vector<64x128xbf16>, vector<64x128xbf16>, vector<64x128xbf16>, vector<64x128xbf16>, vector<64x128xbf16>, vector<64x128xbf16>, vector<64x128xbf16>, vector<64x128xbf16>, vector<64x128xbf16> -> vector<64x1152xbf16>
    %c0_57 = arith.constant 0 : index
    %c0_58 = arith.constant 0 : index
    %c0_59 = arith.constant 0 : index
    %36 = vector.load %arg2[%c0_57, %c0_58, %c0_59] : memref<5x1152x128xbf16, #tpu.memory_space<vmem>>, vector<1x1152x128xbf16>
    %37 = vector.shape_cast %36 : vector<1x1152x128xbf16> to vector<1152x128xbf16>
    %cst_60 = arith.constant dense<0.000000e+00> : vector<64x128xf32>
    %38 = tpu.matmul %35, %37, %cst_60 {dimension_numbers = #tpu.dot_dimension_numbers<[1], [0], [0], [1], [0, 0, 1, 1], [], []>} : vector<64x1152xbf16>, vector<1152x128xbf16>, vector<64x128xf32> -> vector<64x128xf32>
    %c0_61 = arith.constant 0 : index
    %c0_62 = arith.constant 0 : index
    %c0_63 = arith.constant 0 : index
    %39 = vector.load %arg3[%c0_61, %c0_62, %c0_63] : memref<5x1x128xf32, #tpu.memory_space<vmem>>, vector<1x1x128xf32>
    %40 = vector.shape_cast %39 : vector<1x1x128xf32> to vector<1x128xf32>
    %41 = vector.broadcast %40 : vector<1x128xf32> to vector<64x128xf32>
    %42 = arith.addf %38, %41 : vector<64x128xf32>
    %cst_64 = arith.constant 0.000000e+00 : f32
    %43 = vector.broadcast %cst_64 : f32 to vector<64x128xf32>
    %44 = arith.maximumf %42, %43 : vector<64x128xf32>
    %45 = arith.truncf %44 : vector<64x128xf32> to vector<64x128xbf16>
    %c0_65 = arith.constant 0 : index
    %c0_66 = arith.constant 0 : index
    %46 = vector.load %arg4[%c0_65, %c0_66] : memref<64x64xbf16, #tpu.memory_space<vmem>>, vector<64x64xbf16>
    %cst_67 = arith.constant dense<0.000000e+00> : vector<64x128xf32>
    %47 = tpu.matmul %46, %45, %cst_67 {dimension_numbers = #tpu.dot_dimension_numbers<[1], [0], [0], [1], [0, 0, 1, 1], [], []>} : vector<64x64xbf16>, vector<64x128xbf16>, vector<64x128xf32> -> vector<64x128xf32>
    %48 = arith.truncf %47 : vector<64x128xf32> to vector<64x128xbf16>
    %49 = vector.extract_strided_slice %48 {offsets = [0, 0], sizes = [16, 128], strides = [1, 1]} : vector<64x128xbf16> to vector<16x128xbf16>
    %50 = vector.shape_cast %49 : vector<16x128xbf16> to vector<4x4x128xbf16>
    %51 = arith.extf %50 : vector<4x4x128xbf16> to vector<4x4x128xf32>
    %c0_68 = arith.constant 0 : index
    %c1_69 = arith.constant 1 : index
    %c1_70 = arith.constant 1 : index
    %c0_71 = arith.constant 0 : index
    %52 = vector.load %arg6[%c0_68, %c1_69, %c1_70, %c0_71] : memref<4x5x5x128xf32, #tpu.memory_space<vmem>>, vector<1x4x4x128xf32>
    %53 = vector.shape_cast %52 : vector<1x4x4x128xf32> to vector<4x4x128xf32>
    %54 = vector.shape_cast %51 : vector<4x4x128xf32> to vector<1x4x4x128xf32>
    tpu.vector_store %arg6[%c0_68, %c1_69, %c1_70, %c0_71], %54 {strides = array<i32>} : memref<4x5x5x128xf32, #tpu.memory_space<vmem>>, vector<1x4x4x128xf32>,
    %55 = vector.extract_strided_slice %48 {offsets = [16, 0], sizes = [16, 128], strides = [1, 1]} : vector<64x128xbf16> to vector<16x128xbf16>
    %56 = vector.shape_cast %55 : vector<16x128xbf16> to vector<4x4x128xbf16>
    %57 = arith.extf %56 : vector<4x4x128xbf16> to vector<4x4x128xf32>
    %c1_72 = arith.constant 1 : index
    %c1_73 = arith.constant 1 : index
    %c1_74 = arith.constant 1 : index
    %c0_75 = arith.constant 0 : index
    %58 = vector.load %arg6[%c1_72, %c1_73, %c1_74, %c0_75] : memref<4x5x5x128xf32, #tpu.memory_space<vmem>>, vector<1x4x4x128xf32>
    %59 = vector.shape_cast %58 : vector<1x4x4x128xf32> to vector<4x4x128xf32>
    %60 = vector.shape_cast %57 : vector<4x4x128xf32> to vector<1x4x4x128xf32>
    tpu.vector_store %arg6[%c1_72, %c1_73, %c1_74, %c0_75], %60 {strides = array<i32>} : memref<4x5x5x128xf32, #tpu.memory_space<vmem>>, vector<1x4x4x128xf32>,
    %61 = vector.extract_strided_slice %48 {offsets = [32, 0], sizes = [16, 128], strides = [1, 1]} : vector<64x128xbf16> to vector<16x128xbf16>
    %62 = vector.shape_cast %61 : vector<16x128xbf16> to vector<4x4x128xbf16>
    %63 = arith.extf %62 : vector<4x4x128xbf16> to vector<4x4x128xf32>
    %c2_76 = arith.constant 2 : index
    %c1_77 = arith.constant 1 : index
    %c1_78 = arith.constant 1 : index
    %c0_79 = arith.constant 0 : index
    %64 = vector.load %arg6[%c2_76, %c1_77, %c1_78, %c0_79] : memref<4x5x5x128xf32, #tpu.memory_space<vmem>>, vector<1x4x4x128xf32>
    %65 = vector.shape_cast %64 : vector<1x4x4x128xf32> to vector<4x4x128xf32>
    %66 = vector.shape_cast %63 : vector<4x4x128xf32> to vector<1x4x4x128xf32>
    tpu.vector_store %arg6[%c2_76, %c1_77, %c1_78, %c0_79], %66 {strides = array<i32>} : memref<4x5x5x128xf32, #tpu.memory_space<vmem>>, vector<1x4x4x128xf32>,
    %67 = vector.extract_strided_slice %48 {offsets = [48, 0], sizes = [16, 128], strides = [1, 1]} : vector<64x128xbf16> to vector<16x128xbf16>
    %68 = vector.shape_cast %67 : vector<16x128xbf16> to vector<4x4x128xbf16>
    %69 = arith.extf %68 : vector<4x4x128xbf16> to vector<4x4x128xf32>
    %c3_80 = arith.constant 3 : index
    %c1_81 = arith.constant 1 : index
    %c1_82 = arith.constant 1 : index
    %c0_83 = arith.constant 0 : index
    %70 = vector.load %arg6[%c3_80, %c1_81, %c1_82, %c0_83] : memref<4x5x5x128xf32, #tpu.memory_space<vmem>>, vector<1x4x4x128xf32>
    %71 = vector.shape_cast %70 : vector<1x4x4x128xf32> to vector<4x4x128xf32>
    %72 = vector.shape_cast %69 : vector<4x4x128xf32> to vector<1x4x4x128xf32>
    tpu.vector_store %arg6[%c3_80, %c1_81, %c1_82, %c0_83], %72 {strides = array<i32>} : memref<4x5x5x128xf32, #tpu.memory_space<vmem>>, vector<1x4x4x128xf32>,
    %c3_84 = arith.constant 3 : index
    %c0_85 = arith.constant 0 : index
    %c0_86 = arith.constant 0 : index
    %c0_87 = arith.constant 0 : index
    %73 = vector.load %arg6[%c3_84, %c0_85, %c0_86, %c0_87] : memref<4x5x5x128xf32, #tpu.memory_space<vmem>>, vector<1x4x4x128xf32>
    %74 = vector.shape_cast %73 : vector<1x4x4x128xf32> to vector<4x4x128xf32>
    %75 = vector.shape_cast %74 : vector<4x4x128xf32> to vector<16x128xf32>
    %76 = arith.truncf %75 : vector<16x128xf32> to vector<16x128xbf16>
    %c2_88 = arith.constant 2 : index
    %c0_89 = arith.constant 0 : index
    %c1_90 = arith.constant 1 : index
    %c0_91 = arith.constant 0 : index
    %77 = vector.load %arg6[%c2_88, %c0_89, %c1_90, %c0_91] : memref<4x5x5x128xf32, #tpu.memory_space<vmem>>, vector<1x4x4x128xf32>
    %78 = vector.shape_cast %77 : vector<1x4x4x128xf32> to vector<4x4x128xf32>
    %79 = vector.shape_cast %78 : vector<4x4x128xf32> to vector<16x128xf32>
    %80 = arith.truncf %79 : vector<16x128xf32> to vector<16x128xbf16>
    %c3_92 = arith.constant 3 : index
    %c0_93 = arith.constant 0 : index
    %c1_94 = arith.constant 1 : index
    %c0_95 = arith.constant 0 : index
    %81 = vector.load %arg6[%c3_92, %c0_93, %c1_94, %c0_95] : memref<4x5x5x128xf32, #tpu.memory_space<vmem>>, vector<1x4x4x128xf32>
    %82 = vector.shape_cast %81 : vector<1x4x4x128xf32> to vector<4x4x128xf32>
    %83 = vector.shape_cast %82 : vector<4x4x128xf32> to vector<16x128xf32>
    %84 = arith.truncf %83 : vector<16x128xf32> to vector<16x128xbf16>
    %c1_96 = arith.constant 1 : index
    %c1_97 = arith.constant 1 : index
    %c0_98 = arith.constant 0 : index
    %c0_99 = arith.constant 0 : index
    %85 = vector.load %arg6[%c1_96, %c1_97, %c0_98, %c0_99] : memref<4x5x5x128xf32, #tpu.memory_space<vmem>>, vector<1x4x4x128xf32>
    %86 = vector.shape_cast %85 : vector<1x4x4x128xf32> to vector<4x4x128xf32>
    %87 = vector.shape_cast %86 : vector<4x4x128xf32> to vector<16x128xf32>
    %88 = arith.truncf %87 : vector<16x128xf32> to vector<16x128xbf16>
    %c0_100 = arith.constant 0 : index
    %c1_101 = arith.constant 1 : index
    %c1_102 = arith.constant 1 : index
    %c0_103 = arith.constant 0 : index
    %89 = vector.load %arg6[%c0_100, %c1_101, %c1_102, %c0_103] : memref<4x5x5x128xf32, #tpu.memory_space<vmem>>, vector<1x4x4x128xf32>
    %90 = vector.shape_cast %89 : vector<1x4x4x128xf32> to vector<4x4x128xf32>
    %91 = vector.shape_cast %90 : vector<4x4x128xf32> to vector<16x128xf32>
    %92 = arith.truncf %91 : vector<16x128xf32> to vector<16x128xbf16>
    %c1_104 = arith.constant 1 : index
    %c1_105 = arith.constant 1 : index
    %c1_106 = arith.constant 1 : index
    %c0_107 = arith.constant 0 : index
    %93 = vector.load %arg6[%c1_104, %c1_105, %c1_106, %c0_107] : memref<4x5x5x128xf32, #tpu.memory_space<vmem>>, vector<1x4x4x128xf32>
    %94 = vector.shape_cast %93 : vector<1x4x4x128xf32> to vector<4x4x128xf32>
    %95 = vector.shape_cast %94 : vector<4x4x128xf32> to vector<16x128xf32>
    %96 = arith.truncf %95 : vector<16x128xf32> to vector<16x128xbf16>
    %c3_108 = arith.constant 3 : index
    %c1_109 = arith.constant 1 : index
    %c0_110 = arith.constant 0 : index
    %c0_111 = arith.constant 0 : index
    %97 = vector.load %arg6[%c3_108, %c1_109, %c0_110, %c0_111] : memref<4x5x5x128xf32, #tpu.memory_space<vmem>>, vector<1x4x4x128xf32>
    %98 = vector.shape_cast %97 : vector<1x4x4x128xf32> to vector<4x4x128xf32>
    %99 = vector.shape_cast %98 : vector<4x4x128xf32> to vector<16x128xf32>
    %100 = arith.truncf %99 : vector<16x128xf32> to vector<16x128xbf16>
    %c2_112 = arith.constant 2 : index
    %c1_113 = arith.constant 1 : index
    %c1_114 = arith.constant 1 : index
    %c0_115 = arith.constant 0 : index
    %101 = vector.load %arg6[%c2_112, %c1_113, %c1_114, %c0_115] : memref<4x5x5x128xf32, #tpu.memory_space<vmem>>, vector<1x4x4x128xf32>
    %102 = vector.shape_cast %101 : vector<1x4x4x128xf32> to vector<4x4x128xf32>
    %103 = vector.shape_cast %102 : vector<4x4x128xf32> to vector<16x128xf32>
    %104 = arith.truncf %103 : vector<16x128xf32> to vector<16x128xbf16>
    %c3_116 = arith.constant 3 : index
    %c1_117 = arith.constant 1 : index
    %c1_118 = arith.constant 1 : index
    %c0_119 = arith.constant 0 : index
    %105 = vector.load %arg6[%c3_116, %c1_117, %c1_118, %c0_119] : memref<4x5x5x128xf32, #tpu.memory_space<vmem>>, vector<1x4x4x128xf32>
    %106 = vector.shape_cast %105 : vector<1x4x4x128xf32> to vector<4x4x128xf32>
    %107 = vector.shape_cast %106 : vector<4x4x128xf32> to vector<16x128xf32>
    %108 = arith.truncf %107 : vector<16x128xf32> to vector<16x128xbf16>
    %109 = tpu.concatenate %76, %80, %84, %88, %92, %96, %100, %104, %108 in 1 : vector<16x128xbf16>, vector<16x128xbf16>, vector<16x128xbf16>, vector<16x128xbf16>, vector<16x128xbf16>, vector<16x128xbf16>, vector<16x128xbf16>, vector<16x128xbf16>, vector<16x128xbf16> -> vector<16x1152xbf16>
    %c1_120 = arith.constant 1 : index
    %c0_121 = arith.constant 0 : index
    %c0_122 = arith.constant 0 : index
    %110 = vector.load %arg2[%c1_120, %c0_121, %c0_122] : memref<5x1152x128xbf16, #tpu.memory_space<vmem>>, vector<1x1152x128xbf16>
    %111 = vector.shape_cast %110 : vector<1x1152x128xbf16> to vector<1152x128xbf16>
    %cst_123 = arith.constant dense<0.000000e+00> : vector<16x128xf32>
    %112 = tpu.matmul %109, %111, %cst_123 {dimension_numbers = #tpu.dot_dimension_numbers<[1], [0], [0], [1], [0, 0, 1, 1], [], []>} : vector<16x1152xbf16>, vector<1152x128xbf16>, vector<16x128xf32> -> vector<16x128xf32>
    %c1_124 = arith.constant 1 : index
    %c0_125 = arith.constant 0 : index
    %c0_126 = arith.constant 0 : index
    %113 = vector.load %arg3[%c1_124, %c0_125, %c0_126] : memref<5x1x128xf32, #tpu.memory_space<vmem>>, vector<1x1x128xf32>
    %114 = vector.shape_cast %113 : vector<1x1x128xf32> to vector<1x128xf32>
    %115 = vector.broadcast %114 : vector<1x128xf32> to vector<16x128xf32>
    %116 = arith.addf %112, %115 : vector<16x128xf32>
    %cst_127 = arith.constant 0.000000e+00 : f32
    %117 = vector.broadcast %cst_127 : f32 to vector<16x128xf32>
    %118 = arith.maximumf %116, %117 : vector<16x128xf32>
    %119 = arith.truncf %118 : vector<16x128xf32> to vector<16x128xbf16>
    %120 = vector.shape_cast %119 : vector<16x128xbf16> to vector<4x4x128xbf16>
    %121 = arith.extf %120 : vector<4x4x128xbf16> to vector<4x4x128xf32>
    %c1_128 = arith.constant 1 : index
    %c1_129 = arith.constant 1 : index
    %c0_130 = arith.constant 0 : index
    %122 = vector.load %arg7[%c1_128, %c1_129, %c0_130] : memref<6x6x128xf32, #tpu.memory_space<vmem>>, vector<4x4x128xf32>
    tpu.vector_store %arg7[%c1_128, %c1_129, %c0_130], %121 {strides = array<i32>} : memref<6x6x128xf32, #tpu.memory_space<vmem>>, vector<4x4x128xf32>,
    %c0_131 = arith.constant 0 : index
    %c0_132 = arith.constant 0 : index
    %c0_133 = arith.constant 0 : index
    %123 = vector.load %arg7[%c0_131, %c0_132, %c0_133] : memref<6x6x128xf32, #tpu.memory_space<vmem>>, vector<4x4x128xf32>
    %124 = vector.shape_cast %123 : vector<4x4x128xf32> to vector<16x128xf32>
    %125 = arith.truncf %124 : vector<16x128xf32> to vector<16x128xbf16>
    %c0_134 = arith.constant 0 : index
    %c1_135 = arith.constant 1 : index
    %c0_136 = arith.constant 0 : index
    %126 = vector.load %arg7[%c0_134, %c1_135, %c0_136] : memref<6x6x128xf32, #tpu.memory_space<vmem>>, vector<4x4x128xf32>
    %127 = vector.shape_cast %126 : vector<4x4x128xf32> to vector<16x128xf32>
    %128 = arith.truncf %127 : vector<16x128xf32> to vector<16x128xbf16>
    %c0_137 = arith.constant 0 : index
    %c2_138 = arith.constant 2 : index
    %c0_139 = arith.constant 0 : index
    %129 = vector.load %arg7[%c0_137, %c2_138, %c0_139] : memref<6x6x128xf32, #tpu.memory_space<vmem>>, vector<4x4x128xf32>
    %130 = vector.shape_cast %129 : vector<4x4x128xf32> to vector<16x128xf32>
    %131 = arith.truncf %130 : vector<16x128xf32> to vector<16x128xbf16>
    %c1_140 = arith.constant 1 : index
    %c0_141 = arith.constant 0 : index
    %c0_142 = arith.constant 0 : index
    %132 = vector.load %arg7[%c1_140, %c0_141, %c0_142] : memref<6x6x128xf32, #tpu.memory_space<vmem>>, vector<4x4x128xf32>
    %133 = vector.shape_cast %132 : vector<4x4x128xf32> to vector<16x128xf32>
    %134 = arith.truncf %133 : vector<16x128xf32> to vector<16x128xbf16>
    %c1_143 = arith.constant 1 : index
    %c1_144 = arith.constant 1 : index
    %c0_145 = arith.constant 0 : index
    %135 = vector.load %arg7[%c1_143, %c1_144, %c0_145] : memref<6x6x128xf32, #tpu.memory_space<vmem>>, vector<4x4x128xf32>
    %136 = vector.shape_cast %135 : vector<4x4x128xf32> to vector<16x128xf32>
    %137 = arith.truncf %136 : vector<16x128xf32> to vector<16x128xbf16>
    %c1_146 = arith.constant 1 : index
    %c2_147 = arith.constant 2 : index
    %c0_148 = arith.constant 0 : index
    %138 = vector.load %arg7[%c1_146, %c2_147, %c0_148] : memref<6x6x128xf32, #tpu.memory_space<vmem>>, vector<4x4x128xf32>
    %139 = vector.shape_cast %138 : vector<4x4x128xf32> to vector<16x128xf32>
    %140 = arith.truncf %139 : vector<16x128xf32> to vector<16x128xbf16>
    %c2_149 = arith.constant 2 : index
    %c0_150 = arith.constant 0 : index
    %c0_151 = arith.constant 0 : index
    %141 = vector.load %arg7[%c2_149, %c0_150, %c0_151] : memref<6x6x128xf32, #tpu.memory_space<vmem>>, vector<4x4x128xf32>
    %142 = vector.shape_cast %141 : vector<4x4x128xf32> to vector<16x128xf32>
    %143 = arith.truncf %142 : vector<16x128xf32> to vector<16x128xbf16>
    %c2_152 = arith.constant 2 : index
    %c1_153 = arith.constant 1 : index
    %c0_154 = arith.constant 0 : index
    %144 = vector.load %arg7[%c2_152, %c1_153, %c0_154] : memref<6x6x128xf32, #tpu.memory_space<vmem>>, vector<4x4x128xf32>
    %145 = vector.shape_cast %144 : vector<4x4x128xf32> to vector<16x128xf32>
    %146 = arith.truncf %145 : vector<16x128xf32> to vector<16x128xbf16>
    %c2_155 = arith.constant 2 : index
    %c2_156 = arith.constant 2 : index
    %c0_157 = arith.constant 0 : index
    %147 = vector.load %arg7[%c2_155, %c2_156, %c0_157] : memref<6x6x128xf32, #tpu.memory_space<vmem>>, vector<4x4x128xf32>
    %148 = vector.shape_cast %147 : vector<4x4x128xf32> to vector<16x128xf32>
    %149 = arith.truncf %148 : vector<16x128xf32> to vector<16x128xbf16>
    %150 = tpu.concatenate %125, %128, %131, %134, %137, %140, %143, %146, %149 in 1 : vector<16x128xbf16>, vector<16x128xbf16>, vector<16x128xbf16>, vector<16x128xbf16>, vector<16x128xbf16>, vector<16x128xbf16>, vector<16x128xbf16>, vector<16x128xbf16>, vector<16x128xbf16> -> vector<16x1152xbf16>
    %c2_158 = arith.constant 2 : index
    %c0_159 = arith.constant 0 : index
    %c0_160 = arith.constant 0 : index
    %151 = vector.load %arg2[%c2_158, %c0_159, %c0_160] : memref<5x1152x128xbf16, #tpu.memory_space<vmem>>, vector<1x1152x128xbf16>
    %152 = vector.shape_cast %151 : vector<1x1152x128xbf16> to vector<1152x128xbf16>
    %cst_161 = arith.constant dense<0.000000e+00> : vector<16x128xf32>
    %153 = tpu.matmul %150, %152, %cst_161 {dimension_numbers = #tpu.dot_dimension_numbers<[1], [0], [0], [1], [0, 0, 1, 1], [], []>} : vector<16x1152xbf16>, vector<1152x128xbf16>, vector<16x128xf32> -> vector<16x128xf32>
    %c2_162 = arith.constant 2 : index
    %c0_163 = arith.constant 0 : index
    %c0_164 = arith.constant 0 : index
    %154 = vector.load %arg3[%c2_162, %c0_163, %c0_164] : memref<5x1x128xf32, #tpu.memory_space<vmem>>, vector<1x1x128xf32>
    %155 = vector.shape_cast %154 : vector<1x1x128xf32> to vector<1x128xf32>
    %156 = vector.broadcast %155 : vector<1x128xf32> to vector<16x128xf32>
    %157 = arith.addf %153, %156 : vector<16x128xf32>
    %cst_165 = arith.constant 0.000000e+00 : f32
    %158 = vector.broadcast %cst_165 : f32 to vector<16x128xf32>
    %159 = arith.maximumf %157, %158 : vector<16x128xf32>
    %160 = arith.truncf %159 : vector<16x128xf32> to vector<16x128xbf16>
    %161 = vector.shape_cast %160 : vector<16x128xbf16> to vector<4x4x128xbf16>
    %162 = arith.extf %161 : vector<4x4x128xbf16> to vector<4x4x128xf32>
    %c1_166 = arith.constant 1 : index
    %c1_167 = arith.constant 1 : index
    %c0_168 = arith.constant 0 : index
    %163 = vector.load %arg8[%c1_166, %c1_167, %c0_168] : memref<6x6x128xf32, #tpu.memory_space<vmem>>, vector<4x4x128xf32>
    tpu.vector_store %arg8[%c1_166, %c1_167, %c0_168], %162 {strides = array<i32>} : memref<6x6x128xf32, #tpu.memory_space<vmem>>, vector<4x4x128xf32>,
    %c0_169 = arith.constant 0 : index
    %c0_170 = arith.constant 0 : index
    %c0_171 = arith.constant 0 : index
    %164 = vector.load %arg8[%c0_169, %c0_170, %c0_171] : memref<6x6x128xf32, #tpu.memory_space<vmem>>, vector<4x4x128xf32>
    %165 = vector.shape_cast %164 : vector<4x4x128xf32> to vector<16x128xf32>
    %166 = arith.truncf %165 : vector<16x128xf32> to vector<16x128xbf16>
    %c0_172 = arith.constant 0 : index
    %c1_173 = arith.constant 1 : index
    %c0_174 = arith.constant 0 : index
    %167 = vector.load %arg8[%c0_172, %c1_173, %c0_174] : memref<6x6x128xf32, #tpu.memory_space<vmem>>, vector<4x4x128xf32>
    %168 = vector.shape_cast %167 : vector<4x4x128xf32> to vector<16x128xf32>
    %169 = arith.truncf %168 : vector<16x128xf32> to vector<16x128xbf16>
    %c0_175 = arith.constant 0 : index
    %c2_176 = arith.constant 2 : index
    %c0_177 = arith.constant 0 : index
    %170 = vector.load %arg8[%c0_175, %c2_176, %c0_177] : memref<6x6x128xf32, #tpu.memory_space<vmem>>, vector<4x4x128xf32>
    %171 = vector.shape_cast %170 : vector<4x4x128xf32> to vector<16x128xf32>
    %172 = arith.truncf %171 : vector<16x128xf32> to vector<16x128xbf16>
    %c1_178 = arith.constant 1 : index
    %c0_179 = arith.constant 0 : index
    %c0_180 = arith.constant 0 : index
    %173 = vector.load %arg8[%c1_178, %c0_179, %c0_180] : memref<6x6x128xf32, #tpu.memory_space<vmem>>, vector<4x4x128xf32>
    %174 = vector.shape_cast %173 : vector<4x4x128xf32> to vector<16x128xf32>
    %175 = arith.truncf %174 : vector<16x128xf32> to vector<16x128xbf16>
    %c1_181 = arith.constant 1 : index
    %c1_182 = arith.constant 1 : index
    %c0_183 = arith.constant 0 : index
    %176 = vector.load %arg8[%c1_181, %c1_182, %c0_183] : memref<6x6x128xf32, #tpu.memory_space<vmem>>, vector<4x4x128xf32>
    %177 = vector.shape_cast %176 : vector<4x4x128xf32> to vector<16x128xf32>
    %178 = arith.truncf %177 : vector<16x128xf32> to vector<16x128xbf16>
    %c1_184 = arith.constant 1 : index
    %c2_185 = arith.constant 2 : index
    %c0_186 = arith.constant 0 : index
    %179 = vector.load %arg8[%c1_184, %c2_185, %c0_186] : memref<6x6x128xf32, #tpu.memory_space<vmem>>, vector<4x4x128xf32>
    %180 = vector.shape_cast %179 : vector<4x4x128xf32> to vector<16x128xf32>
    %181 = arith.truncf %180 : vector<16x128xf32> to vector<16x128xbf16>
    %c2_187 = arith.constant 2 : index
    %c0_188 = arith.constant 0 : index
    %c0_189 = arith.constant 0 : index
    %182 = vector.load %arg8[%c2_187, %c0_188, %c0_189] : memref<6x6x128xf32, #tpu.memory_space<vmem>>, vector<4x4x128xf32>
    %183 = vector.shape_cast %182 : vector<4x4x128xf32> to vector<16x128xf32>
    %184 = arith.truncf %183 : vector<16x128xf32> to vector<16x128xbf16>
    %c2_190 = arith.constant 2 : index
    %c1_191 = arith.constant 1 : index
    %c0_192 = arith.constant 0 : index
    %185 = vector.load %arg8[%c2_190, %c1_191, %c0_192] : memref<6x6x128xf32, #tpu.memory_space<vmem>>, vector<4x4x128xf32>
    %186 = vector.shape_cast %185 : vector<4x4x128xf32> to vector<16x128xf32>
    %187 = arith.truncf %186 : vector<16x128xf32> to vector<16x128xbf16>
    %c2_193 = arith.constant 2 : index
    %c2_194 = arith.constant 2 : index
    %c0_195 = arith.constant 0 : index
    %188 = vector.load %arg8[%c2_193, %c2_194, %c0_195] : memref<6x6x128xf32, #tpu.memory_space<vmem>>, vector<4x4x128xf32>
    %189 = vector.shape_cast %188 : vector<4x4x128xf32> to vector<16x128xf32>
    %190 = arith.truncf %189 : vector<16x128xf32> to vector<16x128xbf16>
    %191 = tpu.concatenate %166, %169, %172, %175, %178, %181, %184, %187, %190 in 1 : vector<16x128xbf16>, vector<16x128xbf16>, vector<16x128xbf16>, vector<16x128xbf16>, vector<16x128xbf16>, vector<16x128xbf16>, vector<16x128xbf16>, vector<16x128xbf16>, vector<16x128xbf16> -> vector<16x1152xbf16>
    %c3_196 = arith.constant 3 : index
    %c0_197 = arith.constant 0 : index
    %c0_198 = arith.constant 0 : index
    %192 = vector.load %arg2[%c3_196, %c0_197, %c0_198] : memref<5x1152x128xbf16, #tpu.memory_space<vmem>>, vector<1x1152x128xbf16>
    %193 = vector.shape_cast %192 : vector<1x1152x128xbf16> to vector<1152x128xbf16>
    %cst_199 = arith.constant dense<0.000000e+00> : vector<16x128xf32>
    %194 = tpu.matmul %191, %193, %cst_199 {dimension_numbers = #tpu.dot_dimension_numbers<[1], [0], [0], [1], [0, 0, 1, 1], [], []>} : vector<16x1152xbf16>, vector<1152x128xbf16>, vector<16x128xf32> -> vector<16x128xf32>
    %c3_200 = arith.constant 3 : index
    %c0_201 = arith.constant 0 : index
    %c0_202 = arith.constant 0 : index
    %195 = vector.load %arg3[%c3_200, %c0_201, %c0_202] : memref<5x1x128xf32, #tpu.memory_space<vmem>>, vector<1x1x128xf32>
    %196 = vector.shape_cast %195 : vector<1x1x128xf32> to vector<1x128xf32>
    %197 = vector.broadcast %196 : vector<1x128xf32> to vector<16x128xf32>
    %198 = arith.addf %194, %197 : vector<16x128xf32>
    %cst_203 = arith.constant 0.000000e+00 : f32
    %199 = vector.broadcast %cst_203 : f32 to vector<16x128xf32>
    %200 = arith.maximumf %198, %199 : vector<16x128xf32>
    %201 = arith.truncf %200 : vector<16x128xf32> to vector<16x128xbf16>
    %202 = vector.shape_cast %201 : vector<16x128xbf16> to vector<4x4x128xbf16>
    %203 = arith.extf %202 : vector<4x4x128xbf16> to vector<4x4x128xf32>
    %c1_204 = arith.constant 1 : index
    %c1_205 = arith.constant 1 : index
    %c0_206 = arith.constant 0 : index
    %204 = vector.load %arg9[%c1_204, %c1_205, %c0_206] : memref<6x6x128xf32, #tpu.memory_space<vmem>>, vector<4x4x128xf32>
    tpu.vector_store %arg9[%c1_204, %c1_205, %c0_206], %203 {strides = array<i32>} : memref<6x6x128xf32, #tpu.memory_space<vmem>>, vector<4x4x128xf32>,
    %c0_207 = arith.constant 0 : index
    %c0_208 = arith.constant 0 : index
    %c0_209 = arith.constant 0 : index
    %205 = vector.load %arg9[%c0_207, %c0_208, %c0_209] : memref<6x6x128xf32, #tpu.memory_space<vmem>>, vector<4x4x128xf32>
    %206 = vector.shape_cast %205 : vector<4x4x128xf32> to vector<16x128xf32>
    %207 = arith.truncf %206 : vector<16x128xf32> to vector<16x128xbf16>
    %c0_210 = arith.constant 0 : index
    %c1_211 = arith.constant 1 : index
    %c0_212 = arith.constant 0 : index
    %208 = vector.load %arg9[%c0_210, %c1_211, %c0_212] : memref<6x6x128xf32, #tpu.memory_space<vmem>>, vector<4x4x128xf32>
    %209 = vector.shape_cast %208 : vector<4x4x128xf32> to vector<16x128xf32>
    %210 = arith.truncf %209 : vector<16x128xf32> to vector<16x128xbf16>
    %c0_213 = arith.constant 0 : index
    %c2_214 = arith.constant 2 : index
    %c0_215 = arith.constant 0 : index
    %211 = vector.load %arg9[%c0_213, %c2_214, %c0_215] : memref<6x6x128xf32, #tpu.memory_space<vmem>>, vector<4x4x128xf32>
    %212 = vector.shape_cast %211 : vector<4x4x128xf32> to vector<16x128xf32>
    %213 = arith.truncf %212 : vector<16x128xf32> to vector<16x128xbf16>
    %c1_216 = arith.constant 1 : index
    %c0_217 = arith.constant 0 : index
    %c0_218 = arith.constant 0 : index
    %214 = vector.load %arg9[%c1_216, %c0_217, %c0_218] : memref<6x6x128xf32, #tpu.memory_space<vmem>>, vector<4x4x128xf32>
    %215 = vector.shape_cast %214 : vector<4x4x128xf32> to vector<16x128xf32>
    %216 = arith.truncf %215 : vector<16x128xf32> to vector<16x128xbf16>
    %c1_219 = arith.constant 1 : index
    %c1_220 = arith.constant 1 : index
    %c0_221 = arith.constant 0 : index
    %217 = vector.load %arg9[%c1_219, %c1_220, %c0_221] : memref<6x6x128xf32, #tpu.memory_space<vmem>>, vector<4x4x128xf32>
    %218 = vector.shape_cast %217 : vector<4x4x128xf32> to vector<16x128xf32>
    %219 = arith.truncf %218 : vector<16x128xf32> to vector<16x128xbf16>
    %c1_222 = arith.constant 1 : index
    %c2_223 = arith.constant 2 : index
    %c0_224 = arith.constant 0 : index
    %220 = vector.load %arg9[%c1_222, %c2_223, %c0_224] : memref<6x6x128xf32, #tpu.memory_space<vmem>>, vector<4x4x128xf32>
    %221 = vector.shape_cast %220 : vector<4x4x128xf32> to vector<16x128xf32>
    %222 = arith.truncf %221 : vector<16x128xf32> to vector<16x128xbf16>
    %c2_225 = arith.constant 2 : index
    %c0_226 = arith.constant 0 : index
    %c0_227 = arith.constant 0 : index
    %223 = vector.load %arg9[%c2_225, %c0_226, %c0_227] : memref<6x6x128xf32, #tpu.memory_space<vmem>>, vector<4x4x128xf32>
    %224 = vector.shape_cast %223 : vector<4x4x128xf32> to vector<16x128xf32>
    %225 = arith.truncf %224 : vector<16x128xf32> to vector<16x128xbf16>
    %c2_228 = arith.constant 2 : index
    %c1_229 = arith.constant 1 : index
    %c0_230 = arith.constant 0 : index
    %226 = vector.load %arg9[%c2_228, %c1_229, %c0_230] : memref<6x6x128xf32, #tpu.memory_space<vmem>>, vector<4x4x128xf32>
    %227 = vector.shape_cast %226 : vector<4x4x128xf32> to vector<16x128xf32>
    %228 = arith.truncf %227 : vector<16x128xf32> to vector<16x128xbf16>
    %c2_231 = arith.constant 2 : index
    %c2_232 = arith.constant 2 : index
    %c0_233 = arith.constant 0 : index
    %229 = vector.load %arg9[%c2_231, %c2_232, %c0_233] : memref<6x6x128xf32, #tpu.memory_space<vmem>>, vector<4x4x128xf32>
    %230 = vector.shape_cast %229 : vector<4x4x128xf32> to vector<16x128xf32>
    %231 = arith.truncf %230 : vector<16x128xf32> to vector<16x128xbf16>
    %232 = tpu.concatenate %207, %210, %213, %216, %219, %222, %225, %228, %231 in 1 : vector<16x128xbf16>, vector<16x128xbf16>, vector<16x128xbf16>, vector<16x128xbf16>, vector<16x128xbf16>, vector<16x128xbf16>, vector<16x128xbf16>, vector<16x128xbf16>, vector<16x128xbf16> -> vector<16x1152xbf16>
    %c4 = arith.constant 4 : index
    %c0_234 = arith.constant 0 : index
    %c0_235 = arith.constant 0 : index
    %233 = vector.load %arg2[%c4, %c0_234, %c0_235] : memref<5x1152x128xbf16, #tpu.memory_space<vmem>>, vector<1x1152x128xbf16>
    %234 = vector.shape_cast %233 : vector<1x1152x128xbf16> to vector<1152x128xbf16>
    %cst_236 = arith.constant dense<0.000000e+00> : vector<16x128xf32>
    %235 = tpu.matmul %232, %234, %cst_236 {dimension_numbers = #tpu.dot_dimension_numbers<[1], [0], [0], [1], [0, 0, 1, 1], [], []>} : vector<16x1152xbf16>, vector<1152x128xbf16>, vector<16x128xf32> -> vector<16x128xf32>
    %c4_237 = arith.constant 4 : index
    %c0_238 = arith.constant 0 : index
    %c0_239 = arith.constant 0 : index
    %236 = vector.load %arg3[%c4_237, %c0_238, %c0_239] : memref<5x1x128xf32, #tpu.memory_space<vmem>>, vector<1x1x128xf32>
    %237 = vector.shape_cast %236 : vector<1x1x128xf32> to vector<1x128xf32>
    %238 = vector.broadcast %237 : vector<1x128xf32> to vector<16x128xf32>
    %239 = arith.addf %235, %238 : vector<16x128xf32>
    %cst_240 = arith.constant 0.000000e+00 : f32
    %240 = vector.broadcast %cst_240 : f32 to vector<16x128xf32>
    %241 = arith.maximumf %239, %240 : vector<16x128xf32>
    %242 = arith.truncf %241 : vector<16x128xf32> to vector<16x128xbf16>
    %243 = vector.shape_cast %242 : vector<16x128xbf16> to vector<1x4x4x128xbf16>
    %c0_241 = arith.constant 0 : index
    %c0_242 = arith.constant 0 : index
    %c0_243 = arith.constant 0 : index
    %c0_244 = arith.constant 0 : index
    %244 = vector.load %arg5[%c0_241, %c0_242, %c0_243, %c0_244] : memref<1x4x4x128xbf16, #tpu.memory_space<vmem>>, vector<1x4x4x128xbf16>
    tpu.vector_store %arg5[%c0_241, %c0_242, %c0_243, %c0_244], %243 {strides = array<i32>} : memref<1x4x4x128xbf16, #tpu.memory_space<vmem>>, vector<1x4x4x128xbf16>,
    return
  }
  func.func @transform_0(%arg0: i32) -> (i32, i32, i32, i32, i32) {
    %c0_i32 = arith.constant 0 : i32
    %c0_i32_0 = arith.constant 0 : i32
    %c0_i32_1 = arith.constant 0 : i32
    %c0_i32_2 = arith.constant 0 : i32
    %c0_i32_3 = arith.constant 0 : i32
    return %arg0, %c0_i32, %c0_i32_0, %c0_i32_1, %c0_i32_2 : i32, i32, i32, i32, i32
  }
  func.func @transform_1(%arg0: i32) -> (i32, i32, i32) {
    %c0_i32 = arith.constant 0 : i32
    %c0_i32_0 = arith.constant 0 : i32
    %c0_i32_1 = arith.constant 0 : i32
    %c0_i32_2 = arith.constant 0 : i32
    return %c0_i32, %c0_i32_0, %c0_i32_1 : i32, i32, i32
  }
  func.func @transform_2(%arg0: i32) -> (i32, i32, i32) {
    %c0_i32 = arith.constant 0 : i32
    %c0_i32_0 = arith.constant 0 : i32
    %c0_i32_1 = arith.constant 0 : i32
    %c0_i32_2 = arith.constant 0 : i32
    return %c0_i32, %c0_i32_0, %c0_i32_1 : i32, i32, i32
  }
  func.func @transform_3(%arg0: i32) -> (i32, i32) {
    %c0_i32 = arith.constant 0 : i32
    %c0_i32_0 = arith.constant 0 : i32
    %c0_i32_1 = arith.constant 0 : i32
    return %c0_i32, %c0_i32_0 : i32, i32
  }
  func.func @transform_4(%arg0: i32) -> (i32, i32, i32, i32) {
    %c0_i32 = arith.constant 0 : i32
    %c0_i32_0 = arith.constant 0 : i32
    %c0_i32_1 = arith.constant 0 : i32
    %c0_i32_2 = arith.constant 0 : i32
    return %arg0, %c0_i32, %c0_i32_0, %c0_i32_1 : i32, i32, i32, i32
  }
}

</mosaic_0001>

<bundles_post_ra>
// kernel: stagenet_forward.1
= control target key start
LH: loop header
LB: loop body
LE: loop exit
PB: predicated region body
PF: predicated region fallthrough
CT: control target
= control target key end

     0   :  { %9 = vsyncpa [#allocation7], 0  ;;  %s8123_s0 = inlined_call_operand.vmem [shape: bf16[2,4,9,9,128], index: 0, kind: input, shape index: {}]   ;;  %s8124_s1 = inlined_call_operand.hbm [shape: bf16[5,1152,128], index: 1, kind: input, shape index: {}]   ;;  %s8125_s2 = inlined_call_operand.hbm [shape: f32[5,1,128], index: 2, kind: input, shape index: {}]   ;;  %s8126_s3 = inlined_call_operand.hbm [shape: bf16[64,64], index: 3, kind: input, shape index: {}]   ;;  %s8127_s4 = inlined_call_operand.vmem [shape: bf16[2,4,4,128], index: 4, kind: output, shape index: {}]  }
   0x1   :  { %10 = vsyncpa [#allocation9], 0  ;;  %s7715_s15 = smov 0  }
   0x2 LB: > { %s7680_s16 = smov [#allocation8]   ;;  %s7721_s18 = sadd.s32 4294967295, %s7678_s15   ;;  %s7678_s15 = sphi %s7715_s15, %s16_s15  }
   0x3   : > { %s161_s17 = sshll.u32 %s7680_s16, 4  ;;  %p5895_p0 = scmp.ge.s32.totalorder %s7678_s15, 1  ;;  %s7730_s17 = int_to_ptr.vmem [resolvable:$true] %s161_s17 }
   0x4   : > { %p136_p1 = scmp.lt.s32.totalorder %s7678_s15, 3  ;;  %p8128_p2 = scmp.eq.s32.totalorder %s7721_s18, 0 }
   0x5   : > { %s7681_s20 = smov [#allocation6]   ;;  %s7682_s23 = smov [#allocation10]  }
   0x6   : > { %p7726_p3 = pnand %p5895_p0, %p136_p1  ;;  %s148_s21 = sshll.u32 %s7681_s20, 4  ;;  %s7734_s21 = int_to_ptr.vmem [resolvable:$true] %s148_s21 }
   0x7   : > { %s7742_s24 = sshll.u32 %s7682_s23, 4  ;;  %s7580_s27 = scalar_lea.hbm %s8125_s2, 80  ;;  %s175_s24 = int_to_ptr.vmem [resolvable:$true] %s7742_s24 }
   0x8   : > { %s8130_s19 = scalar_select %p7726_p3, 1, 0 }
   0x9   : > { %p7086_p4 = pneg %p7726_p3  ;;  %p7581_p6 = scmp.ne.s32.totalorder %s8125_s2, %s7580_s27 }
   0xa   : > { %p7587_p10 = scmp.lt.u32.totalorder %s7580_s27, %s8125_s2 }
   0xb   : > { %p7738_p5 = pnand %p8128_p2, %p7086_p4 }
   0xd   : > { %p7752_p7 = pneg %p7738_p5 }
   0xf   : > { %p7583_p8 = pnand %p7752_p7, %p7581_p6 }
  0x11   : > { %p7584_p9 = pneg %p7583_p8 }
  0x13   : > { %p7589_p11 = pnand %p7587_p10, %p7584_p9 }
  0x15   : > { %7592 = shalt.err (!%p7589_p11)
}
  0x16   : > { %s7593_s7 = scalar_lea.vmem %s7730_s17, 80  ;;  %s7600_s8 = scalar_lea.vmem %s7730_s17, 96 }
  0x17   : > { %p7594_p12 = scmp.ne.s32.totalorder %s7730_s17, %s7593_s7  ;;  %p7601_p1 = scmp.lt.s32.totalorder %s7730_s17, %s7730_s17 }
  0x18   : > { %p7602_p4 = scmp.lt.s32.totalorder %s7600_s8, %s7593_s7 }
  0x19   : > { %p7596_p13 = pnand %p7594_p12, %p7752_p7 }
  0x1a   : > { %p7603_p6 = por %p7602_p4, %p7601_p1 }
  0x1b   : > { %p7597_p0 = pneg %p7596_p13 }
  0x1d   : > { %p7604_p8 = pnand %p7603_p6, %p7597_p0 }
  0x1f   : > { %7607 = shalt.err (!%p7604_p8)
}
  0x20   : > { %s7683_s9 = smov 16   ;;  %s7684_s10 = smov 1  }
  0x21   : > { %7092 = dma.hbm_to_vmem [thread:$0]  (!%p7738_p5), %s8125_s2, 80, %s7730_s17, [#allocation9], %s7683_s9, %s7683_s9, %s7684_s10  }
  0x22   : > { %s7608_s16 = scalar_lea.hbm %s8124_s1, 46080 }
  0x23   : > { %p7609_p9 = scmp.ne.s32.totalorder %s8124_s1, %s7608_s16  ;;  %p7615_p12 = scmp.lt.u32.totalorder %s7608_s16, %s8124_s1 }
  0x25   : > { %p7611_p10 = pnand %p7609_p9, %p7752_p7 }
  0x27   : > { %p7612_p11 = pneg %p7611_p10 }
  0x29   : > { %p7617_p13 = pnand %p7615_p12, %p7612_p11 }
  0x2b   : > { %7620 = shalt.err (!%p7617_p13)
}
  0x2c   : > { %s7621_s17 = scalar_lea.vmem %s7734_s21, 46080  ;;  %p7629_p6 = scmp.lt.s32.totalorder %s7734_s21, %s7734_s21 }
  0x2d   : > { %p7622_p0 = scmp.ne.s32.totalorder %s7734_s21, %s7621_s17  ;;  %p7630_p8 = scmp.lt.s32.totalorder %s7621_s17, %s7621_s17 }
  0x2f   : > { %p7624_p1 = pnand %p7622_p0, %p7752_p7  ;;  %p7631_p9 = por %p7630_p8, %p7629_p6 }
  0x31   : > { %p7625_p4 = pneg %p7624_p1 }
  0x33   : > { %p7632_p10 = pnand %p7631_p9, %p7625_p4 }
  0x35   : > { %7635 = shalt.err (!%p7632_p10)
}
  0x36   : > { %s7685_s27 = smov 64   ;;  %s7686_s28 = smov 4  }
  0x37   : > { %7089 = dma.hbm_to_vmem [thread:$0]  (!%p7738_p5), %s8124_s1, 46080, %s7734_s21, [#allocation7], %s7685_s27, %s7685_s27, %s7686_s28  }
  0x38   : > { %s7636_s8 = scalar_lea.hbm %s8126_s3, 512 }
  0x39   : > { %p7637_p11 = scmp.ne.s32.totalorder %s8126_s3, %s7636_s8  ;;  %p7643_p0 = scmp.lt.u32.totalorder %s7636_s8, %s8126_s3 }
  0x3b   : > { %p7639_p12 = pnand %p7637_p11, %p7752_p7 }
  0x3d   : > { %p7640_p13 = pneg %p7639_p12 }
  0x3f   : > { %p7645_p1 = pnand %p7643_p0, %p7640_p13 }
  0x41   : > { %7648 = shalt.err (!%p7645_p1)
}
  0x42   : > { %s7649_s13 = scalar_lea.vmem %s175_s24, 512  ;;  %p7657_p9 = scmp.lt.s32.totalorder %s175_s24, %s175_s24 }
  0x43   : > { %p7650_p4 = scmp.ne.s32.totalorder %s175_s24, %s7649_s13  ;;  %p7658_p10 = scmp.lt.s32.totalorder %s7649_s13, %s7649_s13 }
  0x45   : > { %p7652_p6 = pnand %p7650_p4, %p7752_p7  ;;  %p7659_p2 = por %p7658_p10, %p7657_p9 }
  0x47   : > { %p7653_p8 = pneg %p7652_p6 }
  0x49   : > { %p7660_p3 = pnand %p7659_p2, %p7653_p8 }
  0x4b   : > { %7663 = shalt.err (!%p7660_p3)
}
  0x4c   : > { %7095 = dma.hbm_to_vmem [thread:$0]  (!%p7738_p5), %s8126_s3, 512, %s175_s24, [#allocation9], %s7685_s27, %s7685_s27, %s7686_s28  }
  0x4d   : > { %p8133_p11 = scmp.ne.s32.totalorder %s8130_s19, 0 }
  0x4e   : > { %p8134_p12 = scmp.eq.s32.totalorder (!%p8133_p11), %s7721_s18, 0 }
  0x4f   : > { %198 = sbr.rel (%p8133_p11) target bundleno = 1862 (0x746), region = 36 }
  0x56   : > { %7669 = dma.done.wait (%p8134_p12), [#allocation7], 46080   ;;  %p8135_p7 = pmov %p8134_p12 }
  0x58   : > { %7671 = vsyncadd (%p8135_p7), [#allocation7], 4294921216  ;;  %p8136_p13 = pmov %p8135_p7 }
  0x59   : > { %p8137_p2 = pmov %p8135_p7 }
  0x5a   : > { %7673 = dma.done.wait (%p8136_p13), [#allocation9], 592  }
  0x5b   : > { %7675 = vsyncadd (%p8137_p2), [#allocation9], 4294966704  ;;  %v7687_v0 = vmov 0.0   ;;  %v7120_v1 = vld [vmem:[#allocation6 + $0x40] sm:$0xff]   ;;  %v7124_v5 = vld [vmem:[#allocation6 + $0x48] sm:$0xff]   ;;  %p232_p3 = scmp.lt.s32.totalorder %s7721_s18, 1 }
  0x5c   : > { %244 = vst [vmem:[#allocation2 + $0x8] sm:$0x1f] %v7687_v0  ;;  %245 = vst [vmem:[#allocation2 + $0x10] sm:$0x1f] %v7687_v0  ;;  %v7121_v2 = vld [vmem:[#allocation6] sm:$0xff]   ;;  %6385 = vmatprep.subr.bf16.mxu0 %v7120_v1  ;;  %v7125_v6 = vld [vmem:[#allocation6 + $0x8] sm:$0xff]  }
  0x5d   : > { %246 = vst [vmem:[#allocation2 + $0x18] sm:$0x1f] %v7687_v0  ;;  %247 = vst [vmem:[#allocation2 + $0x20] sm:$0x1f] %v7687_v0  ;;  %v7122_v3 = vld [vmem:[#allocation6 + $0xc0] sm:$0xff]   ;;  %6386 = vmatpush3.bf16.msra.mxu0 %v7121_v2  ;;  %v7126_v7 = vld [vmem:[#allocation6 + $0xc8] sm:$0xff]  }
  0x5e   : > { %249 = vst [vmem:[#allocation2 + $0x30] sm:$0x1f] %v7687_v0  ;;  %250 = vst [vmem:[#allocation2 + $0x38] sm:$0x1f] %v7687_v0  ;;  %v7123_v4 = vld [vmem:[#allocation6 + $0x80] sm:$0xff]   ;;  %6425 = vmatprep.subr.bf16.mxu1 %v7122_v3  ;;  %6387 = vmatprep.subr.bf16.mxu0 %v7124_v5  ;;  %v7127_v8 = vld [vmem:[#allocation6 + $0x88] sm:$0xff]  }
  0x5f   : > { %251 = vst [vmem:[#allocation2 + $0x40] sm:$0x1f] %v7687_v0  ;;  %252 = vst [vmem:[#allocation2 + $0x48] sm:$0x1f] %v7687_v0  ;;  %6426 = vmatpush3.bf16.msra.mxu1 %v7123_v4  ;;  %v7128_v9 = vld [vmem:[#allocation6 + $0x50] sm:$0xff]   ;;  %v7132_v13 = vld [vmem:[#allocation6 + $0x58] sm:$0xff]  }
  0x60   : > { %253 = vst [vmem:[#allocation2 + $0x50] sm:$0x1f] %v7687_v0  ;;  %254 = vst [vmem:[#allocation2 + $0x58] sm:$0x1f] %v7687_v0  ;;  %6427 = vmatprep.subr.bf16.mxu1 %v7126_v7  ;;  %v7129_v10 = vld [vmem:[#allocation6 + $0x10] sm:$0xff]   ;;  %v7133_v14 = vld [vmem:[#allocation6 + $0x18] sm:$0xff]  }
  0x61   : > { %255 = vst [vmem:[#allocation2 + $0x60] sm:$0x1f] %v7687_v0  ;;  %256 = vst [vmem:[#allocation2 + $0x68] sm:$0x1f] %v7687_v0  ;;  %6388 = vmatpush3.bf16.msra.mxu0 %v7125_v6  ;;  %v7130_v11 = vld [vmem:[#allocation6 + $0xd0] sm:$0xff]   ;;  %v7134_v15 = vld [vmem:[#allocation6 + $0xd8] sm:$0xff]  }
  0x62   : > { %257 = vst [vmem:[#allocation2 + $0x70] sm:$0x1f] %v7687_v0  ;;  %258 = vst [vmem:[#allocation2 + $0x78] sm:$0x1f] %v7687_v0  ;;  %6389 = vmatprep.subr.bf16.mxu0 %v7128_v9  ;;  %v7131_v12 = vld [vmem:[#allocation6 + $0x90] sm:$0xff]   ;;  %v7135_v16 = vld [vmem:[#allocation6 + $0x98] sm:$0xff]  }
  0x63   : > { %259 = vst [vmem:[#allocation2 + $0x80] sm:$0x1f] %v7687_v0  ;;  %260 = vst [vmem:[#allocation2 + $0x88] sm:$0x1f] %v7687_v0  ;;  %6428 = vmatpush3.bf16.msra.mxu1 %v7127_v8  ;;  %v7136_v17 = vld [vmem:[#allocation6 + $0x60] sm:$0xff]   ;;  %v7140_v21 = vld [vmem:[#allocation6 + $0x68] sm:$0xff]  }
  0x64   : > { %261 = vst [vmem:[#allocation2 + $0x90] sm:$0x1f] %v7687_v0  ;;  %262 = vst [vmem:[#allocation2 + $0x98] sm:$0x1f] %v7687_v0  ;;  %6429 = vmatprep.subr.bf16.mxu1 %v7130_v11  ;;  %v7137_v18 = vld [vmem:[#allocation6 + $0x20] sm:$0xff]   ;;  %v7141_v22 = vld [vmem:[#allocation6 + $0x28] sm:$0xff]  }
  0x65   : > { %263 = vst [vmem:[#allocation3] sm:$0x3f] %v7687_v0  ;;  %264 = vst [vmem:[#allocation3 + $0x8] sm:$0x3f] %v7687_v0  ;;  %6390 = vmatpush3.bf16.msra.mxu0 %v7129_v10  ;;  %v7138_v19 = vld [vmem:[#allocation6 + $0xe0] sm:$0xff]   ;;  %v7142_v23 = vld [vmem:[#allocation6 + $0xe8] sm:$0xff]  }
  0x66   : > { %265 = vst [vmem:[#allocation3 + $0x10] sm:$0x3f] %v7687_v0  ;;  %266 = vst [vmem:[#allocation3 + $0x18] sm:$0x3f] %v7687_v0  ;;  %6391 = vmatprep.subr.bf16.mxu0 %v7132_v13  ;;  %v7139_v20 = vld [vmem:[#allocation6 + $0xa0] sm:$0xff]   ;;  %s8141_s18 = smov (!%p232_p3, %s7721_s18), 1 }
  0x67   : > { %267 = vst [vmem:[#allocation3 + $0x20] sm:$0x3f] %v7687_v0  ;;  %268 = vst [vmem:[#allocation3 + $0x28] sm:$0x3f] %v7687_v0  ;;  %6430 = vmatpush3.bf16.msra.mxu1 %v7131_v12  ;;  %v7143_v24 = vld [vmem:[#allocation6 + $0xa8] sm:$0xff]   ;;  %v7144_v25 = vld [vmem:[#allocation6 + $0x70] sm:$0xff]  }
  0x68   : > { %269 = vst [vmem:[#allocation4] sm:$0x3f] %v7687_v0  ;;  %270 = vst [vmem:[#allocation4 + $0x8] sm:$0x3f] %v7687_v0  ;;  %6431 = vmatprep.subr.bf16.mxu1 %v7134_v15  ;;  %v7145_v26 = vld [vmem:[#allocation6 + $0x30] sm:$0xff]   ;;  %s7073_s19 = smul.u32 288, %s8141_s18 }
  0x69   : > { %271 = vst [vmem:[#allocation4 + $0x10] sm:$0x3f] %v7687_v0  ;;  %272 = vst [vmem:[#allocation4 + $0x18] sm:$0x3f] %v7687_v0  ;;  %6392 = vmatpush3.bf16.msra.mxu0 %v7133_v14  ;;  %v7146_v27 = vld [vmem:[#allocation6 + $0xf0] sm:$0xff]   ;;  %v7148_v29 = vld [vmem:[#allocation6 + $0x78] sm:$0xff]  }
  0x6a   : > { %273 = vst [vmem:[#allocation4 + $0x20] sm:$0x3f] %v7687_v0  ;;  %274 = vst [vmem:[#allocation4 + $0x28] sm:$0x3f] %v7687_v0  ;;  %6393 = vmatprep.subr.bf16.mxu0 %v7136_v17  ;;  %v7147_v28 = vld [vmem:[#allocation6 + $0xb0] sm:$0xff]   ;;  %v7149_v30 = vld [vmem:[#allocation6 + $0x38] sm:$0xff]   ;;  %s7870_s30 = scalar_lea.vmem %s8123_s0, %s7073_s19 }
  0x6b   : > { %275 = vst [vmem:[#allocation5] sm:$0x3f] %v7687_v0  ;;  %276 = vst [vmem:[#allocation5 + $0x8] sm:$0x3f] %v7687_v0  ;;  %6432 = vmatpush3.bf16.msra.mxu1 %v7135_v16  ;;  %v7150_v31 = vld [vmem:[#allocation6 + $0xf8] sm:$0xff]   ;;  %v7154_v41 = vld [vmem:[#allocation6 + $0x140] sm:$0xff]  }
  0x6c   : > { %277 = vst [vmem:[#allocation5 + $0x10] sm:$0x3f] %v7687_v0  ;;  %278 = vst [vmem:[#allocation5 + $0x18] sm:$0x3f] %v7687_v0  ;;  %6433 = vmatprep.subr.bf16.mxu1 %v7138_v19  ;;  %v7151_v32 = vld [vmem:[%s7870_s30 + $0x48] ss:$8 sps:$4 sm:$0xff]  }
  0x6d   : > { %279 = vst [vmem:[#allocation5 + $0x20] sm:$0x3f] %v7687_v0  ;;  %280 = vst [vmem:[#allocation5 + $0x28] sm:$0x3f] %v7687_v0  ;;  %6394 = vmatpush3.bf16.msra.mxu0 %v7137_v18  ;;  %v7152_v33 = vld [vmem:[#allocation6 + $0xb8] sm:$0xff]   ;;  %1504 = vmatprep.mubr.bf16.mxu0 %v7151_v32  ;;  %v7156_v49 = vld [vmem:[#allocation6 + $0x100] sm:$0xff]  }
  0x6e   : > { %6395 = vmatprep.subr.bf16.mxu0 %v7140_v21  ;;  %v281_v34 = vld [vmem:[%s7870_s30] sm:$0xf]  ;;  %v282_v35 = vld [vmem:[%s7870_s30 + $0x8] sm:$0xf]  ;;  %v7876_v42 = vld [vmem:[%s7870_s30 + $0x90] sm:$0xf] }
  0x6f   : > { %6434 = vmatpush3.bf16.msra.mxu1 %v7139_v20  ;;  %v310_v36 = vshrl.u32 %v281_v34, 16  ;;  %v313_v37 = vshll.u32 %v281_v34, 16  ;;  %v324_v38 = vshrl.u32 %v282_v35, 16  ;;  %v327_v39 = vshll.u32 %v282_v35, 16  ;;  %v7879_v43 = vld [vmem:[%s7870_s30 + $0x98] sm:$0xf] }
  0x70   : > { %6435 = vmatprep.subr.bf16.mxu1 %v7142_v23  ;;  %v5963_v40 = vcombine.low %v281_v34, %v282_v35  ;;  %vm306_vm0 = vsmask.f32 3328  ;;  %vm307_vm1 = vsmask.f32 7440  ;;  %v5975_v48 = vcombine.low %v7876_v42, %v7879_v43  ;;  %v298_v50 = vld [vmem:[%s7870_s30 + $0x4] sm:$0x1] }
  0x71   : > { %6396 = vmatpush3.bf16.msra.mxu0 %v7141_v22  ;;  %v312_v44 = vrot.slane %v310_v36, 4  ;;  %v315_v45 = vrot.slane %v313_v37, 5  ;;  %v326_v46 = vrot.slane %v324_v38, 4  ;;  %v329_v47 = vrot.slane %v327_v39, 5  ;;  %v299_v51 = vld [vmem:[%s7870_s30 + $0xc] sm:$0x1]  ;;  %vm7885_vm2 = vmor %vm306_vm0, %vm307_vm1 }
  0x72   : > { %6397 = vmatprep.subr.bf16.mxu0 %v7144_v25  ;;  %1569 = vmatprep.mubr.bf16.mxu1 %v5975_v48  ;;  %v319_v56 = vshll.u32 %v298_v50, 16  ;;  %v333_v58 = vshll.u32 %v299_v51, 16  ;;  %v7157_v59 = vld [vmem:[#allocation6 + $0x1c0] sm:$0xff]   ;;  %v7159_v62 = vld [vmem:[#allocation6 + $0x148] sm:$0xff]   ;;  %v448_v4 = vshrl.u32 %v7876_v42, 16  ;;  %v451_v8 = vshll.u32 %v7876_v42, 16 }
  0x73   : > { %6436 = vmatpush3.bf16.msra.mxu1 %v7143_v24  ;;  %v316_v52 = vor.u32 %v315_v45, %v312_v44  ;;  %v330_v53 = vor.u32 %v329_v47, %v326_v46  ;;  %v7158_v63 = vld [vmem:[#allocation6 + $0x180] sm:$0xff]   ;;  %v7160_v3 = vld [vmem:[#allocation6 + $0x108] sm:$0xff]   ;;  %v7165_v17 = vld [vmem:[#allocation6 + $0x150] sm:$0xff]   ;;  %vm1837_vm3 = vcmask 523264   ;;  %vm7689_vm4 = vmmov 0   ;;  %s6384_s16 = sshll.u32 %s8141_s18, 3 }
  0x74   : > { %6437 = vmatprep.subr.bf16.mxu1 %v7146_v27  ;;  %v321_v60 = vrot.slane %v319_v56, 5  ;;  %v335_v61 = vrot.slane %v333_v58, 5  ;;  %v7161_v6 = vld [vmem:[#allocation6 + $0x1c8] sm:$0xff]   ;;  %v283_v10 = vld [vmem:[%s7870_s30 + $0x10] sm:$0xf]  ;;  %v7167_v18 = vld [vmem:[#allocation6 + $0x110] sm:$0xff]   ;;  %s241_s25 = scalar_lea.vmem %s8127_s4, %s6384_s16 }
  0x75   : > { %6398 = vmatpush3.bf16.msra.mxu0 %v7145_v26  ;;  %v317_v55 = vrot.slane %v316_v52, 4  ;;  %v331_v57 = vrot.slane %v330_v53, 4  ;;  %v7162_v7 = vld [vmem:[%s7870_s30 + $0x58] ss:$8 sps:$4 sm:$0xff]   ;;  %v338_v12 = vshrl.u32 %v283_v10, 16  ;;  %v341_v13 = vshll.u32 %v283_v10, 16 }
  0x76   : > { %6399 = vmatprep.subr.bf16.mxu0 %v7148_v29  ;;  %v7163_v9 = vld [vmem:[#allocation6 + $0x188] sm:$0xff]   ;;  %v7899_v21 = vld [vmem:[%s7870_s30 + $0xa0] sm:$0xf]  ;;  %v7902_v22 = vld [vmem:[%s7870_s30 + $0xa8] sm:$0xf]  ;;  %v465_v29 = vshll.u32 %v7879_v43, 16 }
  0x77   : > { %6438 = vmatpush3.bf16.msra.mxu1 %v7147_v28  ;;  %v322_v1 = vsel %vm7885_vm2, %v317_v55, %v321_v60  ;;  %v336_v2 = vsel %vm7885_vm2, %v331_v57, %v335_v61  ;;  %v284_v11 = vld [vmem:[%s7870_s30 + $0x18] sm:$0xf]  ;;  %v340_v19 = vrot.slane %v338_v12, 4  ;;  %v343_v20 = vrot.slane %v341_v13, 5  ;;  %v300_v26 = vld [vmem:[%s7870_s30 + $0x14] sm:$0x1] }
  0x78   : > { %6439 = vmatprep.subr.bf16.mxu1 %v7150_v31  ;;  %v5971_v5 = vcombine.low %v322_v1, %v336_v2  ;;  %v352_v14 = vshrl.u32 %v284_v11, 16  ;;  %v355_v15 = vshll.u32 %v284_v11, 16  ;;  %v5964_v16 = vcombine.low %v283_v10, %v284_v11  ;;  %v7170_v44 = vld [vmem:[#allocation6 + $0x158] sm:$0xff]   ;;  %v285_v55 = vld [vmem:[%s7870_s30 + $0x20] sm:$0xf]  ;;  %v7178_v1 = vld [vmem:[#allocation6 + $0x120] sm:$0xff]  }
  0x79   : > { %6400 = vmatpush3.bf16.msra.mxu0 %v7149_v30  ;;  %v5976_v25 = vcombine.low %v7899_v21, %v7902_v22  ;;  %v344_v27 = vor.u32 %v343_v20, %v340_v19  ;;  %v462_v28 = vshrl.u32 %v7879_v43, 16  ;;  %v301_v30 = vld [vmem:[%s7870_s30 + $0x1c] sm:$0x1]  ;;  %v347_v31 = vshll.u32 %v300_v26, 16  ;;  %v7171_v47 = vld [vmem:[#allocation6 + $0x118] sm:$0xff]   ;;  %v7179_v19 = vld [vmem:[#allocation6 + $0x1e0] sm:$0xff]  }
  0x7a   : > { %6465 = vmatprep.subr.bf16.mxu0 %v7154_v41  ;;  %v354_v23 = vrot.slane %v352_v14, 4  ;;  %v357_v24 = vrot.slane %v355_v15, 5  ;;  %v450_v34 = vrot.slane %v448_v4, 4  ;;  %v453_v35 = vrot.slane %v451_v8, 5  ;;  %v7169_v41 = vld [vmem:[#allocation6 + $0x190] sm:$0xff]   ;;  %v7172_v50 = vld [vmem:[#allocation6 + $0x1d8] sm:$0xff]  }
  0x7b   : > { %6440 = vmatpush3.bf16.msra.mxu1 %v7152_v33  ;;  %v7168_v33 = vld [vmem:[#allocation6 + $0x1d0] sm:$0xff]   ;;  %v345_v36 = vrot.slane %v344_v27, 4  ;;  %v361_v37 = vshll.u32 %v301_v30, 16  ;;  %v349_v38 = vrot.slane %v347_v31, 5  ;;  %v476_v42 = vshrl.u32 %v7899_v21, 16  ;;  %v7174_v53 = vld [vmem:[#allocation6 + $0x198] sm:$0xff]  }
  0x7c   : > { %1505 = vmatmul.mubr.bf16.vlgmr.msra.gmra.mrb[0].mxu0 %v5963_v40  ;;  %6505 = vmatprep.subr.bf16.mxu1 %v7157_v59  ;;  %v358_v32 = vor.u32 %v357_v24, %v354_v23  ;;  %v479_v45 = vshll.u32 %v7899_v21, 16  ;;  %v490_v48 = vshrl.u32 %v7902_v22, 16  ;;  %v7173_v51 = vld [vmem:[%s7870_s30 + $0x68] ss:$8 sps:$4 sm:$0xff]   ;;  %v493_v52 = vshll.u32 %v7902_v22, 16  ;;  %v7181_v30 = vld [vmem:[#allocation6 + $0x168] sm:$0xff]  }
  0x7d   : > { %6466 = vmatpush3.bf16.msra.mxu0 %v7156_v49  ;;  %1512 = vmatprep.mubr.bf16.mxu0 %v7162_v7  ;;  %v363_v40 = vrot.slane %v361_v37, 5  ;;  %v350_v43 = vsel %vm7885_vm2, %v345_v36, %v349_v38  ;;  %v454_v56 = vor.u32 %v453_v35, %v450_v34  ;;  %v286_v57 = vld [vmem:[%s7870_s30 + $0x28] sm:$0xf]  ;;  %v366_v58 = vshrl.u32 %v285_v55, 16  ;;  %v7922_v4 = vld [vmem:[%s7870_s30 + $0xb0] sm:$0xf] }
  0x7e   : > { %6467 = vmatprep.subr.bf16.mxu0 %v7159_v62  ;;  %1570 = vmatmul.mubr.bf16.vlgmr.msra.gmra.mrb[0].mxu1 %v5971_v5  ;;  %v359_v39 = vrot.slane %v358_v32, 4  ;;  %v369_v59 = vshll.u32 %v285_v55, 16  ;;  %v380_v60 = vshrl.u32 %v286_v57, 16  ;;  %v383_v61 = vshll.u32 %v286_v57, 16  ;;  %v7925_v5 = vld [vmem:[%s7870_s30 + $0xb8] sm:$0xf] }
  0x7f   : > { %6506 = vmatpush3.bf16.msra.mxu1 %v7158_v63  ;;  %1577 = vmatprep.mubr.bf16.mxu1 %v5976_v25  ;;  %v5965_v62 = vcombine.low %v285_v55, %v286_v57  ;;  %v7176_v63 = vld [vmem:[#allocation6 + $0x160] sm:$0xff]   ;;  %v368_v2 = vrot.slane %v366_v58, 4  ;;  %v467_v10 = vrot.slane %v465_v29, 5  ;;  %v5977_v11 = vcombine.low %v7922_v4, %v7925_v5  ;;  %v302_v12 = vld [vmem:[%s7870_s30 + $0x24] sm:$0x1]  ;;  %v7183_v36 = vld [vmem:[#allocation6 + $0x1e8] sm:$0xff]  }
  0x80   : > { %6507 = vmatprep.subr.bf16.mxu1 %v7161_v6  ;;  %v364_v46 = vsel %vm7885_vm2, %v359_v39, %v363_v40  ;;  %v464_v6 = vrot.slane %v462_v28, 4  ;;  %v382_v7 = vrot.slane %v380_v60, 4  ;;  %v385_v8 = vrot.slane %v383_v61, 5  ;;  %v7180_v27 = vld [vmem:[#allocation6 + $0x1a0] sm:$0xff]   ;;  %v7184_v37 = vld [vmem:[%s7870_s30 + $0x78] ss:$8 sps:$4 sm:$0xff]  }
  0x81   : > { %6468 = vmatpush3.bf16.msra.mxu0 %v7160_v3  ;;  %v5972_v49 = vcombine.low %v350_v43, %v364_v46  ;;  %v371_v3 = vrot.slane %v369_v59, 5  ;;  %v478_v14 = vrot.slane %v476_v42, 4  ;;  %v481_v15 = vrot.slane %v479_v45, 5  ;;  %v7185_v40 = vld [vmem:[#allocation6 + $0x1a8] sm:$0xff]   ;;  %v5921_v55 = vld [vmem:[%s7870_s30 + $0xc0] sm:$0xf] }
  0x82   : > { %6469 = vmatprep.subr.bf16.mxu0 %v7165_v17  ;;  %v375_v17 = vshll.u32 %v302_v12, 16  ;;  %v492_v20 = vrot.slane %v490_v48, 4  ;;  %v495_v21 = vrot.slane %v493_v52, 5  ;;  %v504_v28 = vshrl.u32 %v7922_v4, 16  ;;  %v288_v43 = vld [vmem:[%s7870_s30 + $0x38] sm:$0xf] }
  0x83   : > { %6508 = vmatpush3.bf16.msra.mxu1 %v7163_v9  ;;  %v7927_v9 = vrot.slane %v454_v56, 4  ;;  %v372_v13 = vor.u32 %v371_v3, %v368_v2  ;;  %v507_v31 = vshll.u32 %v7922_v4, 16  ;;  %v518_v34 = vshrl.u32 %v7925_v5, 16  ;;  %v5922_v56 = vld [vmem:[%s7870_s30 + $0xc8] sm:$0xf] }
  0x84   : > { %1513 = vmatmul.mubr.bf16.gmra.mrb[4].mxu0 %v5964_v16  ;;  %6509 = vmatprep.subr.bf16.mxu1 %v7168_v33  ;;  %v303_v16 = vld [vmem:[%s7870_s30 + $0x2c] sm:$0x1]  ;;  %v377_v24 = vrot.slane %v375_v17, 5  ;;  %v7182_v33 = vld [vmem:[#allocation6 + $0x128] sm:$0xff]   ;;  %v468_v38 = vor.u32 %v467_v10, %v464_v6  ;;  %v521_v39 = vshll.u32 %v7925_v5, 16  ;;  %v482_v42 = vor.u32 %v481_v15, %v478_v14  ;;  %v7191_v17 = vld [vmem:[#allocation6 + $0x1b0] sm:$0xff]  }
  0x85   : > { %6470 = vmatpush3.bf16.msra.mxu0 %v7167_v18  ;;  %1520 = vmatprep.mubr.bf16.mxu0 %v7173_v51  ;;  %v386_v18 = vor.u32 %v385_v8, %v382_v7  ;;  %v373_v22 = vrot.slane %v372_v13, 4  ;;  %v389_v23 = vshll.u32 %v303_v16, 16  ;;  %v496_v46 = vor.u32 %v495_v21, %v492_v20  ;;  %v7189_v51 = vld [vmem:[#allocation6 + $0x130] sm:$0xff]   ;;  %v305_v5 = vld [vmem:[%s7870_s30 + $0x3c] sm:$0x1]  ;;  %v7192_v20 = vld [vmem:[#allocation6 + $0x178] sm:$0xff]  }
  0x86   : > { %6471 = vmatprep.subr.bf16.mxu0 %v7170_v44  ;;  %1578 = vmatmul.mubr.bf16.gmra.mrb[4].mxu1 %v5972_v49  ;;  %v411_v48 = vshll.u32 %v288_v43, 16  ;;  %v7946_v57 = vrot.slane %v468_v38, 4  ;;  %v7948_v60 = vrot.slane %v482_v42, 4  ;;  %v7950_v61 = vrot.slane %v504_v28, 4  ;;  %v7190_v8 = vld [vmem:[#allocation6 + $0x1f0] sm:$0xff]  }
  0x87   : > { %6510 = vmatpush3.bf16.msra.mxu1 %v7169_v41  ;;  %1585 = vmatprep.mubr.bf16.mxu1 %v5977_v11  ;;  %v387_v25 = vrot.slane %v386_v18, 4  ;;  %v391_v26 = vrot.slane %v389_v23, 5  ;;  %v378_v29 = vsel %vm7885_vm2, %v373_v22, %v377_v24  ;;  %v287_v41 = vld [vmem:[%s7870_s30 + $0x30] sm:$0xf]  ;;  %v7953_v2 = vrot.slane %v496_v46, 4  ;;  %v7193_v23 = vld [vmem:[#allocation6 + $0x138] sm:$0xff]  }
  0x88   : > { %6511 = vmatprep.subr.bf16.mxu1 %v7172_v50  ;;  %v394_v44 = vshrl.u32 %v287_v41, 16  ;;  %v397_v45 = vshll.u32 %v287_v41, 16  ;;  %v5966_v49 = vcombine.low %v287_v41, %v288_v43  ;;  %v7187_v50 = vld [vmem:[#allocation6 + $0x170] sm:$0xff]   ;;  %v413_v59 = vrot.slane %v411_v48, 5  ;;  %v5932_v28 = vld [vmem:[%s7870_s30 + $0x9c] sm:$0x1] }
  0x89   : > { %6472 = vmatpush3.bf16.msra.mxu0 %v7171_v47  ;;  %v392_v32 = vsel %vm7885_vm2, %v387_v25, %v391_v26  ;;  %v408_v47 = vshrl.u32 %v288_v43, 16  ;;  %v509_v3 = vrot.slane %v507_v31, 5  ;;  %v7955_v4 = vrot.slane %v518_v34, 4  ;;  %v7194_v26 = vld [vmem:[#allocation6 + $0x1f8] sm:$0xff]   ;;  %v7198_v41 = vld [vmem:[%s7870_s30 + $0x50] ss:$8 sps:$4 sm:$0xff]  }
  0x8a   : > { %6473 = vmatprep.subr.bf16.mxu0 %v7176_v63  ;;  %v5973_v35 = vcombine.low %v378_v29, %v392_v32  ;;  %v396_v52 = vrot.slane %v394_v44, 4  ;;  %v304_v63 = vld [vmem:[%s7870_s30 + $0x34] sm:$0x1]  ;;  %v7958_v10 = vrot.slane %v521_v39, 5  ;;  %v532_v11 = vshrl.u32 %v5921_v55, 16  ;;  %v7200_v46 = vld [vmem:[#allocation6 + $0x208] sm:$0xff]  }
  0x8b   : > { %6512 = vmatpush3.bf16.msra.mxu1 %v7174_v53  ;;  %v399_v53 = vrot.slane %v397_v45, 5  ;;  %v410_v58 = vrot.slane %v408_v47, 4  ;;  %v403_v6 = vshll.u32 %v304_v63, 16  ;;  %v417_v13 = vshll.u32 %v305_v5, 16  ;;  %v7197_v32 = vld [vmem:[#allocation6 + $0x200] sm:$0xff]  }
  0x8c   : > { %1521 = vmatmul.mubr.bf16.gmra.mrb[8].mxu0 %v5965_v62  ;;  %6513 = vmatprep.subr.bf16.mxu1 %v7179_v19  ;;  %v5978_v62 = vcombine.low %v5921_v55, %v5922_v56  ;;  %v535_v18 = vshll.u32 %v5921_v55, 16  ;;  %v546_v21 = vshrl.u32 %v5922_v56, 16  ;;  %v549_v24 = vshll.u32 %v5922_v56, 16  ;;  %v7196_v39 = vld [vmem:[%s7870_s30 + $0xd8] ss:$8 sps:$4 sm:$0xff]  }
  0x8d   : > { %6474 = vmatpush3.bf16.msra.mxu0 %v7178_v1  ;;  %1528 = vmatprep.mubr.bf16.mxu0 %v7184_v37  ;;  %v400_v1 = vor.u32 %v399_v53, %v396_v52  ;;  %v414_v7 = vor.u32 %v413_v59, %v410_v58  ;;  %v405_v14 = vrot.slane %v403_v6, 5  ;;  %v419_v16 = vrot.slane %v417_v13, 5  ;;  %v7978_v44 = vld [vmem:[%s7870_s30 + $0x8] sm:$0xf]  ;;  %v7981_v45 = vld [vmem:[%s7870_s30 + $0x10] sm:$0xf] }
  0x8e   : > { %6475 = vmatprep.subr.bf16.mxu0 %v7181_v30  ;;  %1586 = vmatmul.mubr.bf16.gmra.mrb[8].mxu1 %v5973_v35  ;;  %v7195_v30 = vld [vmem:[#allocation6 + $0x1b8] sm:$0xff]   ;;  %v471_v31 = vshll.u32 %v5932_v28, 16  ;;  %v537_v34 = vrot.slane %v535_v18, 5  ;;  %v548_v35 = vrot.slane %v546_v21, 4  ;;  %v551_v37 = vrot.slane %v549_v24, 5  ;;  %v7202_v56 = vld [vmem:[#allocation6 + $0x210] sm:$0xff]  }
  0x8f   : > { %6514 = vmatpush3.bf16.msra.mxu1 %v7180_v27  ;;  %1593 = vmatprep.mubr.bf16.mxu1 %v5978_v62  ;;  %v401_v12 = vrot.slane %v400_v1, 4  ;;  %v415_v15 = vrot.slane %v414_v7, 4  ;;  %v5931_v27 = vld [vmem:[%s7870_s30 + $0x94] sm:$0x1]  ;;  %v510_v42 = vor.u32 %v509_v3, %v7950_v61  ;;  %v5933_v48 = vld [vmem:[%s7870_s30 + $0xa4] sm:$0x1]  ;;  %v524_v61 = vor.u32 %v7958_v10, %v7955_v4 }
  0x90   : > { %6515 = vmatprep.subr.bf16.mxu1 %v7183_v36  ;;  %v457_v29 = vshll.u32 %v5931_v27, 16  ;;  %v473_v38 = vrot.slane %v471_v31, 5  ;;  %v5941_v58 = vld [vmem:[%s7870_s30 + $0x18] sm:$0xf]  ;;  %v5942_v59 = vld [vmem:[%s7870_s30 + $0x20] sm:$0xf]  ;;  %v552_v63 = vor.u32 %v551_v37, %v548_v35 }
  0x91   : > { %6476 = vmatpush3.bf16.msra.mxu0 %v7182_v33  ;;  %v406_v19 = vsel %vm7885_vm2, %v401_v12, %v405_v14  ;;  %v420_v22 = vsel %vm7885_vm2, %v415_v15, %v419_v16  ;;  %v7966_v33 = vrot.slane %v532_v11, 4  ;;  %v511_v52 = vrot.slane %v510_v42, 4  ;;  %v5935_v10 = vld [vmem:[%s7870_s30 + $0xb4] sm:$0x1]  ;;  %v5936_v15 = vld [vmem:[%s7870_s30 + $0xbc] sm:$0x1] }
  0x92   : > { %6477 = vmatprep.subr.bf16.mxu0 %v7187_v50  ;;  %v5974_v25 = vcombine.low %v406_v19, %v420_v22  ;;  %v459_v36 = vrot.slane %v457_v29, 5  ;;  %v474_v43 = vsel %vm7885_vm2, %v7946_v57, %v473_v38  ;;  %v485_v50 = vshll.u32 %v5933_v48, 16  ;;  %v7203_v57 = vld [vmem:[%s7870_s30 + $0x60] ss:$8 sps:$4 sm:$0xff]   ;;  %v7207_v28 = vld [vmem:[#allocation6 + $0x220] sm:$0xff]  }
  0x93   : > { %6516 = vmatpush3.bf16.msra.mxu1 %v7185_v40  ;;  %v538_v62 = vor.u32 %v537_v34, %v7966_v33  ;;  %v614_v5 = vshrl.u32 %v5941_v58, 16  ;;  %v617_v6 = vshll.u32 %v5941_v58, 16  ;;  %v628_v11 = vshrl.u32 %v5942_v59, 16  ;;  %v5943_v33 = vld [vmem:[%s7870_s30 + $0x28] sm:$0xf] }
  0x94   : > { %1529 = vmatmul.mubr.bf16.gmra.mrb[12].mxu0 %v5966_v49  ;;  %6517 = vmatprep.subr.bf16.mxu1 %v7190_v8  ;;  %v460_v40 = vsel %vm7885_vm2, %v7927_v9, %v459_v36  ;;  %v5987_v9 = vcombine.low %v7978_v44, %v7981_v45  ;;  %v5934_v49 = vld [vmem:[%s7870_s30 + $0xac] sm:$0x1]  ;;  %v487_v53 = vrot.slane %v485_v50, 5  ;;  %v7201_v8 = vld [vmem:[%s7870_s30 + $0xe8] ss:$8 sps:$4 sm:$0xff]   ;;  %v631_v4 = vshll.u32 %v5942_v59, 16 }
  0x95   : > { %6478 = vmatpush3.bf16.msra.mxu0 %v7189_v51  ;;  %v5983_v47 = vcombine.low %v460_v40, %v474_v43  ;;  %v499_v51 = vshll.u32 %v5934_v49, 16  ;;  %v616_v12 = vrot.slane %v614_v5, 4  ;;  %v619_v13 = vrot.slane %v617_v6, 5  ;;  %v7206_v36 = vld [vmem:[%s7870_s30 + $0xf8] ss:$8 sps:$4 sm:$0xff]  }
  0x96   : > { %6479 = vmatprep.subr.bf16.mxu0 %v7192_v20  ;;  %1594 = vmatmul.mubr.bf16.gmra.mrb[12].mxu1 %v5974_v25  ;;  %v488_v1 = vsel %vm7885_vm2, %v7948_v60, %v487_v53  ;;  %v5988_v14 = vcombine.low %v5941_v58, %v5942_v59  ;;  %v513_v16 = vshll.u32 %v5935_v10, 16  ;;  %v630_v60 = vrot.slane %v628_v11, 4  ;;  %v7205_v20 = vld [vmem:[#allocation6 + $0x218] sm:$0xff]   ;;  %v5944_v37 = vld [vmem:[%s7870_s30 + $0x30] sm:$0xf] }
  0x97   : > { %6518 = vmatpush3.bf16.msra.mxu1 %v7191_v17  ;;  %1699 = vmatprep.mubr.bf16.mxu1 %v7198_v41  ;;  %v501_v55 = vrot.slane %v499_v51, 5  ;;  %v633_v17 = vrot.slane %v631_v4, 5  ;;  %v525_v18 = vrot.slane %v524_v61, 4  ;;  %v527_v19 = vshll.u32 %v5936_v15, 16  ;;  %v5937_v42 = vld [vmem:[%s7870_s30 + $0xc4] sm:$0x1] }
  0x98   : > { %6519 = vmatprep.subr.bf16.mxu1 %v7194_v26  ;;  %1634 = vmatprep.mubr.bf16.mxu0 %v5983_v47  ;;  %v515_v21 = vrot.slane %v513_v16, 5  ;;  %v539_v22 = vrot.slane %v538_v62, 4  ;;  %v586_v25 = vshrl.u32 %v7978_v44, 16  ;;  %v589_v29 = vshll.u32 %v7978_v44, 16  ;;  %v5938_v47 = vld [vmem:[%s7870_s30 + $0xcc] sm:$0x1] }
  0x99   : > { %6480 = vmatpush3.bf16.msra.mxu0 %v7193_v23  ;;  %v502_v3 = vsel %vm7885_vm2, %v7953_v2, %v501_v55  ;;  %v620_v2 = vor.u32 %v619_v13, %v616_v12  ;;  %v553_v23 = vrot.slane %v552_v63, 4  ;;  %v529_v24 = vrot.slane %v527_v19, 5  ;;  %v7213_v63 = vld [vmem:[%s7870_s30 + $0x80] ss:$8 sps:$4 sm:$0xff]   ;;  %v5956_v15 = vld [vmem:[%s7870_s30 + $0x14] sm:$0x1] }
  0x9a   : > { %6953 = vmatprep.subr.bf16.mxu0 %v7197_v32  ;;  %v5984_v7 = vcombine.low %v488_v1, %v502_v3  ;;  %v634_v26 = vor.u32 %v633_v17, %v630_v60  ;;  %v516_v27 = vsel %vm7885_vm2, %v511_v52, %v515_v21  ;;  %v588_v34 = vrot.slane %v586_v25, 4  ;;  %v5945_v3 = vld [vmem:[%s7870_s30 + $0x38] sm:$0xf]  ;;  %v5946_v5 = vld [vmem:[%s7870_s30 + $0x40] sm:$0xf] }
  0x9b   : > { %6520 = vmatpush3.bf16.msra.mxu1 %v7195_v30  ;;  %v8006_v30 = vrot.slane %v620_v2, 4  ;;  %v530_v31 = vsel %vm7885_vm2, %v525_v18, %v529_v24  ;;  %v642_v38 = vshrl.u32 %v5943_v33, 16  ;;  %v656_v40 = vshrl.u32 %v5944_v37, 16  ;;  %v7215_v2 = vld [vmem:[#allocation6 + $0x238] sm:$0xff]   ;;  %v5957_v21 = vld [vmem:[%s7870_s30 + $0x1c] sm:$0x1] }
  0x9c   : > { %1635 = vmatmul.mubr.bf16.vlgmr.msra.gmra.mrb[16].mxu0 %v7196_v39  ;;  %v5985_v35 = vcombine.low %v516_v27, %v530_v31  ;;  %v645_v39 = vshll.u32 %v5943_v33, 16  ;;  %v659_v41 = vshll.u32 %v5944_v37, 16  ;;  %v8015_v43 = vrot.slane %v634_v26, 4  ;;  %v5958_v25 = vld [vmem:[%s7870_s30 + $0x24] sm:$0x1] }
  0x9d   : > { %6954 = vmatpush3.bf16.msra.mxu0 %v7197_v32  ;;  %1642 = vmatprep.mubr.bf16.mxu0 %v5984_v7  ;;  %v7208_v32 = vld [vmem:[%s7870_s30 + $0x70] ss:$8 sps:$4 sm:$0xff]   ;;  %v5989_v44 = vcombine.low %v5943_v33, %v5944_v37  ;;  %v591_v48 = vrot.slane %v589_v29, 5  ;;  %v644_v49 = vrot.slane %v642_v38, 4  ;;  %v555_v51 = vshll.u32 %v5938_v47, 16 }
  0x9e   : > { %1700 = vmatmul.mubr.bf16.vlgmr.msra.gmra.mrb[16].mxu1 %v5987_v9  ;;  %6955 = vmatprep.subr.bf16.mxu0 %v7200_v46  ;;  %v541_v9 = vshll.u32 %v5937_v42, 16  ;;  %v647_v50 = vrot.slane %v645_v39, 5  ;;  %v600_v52 = vshrl.u32 %v7981_v45, 16  ;;  %v658_v53 = vrot.slane %v656_v40, 4  ;;  %v7211_v7 = vld [vmem:[%s7870_s30 + $0x108] ss:$8 sps:$4 sm:$0xff]  }
  0x9f   : > { %1707 = vmatprep.mubr.bf16.mxu1 %v7203_v57  ;;  %v661_v55 = vrot.slane %v659_v41, 5  ;;  %v603_v57 = vshll.u32 %v7981_v45, 16  ;;  %v557_v58 = vrot.slane %v555_v51, 5  ;;  %v592_v59 = vor.u32 %v591_v48, %v588_v34  ;;  %v5959_v29 = vld [vmem:[%s7870_s30 + $0x2c] sm:$0x1] }
  0xa0   : > { %v602_v61 = vrot.slane %v600_v52, 4  ;;  %v648_v6 = vor.u32 %v647_v50, %v644_v49  ;;  %v670_v11 = vshrl.u32 %v5945_v3, 16  ;;  %v673_v4 = vshll.u32 %v5945_v3, 16  ;;  %v5960_v31 = vld [vmem:[%s7870_s30 + $0x34] sm:$0x1] }
  0xa1   : > { %6956 = vmatpush3.bf16.msra.mxu0 %v7200_v46  ;;  %v7210_v46 = vld [vmem:[#allocation6 + $0x228] sm:$0xff]   ;;  %v558_v1 = vsel %vm7885_vm2, %v553_v23, %v557_v58  ;;  %v684_v10 = vshrl.u32 %v5946_v5, 16  ;;  %v687_v12 = vshll.u32 %v5946_v5, 16  ;;  %v5990_v13 = vcombine.low %v5945_v3, %v5946_v5  ;;  %v5962_v42 = vld [vmem:[%s7870_s30 + $0x44] sm:$0x1] }
  0xa2   : > { %6957 = vmatprep.subr.bf16.mxu0 %v7202_v56  ;;  %v593_v16 = vrot.slane %v592_v59, 4  ;;  %v662_v60 = vor.u32 %v661_v55, %v658_v53  ;;  %v672_v17 = vrot.slane %v670_v11, 4  ;;  %v675_v18 = vrot.slane %v673_v4, 5  ;;  %v5961_v37 = vld [vmem:[%s7870_s30 + $0x3c] sm:$0x1] }
  0xa3   : > { %v686_v19 = vrot.slane %v684_v10, 4  ;;  %v605_v23 = vrot.slane %v603_v57, 5  ;;  %v609_v24 = vshll.u32 %v5956_v15, 16  ;;  %v623_v26 = vshll.u32 %v5957_v21, 16  ;;  %v7216_v5 = vld [vmem:[#allocation10] sm:$0xff]  }
  0xa4   : > { %1643 = vmatmul.mubr.bf16.gmra.mrb[20].mxu0 %v7201_v8  ;;  %v7212_v8 = vld [vmem:[#allocation6 + $0x230] sm:$0xff]   ;;  %v651_v40 = vshll.u32 %v5959_v29, 16  ;;  %v663_v41 = vrot.slane %v662_v60, 4  ;;  %v665_v47 = vshll.u32 %v5960_v31, 16  ;;  %v679_v50 = vshll.u32 %v5961_v37, 16 }
  0xa5   : > { %6958 = vmatpush3.bf16.msra.mxu0 %v7202_v56  ;;  %1650 = vmatprep.mubr.bf16.mxu0 %v5985_v35  ;;  %v543_v56 = vrot.slane %v541_v9, 5  ;;  %v606_v33 = vor.u32 %v605_v23, %v602_v61  ;;  %v611_v34 = vrot.slane %v609_v24, 5  ;;  %v625_v35 = vrot.slane %v623_v26, 5 }
  0xa6   : > { %1708 = vmatmul.mubr.bf16.gmra.mrb[20].mxu1 %v5988_v14  ;;  %6959 = vmatprep.subr.bf16.mxu0 %v7205_v20  ;;  %v5955_v14 = vld [vmem:[%s7870_s30 + $0xc] sm:$0x1]  ;;  %v653_v49 = vrot.slane %v651_v40, 5  ;;  %v667_v53 = vrot.slane %v665_v47, 5  ;;  %v693_v55 = vshll.u32 %v5962_v42, 16  ;;  %v681_v58 = vrot.slane %v679_v50, 5 }
  0xa7   : > { %1715 = vmatprep.mubr.bf16.mxu1 %v7208_v32  ;;  %v544_v62 = vsel %vm7885_vm2, %v539_v22, %v543_v56  ;;  %v689_v22 = vrot.slane %v687_v12, 5  ;;  %v676_v32 = vor.u32 %v675_v18, %v672_v17 }
  0xa8   : > { %v5986_v45 = vcombine.low %v544_v62, %v558_v1  ;;  %v668_v59 = vsel %vm7885_vm2, %v663_v41, %v667_v53 }
  0xa9   : > { %6960 = vmatpush3.bf16.msra.mxu0 %v7205_v20  ;;  %v595_v20 = vshll.u32 %v5955_v14, 16  ;;  %v677_v9 = vrot.slane %v676_v32, 4  ;;  %v690_v51 = vor.u32 %v689_v22, %v686_v19 }
  0xaa   : > { %6961 = vmatprep.subr.bf16.mxu0 %v7207_v28 }
  0xab   : > { %v597_v27 = vrot.slane %v595_v20, 5  ;;  %v691_v61 = vrot.slane %v690_v51, 4 }
  0xac   : > { %1651 = vmatmul.mubr.bf16.gmra.mrb[24].mxu0 %v7206_v36  ;;  %v649_v36 = vrot.slane %v648_v6, 4  ;;  %v7222_v6 = vld [vmem:[#allocation6 + $0x280] sm:$0xff]  }
  0xad   : > { %6962 = vmatpush3.bf16.msra.mxu0 %v7207_v28  ;;  %1658 = vmatprep.mubr.bf16.mxu0 %v5986_v45  ;;  %v637_v28 = vshll.u32 %v5958_v25, 16  ;;  %v598_v38 = vsel %vm7885_vm2, %v593_v16, %v597_v27  ;;  %v7223_v45 = vld [vmem:[#allocation6 + $0x240] sm:$0xff]  }
  0xae   : > { %1716 = vmatmul.mubr.bf16.gmra.mrb[24].mxu1 %v5989_v44  ;;  %6963 = vmatprep.subr.bf16.mxu0 %v7210_v46  ;;  %v607_v44 = vrot.slane %v606_v33, 4 }
  0xaf   : > { %1723 = vmatprep.mubr.bf16.mxu1 %v7213_v63  ;;  %v639_v39 = vrot.slane %v637_v28, 5  ;;  %v682_v63 = vsel %vm7885_vm2, %v677_v9, %v681_v58 }
  0xb0   : > { %v612_v52 = vsel %vm7885_vm2, %v607_v44, %v611_v34 }
  0xb1   : > { %6964 = vmatpush3.bf16.msra.mxu0 %v7210_v46  ;;  %v626_v46 = vsel %vm7885_vm2, %v8006_v30, %v625_v35  ;;  %v640_v48 = vsel %vm7885_vm2, %v8015_v43, %v639_v39  ;;  %v5995_v56 = vcombine.low %v598_v38, %v612_v52  ;;  %v654_v30 = vsel %vm7885_vm2, %v649_v36, %v653_v49 }
  0xb2   : > { %6965 = vmatprep.subr.bf16.mxu0 %v7212_v8  ;;  %v5996_v57 = vcombine.low %v626_v46, %v640_v48  ;;  %v695_v43 = vrot.slane %v693_v55, 5  ;;  %v5997_v62 = vcombine.low %v654_v30, %v668_v59 }
  0xb4   : > { %1659 = vmatmul.mubr.bf16.gmra.mrb[28].mxu0 %v7211_v7  ;;  %v696_v1 = vsel %vm7885_vm2, %v691_v61, %v695_v43 }
  0xb5   : > { %6966 = vmatpush3.bf16.msra.mxu0 %v7212_v8  ;;  %6969 = vmatprep.mubr.bf16.mxu0 %v5995_v56  ;;  %v5998_v3 = vcombine.low %v682_v63, %v696_v1 }
  0xb6   : > { %1724 = vmatmul.mubr.bf16.gmra.mrb[28].mxu1 %v5990_v13  ;;  %6967 = vmatprep.subr.bf16.mxu0 %v7215_v2  ;;  %v5999_v13 = vld [vmem:[#allocation8] ss:$0 sm:$0xff] }
  0xb7   : > { %6985 = vmatprep.mubr.msk.bf16.mxu1 %vm1837_vm3, %v7216_v5 }
  0xb9   : > { %6968 = vmatpush3.bf16.msra.mxu0 %v7215_v2 }
  0xba   : > { %6565 = vmatprep.subr.bf16.mxu0 %v7222_v6 }
  0xbc   : > { %6970 = vmatmul.mubr.bf16.vlgmr.msra.gmra.mrb[32].mxu0 %v5996_v57 }
  0xbd   : > { %6973 = vmatprep.mubr.bf16.mxu0 %v5997_v62  ;;  %6566 = vmatpush3.bf16.msra.mxu0 %v7223_v45 }
  0xc4   : > { %6974 = vmatmul.mubr.bf16.gmra.mrb[36].mxu0 %v5998_v3 }
 0x14f   : > { %v6401_v7 = vpop.f32.mrb[0].mxu0 }
 0x150   : > { %v6402_v8 = vpop.f32.mrb[1].mxu0 }
 0x151   : > { %v6403_v11 = vadd.f32 %v6402_v8, %v6401_v7  ;;  %v6404_v4 = vpop.f32.mrb[2].mxu0  ;;  %v6441_v54 = vpop.f32.mrb[0].mxu1 }
 0x152   : > { %v6405_v10 = vpop.f32.mrb[3].mxu0  ;;  %v6442_v15 = vpop.f32.mrb[1].mxu1 }
 0x153   : > { %v6406_v12 = vadd.f32 %v6405_v10, %v6404_v4  ;;  %v1507_v14 = vadd.f32 %v6403_v11, %v5999_v13  ;;  %v6443_v60 = vadd.f32 %v6442_v15, %v6441_v54  ;;  %v6444_v17 = vpop.f32.mrb[2].mxu1 }
 0x154   : > { %v6445_v18 = vpop.f32.mrb[3].mxu1 }
 0x155   : > { %v1510_v16 = vadd.f32 %v6406_v12, %v5999_v13  ;;  %v1572_v19 = vadd.f32 %v6443_v60, %v1507_v14  ;;  %v6446_v2 = vadd.f32 %v6445_v18, %v6444_v17 }
 0x157   : > { %v6407_v20 = vpop.f32.mrb[4].mxu0  ;;  %v1575_v22 = vadd.f32 %v6446_v2, %v1510_v16 }
 0x158   : > { %v6408_v21 = vpop.f32.mrb[5].mxu0 }
 0x159   : > { %v6409_v23 = vadd.f32 %v6408_v21, %v6407_v20  ;;  %v6410_v24 = vpop.f32.mrb[6].mxu0  ;;  %v6447_v28 = vpop.f32.mrb[4].mxu1 }
 0x15a   : > { %v6411_v25 = vpop.f32.mrb[7].mxu0  ;;  %v6448_v29 = vpop.f32.mrb[5].mxu1 }
 0x15b   : > { %v6412_v26 = vadd.f32 %v6411_v25, %v6410_v24  ;;  %v1515_v27 = vadd.f32 %v6409_v23, %v5999_v13  ;;  %v6449_v32 = vadd.f32 %v6448_v29, %v6447_v28  ;;  %v6450_v33 = vpop.f32.mrb[6].mxu1 }
 0x15c   : > { %v6451_v34 = vpop.f32.mrb[7].mxu1 }
 0x15d   : > { %v1518_v31 = vadd.f32 %v6412_v26, %v5999_v13  ;;  %v1580_v35 = vadd.f32 %v6449_v32, %v1515_v27  ;;  %v6452_v36 = vadd.f32 %v6451_v34, %v6450_v33 }
 0x15f   : > { %v6413_v37 = vpop.f32.mrb[8].mxu0  ;;  %v1583_v39 = vadd.f32 %v6452_v36, %v1518_v31 }
 0x160   : > { %v6414_v38 = vpop.f32.mrb[9].mxu0 }
 0x161   : > { %v6415_v40 = vadd.f32 %v6414_v38, %v6413_v37  ;;  %v6416_v41 = vpop.f32.mrb[10].mxu0  ;;  %v6453_v47 = vpop.f32.mrb[8].mxu1 }
 0x162   : > { %v6417_v42 = vpop.f32.mrb[11].mxu0  ;;  %v6454_v9 = vpop.f32.mrb[9].mxu1 }
 0x163   : > { %v6418_v44 = vadd.f32 %v6417_v42, %v6416_v41  ;;  %v1523_v46 = vadd.f32 %v6415_v40, %v5999_v13  ;;  %v6455_v49 = vadd.f32 %v6454_v9, %v6453_v47  ;;  %v6456_v50 = vpop.f32.mrb[10].mxu1 }
 0x164   : > { %v6457_v51 = vpop.f32.mrb[11].mxu1 }
 0x165   : > { %v1526_v48 = vadd.f32 %v6418_v44, %v5999_v13  ;;  %v1588_v52 = vadd.f32 %v6455_v49, %v1523_v46  ;;  %v6458_v53 = vadd.f32 %v6457_v51, %v6456_v50 }
 0x167   : > { %v6419_v55 = vpop.f32.mrb[12].mxu0  ;;  %v1591_v57 = vadd.f32 %v6458_v53, %v1526_v48 }
 0x168   : > { %v6420_v56 = vpop.f32.mrb[13].mxu0 }
 0x169   : > { %v6421_v30 = vadd.f32 %v6420_v56, %v6419_v55  ;;  %v6422_v58 = vpop.f32.mrb[14].mxu0  ;;  %v6459_v62 = vpop.f32.mrb[12].mxu1 }
 0x16a   : > { %v6423_v59 = vpop.f32.mrb[15].mxu0  ;;  %v6460_v63 = vpop.f32.mrb[13].mxu1 }
 0x16b   : > { %v6424_v61 = vadd.f32 %v6423_v59, %v6422_v58  ;;  %v1531_v43 = vadd.f32 %v6421_v30, %v5999_v13  ;;  %v6461_v3 = vadd.f32 %v6460_v63, %v6459_v62  ;;  %v6462_v5 = vpop.f32.mrb[14].mxu1 }
 0x16c   : > { %v6463_v6 = vpop.f32.mrb[15].mxu1 }
 0x16d   : > { %v1534_v1 = vadd.f32 %v6424_v61, %v5999_v13  ;;  %v1596_v45 = vadd.f32 %v6461_v3, %v1531_v43  ;;  %v6464_v7 = vadd.f32 %v6463_v6, %v6462_v5 }
 0x16f   : > { %v1599_v8 = vadd.f32 %v6464_v7, %v1534_v1  ;;  %v6481_v11 = vpop.f32.mrb[16].mxu0 }
 0x170   : > { %v6482_v10 = vpop.f32.mrb[17].mxu0 }
 0x171   : > { %v6521_v4 = vpop.f32.mrb[16].mxu1  ;;  %v6483_v14 = vadd.f32 %v6482_v10, %v6481_v11  ;;  %v6484_v54 = vpop.f32.mrb[18].mxu0 }
 0x172   : > { %v6522_v12 = vpop.f32.mrb[17].mxu1  ;;  %v6485_v60 = vpop.f32.mrb[19].mxu0 }
 0x173   : > { %v6523_v15 = vadd.f32 %v6522_v12, %v6521_v4  ;;  %v6524_v16 = vpop.f32.mrb[18].mxu1  ;;  %v1637_v18 = vadd.f32 %v6483_v14, %v1572_v19  ;;  %v6486_v2 = vadd.f32 %v6485_v60, %v6484_v54 }
 0x174   : > { %v6525_v17 = vpop.f32.mrb[19].mxu1 }
 0x175   : > { %v6526_v20 = vadd.f32 %v6525_v17, %v6524_v16  ;;  %v1640_v13 = vadd.f32 %v6486_v2, %v1575_v22  ;;  %v1702_v21 = vadd.f32 %v6523_v15, %v1637_v18 }
 0x177   : > { %v6487_v23 = vpop.f32.mrb[20].mxu0  ;;  %v1705_v25 = vadd.f32 %v6526_v20, %v1640_v13 }
 0x178   : > { %v6488_v26 = vpop.f32.mrb[21].mxu0 }
 0x179   : > { %v6527_v24 = vpop.f32.mrb[20].mxu1  ;;  %v6489_v28 = vadd.f32 %v6488_v26, %v6487_v23  ;;  %v6490_v29 = vpop.f32.mrb[22].mxu0 }
 0x17a   : > { %v6528_v27 = vpop.f32.mrb[21].mxu1  ;;  %v6491_v33 = vpop.f32.mrb[23].mxu0 }
 0x17b   : > { %v6529_v31 = vadd.f32 %v6528_v27, %v6527_v24  ;;  %v6530_v32 = vpop.f32.mrb[22].mxu1  ;;  %v1645_v36 = vadd.f32 %v6489_v28, %v1580_v35  ;;  %v6492_v37 = vadd.f32 %v6491_v33, %v6490_v29 }
 0x17c   : > { %v6531_v34 = vpop.f32.mrb[23].mxu1 }
 0x17d   : > { %v6532_v38 = vadd.f32 %v6531_v34, %v6530_v32  ;;  %v1648_v40 = vadd.f32 %v6492_v37, %v1583_v39  ;;  %v1710_v19 = vadd.f32 %v6529_v31, %v1645_v36 }
 0x17f   : > { %v6493_v41 = vpop.f32.mrb[24].mxu0  ;;  %v1713_v22 = vadd.f32 %v6532_v38, %v1648_v40  ;;  %v7220_v40 = vld [vmem:[#allocation6 + $0x300] sm:$0xff]  }
 0x180   : > { %v6494_v44 = vpop.f32.mrb[25].mxu0 }
 0x181   : > { %v6533_v42 = vpop.f32.mrb[24].mxu1  ;;  %v6495_v47 = vadd.f32 %v6494_v44, %v6493_v41  ;;  %v6496_v9 = vpop.f32.mrb[26].mxu0  ;;  %v7218_v41 = vld [vmem:[#allocation10 + $0x10] sm:$0xff]   ;;  %v7225_v44 = vld [vmem:[#allocation6 + $0x2c8] sm:$0xff]  }
 0x182   : > { %v6534_v46 = vpop.f32.mrb[25].mxu1  ;;  %v6497_v50 = vpop.f32.mrb[27].mxu0 }
 0x183   : > { %v6535_v48 = vadd.f32 %v6534_v46, %v6533_v42  ;;  %v6536_v49 = vpop.f32.mrb[26].mxu1  ;;  %v1653_v53 = vadd.f32 %v6495_v47, %v1588_v52  ;;  %v6498_v55 = vadd.f32 %v6497_v50, %v6496_v9  ;;  %v7221_v42 = vld [vmem:[#allocation6 + $0x2c0] sm:$0xff]   ;;  %v7226_v47 = vld [vmem:[#allocation6 + $0x288] sm:$0xff]   ;;  %v7230_v50 = vld [vmem:[#allocation6 + $0x290] sm:$0xff]  }
 0x184   : > { %v6537_v51 = vpop.f32.mrb[27].mxu1  ;;  %v7219_v46 = vld [vmem:[#allocation10 + $0x18] sm:$0xff]   ;;  %v7227_v9 = vld [vmem:[#allocation6 + $0x248] sm:$0xff]   ;;  %6567 = vmatprep.subr.bf16.mxu0 %v7226_v47 }
 0x185   : > { %v6538_v56 = vadd.f32 %v6537_v51, %v6536_v49  ;;  %v1656_v30 = vadd.f32 %v6498_v55, %v1591_v57  ;;  %v1718_v35 = vadd.f32 %v6535_v48, %v1653_v53  ;;  %6568 = vmatpush3.bf16.msra.mxu0 %v7227_v9  ;;  %v7228_v48 = vld [vmem:[#allocation6 + $0x310] sm:$0xff]   ;;  %v7232_v53 = vld [vmem:[#allocation6 + $0x318] sm:$0xff]  }
 0x186   : > { %v7229_v49 = vld [vmem:[#allocation6 + $0x2d0] sm:$0xff]   ;;  %6569 = vmatprep.subr.bf16.mxu0 %v7230_v50  ;;  %v7233_v55 = vld [vmem:[#allocation6 + $0x2d8] sm:$0xff]  }
 0x187   : > { %v6499_v58 = vpop.f32.mrb[28].mxu0  ;;  %v1721_v39 = vadd.f32 %v6538_v56, %v1656_v30  ;;  %v7231_v51 = vld [vmem:[#allocation6 + $0x250] sm:$0xff]   ;;  %v7234_v56 = vld [vmem:[#allocation6 + $0x298] sm:$0xff]  }
 0x188   : > { %v6500_v61 = vpop.f32.mrb[29].mxu0  ;;  %v7235_v30 = vld [vmem:[#allocation6 + $0x258] sm:$0xff]  }
 0x189   : > { %v6539_v59 = vpop.f32.mrb[28].mxu1  ;;  %v6501_v62 = vadd.f32 %v6500_v61, %v6499_v58  ;;  %v6502_v63 = vpop.f32.mrb[30].mxu0  ;;  %6570 = vmatpush3.bf16.msra.mxu0 %v7231_v51  ;;  %v7237_v58 = vld [vmem:[#allocation6 + $0x2e0] sm:$0xff]   ;;  %v7240_v61 = vld [vmem:[#allocation6 + $0x328] sm:$0xff]  }
 0x18a   : > { %v6540_v43 = vpop.f32.mrb[29].mxu1  ;;  %v6503_v5 = vpop.f32.mrb[31].mxu0  ;;  %6571 = vmatprep.subr.bf16.mxu0 %v7234_v56 }
 0x18b   : > { %v6541_v1 = vadd.f32 %v6540_v43, %v6539_v59  ;;  %v6542_v3 = vpop.f32.mrb[30].mxu1  ;;  %v1661_v7 = vadd.f32 %v6501_v62, %v1596_v45  ;;  %v6504_v11 = vadd.f32 %v6503_v5, %v6502_v63  ;;  %v7238_v59 = vld [vmem:[#allocation6 + $0x2a0] sm:$0xff]   ;;  %v7241_v43 = vld [vmem:[#allocation6 + $0x2e8] sm:$0xff]   ;;  %v7246_v5 = vld [vmem:[#allocation6 + $0x2b0] sm:$0xff]  }
 0x18c   : > { %v6543_v6 = vpop.f32.mrb[31].mxu1  ;;  %v7242_v62 = vld [vmem:[#allocation6 + $0x2a8] sm:$0xff]  }
 0x18d   : > { %v6544_v4 = vadd.f32 %v6543_v6, %v6542_v3  ;;  %v1664_v10 = vadd.f32 %v6504_v11, %v1599_v8  ;;  %v1726_v52 = vadd.f32 %v6541_v1, %v1661_v7  ;;  %6572 = vmatpush3.bf16.msra.mxu0 %v7235_v30  ;;  %v7243_v63 = vld [vmem:[#allocation6 + $0x268] sm:$0xff]   ;;  %v7244_v1 = vld [vmem:[#allocation6 + $0x330] sm:$0xff]   ;;  %v7248_v7 = vld [vmem:[#allocation6 + $0x338] sm:$0xff]  }
 0x18e   : > { %6573 = vmatprep.subr.bf16.mxu0 %v7238_v59  ;;  %v7245_v3 = vld [vmem:[#allocation6 + $0x2f0] sm:$0xff]   ;;  %v7250_v11 = vld [vmem:[#allocation6 + $0x2b8] sm:$0xff]  }
 0x18f   : > { %v6971_v12 = vpop.f32.mrb[32].mxu0  ;;  %v1729_v14 = vadd.f32 %v6544_v4, %v1664_v10  ;;  %v7247_v6 = vld [vmem:[#allocation6 + $0x270] sm:$0xff]   ;;  %v7249_v4 = vld [vmem:[#allocation6 + $0x2f8] sm:$0xff]   ;;  %v7254_v10 = vld [vmem:[#allocation6 + $0x400] sm:$0xff]  }
 0x190   : > { %v1775_v57 = vadd.f32 %v6971_v12, %v1710_v19  ;;  %v1766_v54 = vpop.f32.mrb[33].mxu0  ;;  %v7217_v19 = vld [vmem:[#allocation10 + $0x8] sm:$0xff]   ;;  %v7260_v12 = vld [vmem:[#allocation6 + $0x380] sm:$0xff]  }
 0x191   : > { %v1767_v15 = vadd.f32 %v1766_v54, %v1702_v21  ;;  %v6972_v16 = vpop.f32.mrb[34].mxu0  ;;  %v1924_v54 = vlaneseq }
 0x192   : > { %v1778_v60 = vadd.f32 %v6972_v16, %v1713_v22  ;;  %v1769_v17 = vpop.f32.mrb[35].mxu0  ;;  %v1799_v2 = vmax.f32 %v1775_v57, 0.0  ;;  %v7224_v22 = vld [vmem:[#allocation6 + $0x308] sm:$0xff]  }
 0x193   : > { %v1770_v18 = vadd.f32 %v1769_v17, %v1705_v25  ;;  %v1797_v13 = vmax.f32 %v1767_v15, 0.0  ;;  %v1925_v16 = vshrl.u32 %v1924_v54, 7  ;;  %v7263_v54 = vld [vmem:[#allocation6 + $0x340] sm:$0xff]  }
 0x194   : > { %v1800_v20 = vmax.f32 %v1778_v60, 0.0 }
 0x195   : > { %v1798_v23 = vmax.f32 %v1770_v18, 0.0 }
 0x196   : > { %v1806_v24 = vpack.c.bf16 %v1800_v20, %v1799_v2 }
 0x197   : > { %v1805_v26 = vpack.c.bf16 %v1798_v23, %v1797_v13  ;;  %v6975_v45 = vpop.f32.mrb[36].mxu0 }
 0x198   : > { %v1791_v27 = vadd.f32 %v6975_v45, %v1726_v52  ;;  %v1782_v28 = vpop.f32.mrb[37].mxu0  ;;  %v7251_v52 = vld [vmem:[#allocation6 + $0x278] sm:$0xff]  }
 0x199   : > { %v1783_v8 = vadd.f32 %v1782_v28, %v1718_v35  ;;  %v6976_v29 = vpop.f32.mrb[38].mxu0  ;;  %6977 = vmatprep.subr.bf16.mxu1 %v1805_v26  ;;  %v7236_v35 = vld [vmem:[#allocation6 + $0x320] sm:$0xff]  }
 0x19a   : > { %v1794_v31 = vadd.f32 %v6976_v29, %v1729_v14  ;;  %v1785_v32 = vpop.f32.mrb[39].mxu0  ;;  %6978 = vmatpush3.bf16.msra.mxu1 %v1805_v26  ;;  %v1803_v33 = vmax.f32 %v1791_v27, 0.0  ;;  %v7688_v14 = vmov 1983009808  }
 0x19b   : > { %v1786_v21 = vadd.f32 %v1785_v32, %v1721_v39  ;;  %6979 = vmatprep.subr.bf16.mxu1 %v1806_v24  ;;  %v1801_v25 = vmax.f32 %v1783_v8, 0.0  ;;  %v7239_v39 = vld [vmem:[#allocation6 + $0x260] sm:$0xff]   ;;  %v1922_v57 = vunpack.c.l.s4 %v7688_v14  ;;  %v7264_v14 = vld [vmem:[#allocation6 + $0x408] sm:$0xff]  }
 0x19c   : > { %v1804_v34 = vmax.f32 %v1794_v31, 0.0  ;;  %6574 = vmatpush3.bf16.msra.mxu0 %v7239_v39 }
 0x19d   : > { %v1802_v36 = vmax.f32 %v1786_v21, 0.0  ;;  %6575 = vmatprep.subr.bf16.mxu0 %v7242_v62  ;;  %v1923_v15 = vunpack.c.0.s8 %v1922_v57 }
 0x19e   : > { %v1808_v37 = vpack.c.bf16 %v1804_v34, %v1803_v33  ;;  %6980 = vmatpush3.bf16.msra.mxu1 %v1806_v24 }
 0x19f   : > { %v1807_v38 = vpack.c.bf16 %v1802_v36, %v1801_v25  ;;  %v8058_v18 = vsub.s32 %v1923_v15, %v1925_v16 }
 0x1a0   : > { %6576 = vmatpush3.bf16.msra.mxu0 %v7243_v63 }
 0x1a1   : > { %6981 = vmatprep.subr.bf16.mxu1 %v1807_v38  ;;  %6577 = vmatprep.subr.bf16.mxu0 %v7246_v5 }
 0x1a2   : > { %6982 = vmatpush3.bf16.msra.mxu1 %v1807_v38 }
 0x1a3   : > { %6983 = vmatprep.subr.bf16.mxu1 %v1808_v37 }
 0x1a4   : > { %6578 = vmatpush3.bf16.msra.mxu0 %v7247_v6 }
 0x1a5   : > { %6579 = vmatprep.subr.bf16.mxu0 %v7250_v11  ;;  %v7257_v11 = vld [vmem:[#allocation6 + $0x3c0] sm:$0xff]  }
 0x1a6   : > { %6984 = vmatpush3.bf16.msra.mxu1 %v1808_v37 }
 0x1a7   : > { %6587 = vmatprep.subr.bf16.mxu1 %v7220_v40 }
 0x1a8   : > { %6580 = vmatpush3.bf16.msra.mxu0 %v7251_v52 }
 0x1a9   : > { %6986 = vmatmul.mubr.msk.bf16.vlgmr.msra.gmra.mrb[32].mxu1 %vm1837_vm3, %v7217_v19  ;;  %6609 = vmatprep.subr.bf16.mxu0 %v7260_v12 }
 0x1aa   : > { %6989 = vmatprep.mubr.msk.bf16.mxu1 %vm1837_vm3, %v7218_v41  ;;  %6588 = vmatpush3.bf16.msra.mxu1 %v7221_v42 }
 0x1ab   : > { %6589 = vmatprep.subr.bf16.mxu1 %v7224_v22 }
 0x1ae   : > { %6590 = vmatpush3.bf16.msra.mxu1 %v7225_v44 }
 0x1af   : > { %6591 = vmatprep.subr.bf16.mxu1 %v7228_v48 }
 0x1b1   : > { %6990 = vmatmul.mubr.msk.bf16.gmra.mrb[36].mxu1 %vm1837_vm3, %v7219_v46 }
 0x1b2   : > { %6592 = vmatpush3.bf16.msra.mxu1 %v7229_v49 }
 0x1b3   : > { %6593 = vmatprep.subr.bf16.mxu1 %v7232_v53 }
 0x1b6   : > { %6594 = vmatpush3.bf16.msra.mxu1 %v7233_v55 }
 0x1b7   : > { %6595 = vmatprep.subr.bf16.mxu1 %v7236_v35 }
 0x1ba   : > { %6596 = vmatpush3.bf16.msra.mxu1 %v7237_v58 }
 0x1bb   : > { %6597 = vmatprep.subr.bf16.mxu1 %v7240_v61 }
 0x1be   : > { %6598 = vmatpush3.bf16.msra.mxu1 %v7241_v43 }
 0x1bf   : > { %6599 = vmatprep.subr.bf16.mxu1 %v7244_v1 }
 0x1c2   : > { %6600 = vmatpush3.bf16.msra.mxu1 %v7245_v3 }
 0x1c3   : > { %6601 = vmatprep.subr.bf16.mxu1 %v7248_v7 }
 0x1c6   : > { %6602 = vmatpush3.bf16.msra.mxu1 %v7249_v4 }
 0x1c7   : > { %6631 = vmatprep.subr.bf16.mxu1 %v7254_v10 }
 0x27c   : > { %v6987_v60 = vpop.f32.mrb[32].mxu1 }
 0x27d   : > { %v1884_v17 = vpop.f32.mrb[33].mxu1 }
 0x27e   : > { %v6988_v2 = vpop.f32.mrb[34].mxu1 }
 0x27f   : > { %v1916_v20 = vpack.c.bf16 %v6988_v2, %v6987_v60  ;;  %v6081_v13 = vpack.c.bf16 %v6988_v2, %v6988_v2  ;;  %v1887_v23 = vpop.f32.mrb[35].mxu1 }
 0x280   : > { %v1915_v24 = vpack.c.bf16 %v1887_v23, %v1884_v17  ;;  %v6080_v26 = vpack.c.bf16 %v1887_v23, %v1887_v23  ;;  %v7266_v17 = vld [vmem:[#allocation6 + $0x388] sm:$0xff]  }
 0x281   : > { %v1958_v45 = vrot.slane %v1916_v20, %v8058_v18  ;;  %v1965_v27 = vrot.slane %v6081_v13, %v8058_v18  ;;  %v7265_v20 = vld [vmem:[#allocation6 + $0x3c8] sm:$0xff]  }
 0x282   : > { %v1927_v28 = vrot.slane %v1915_v24, %v8058_v18  ;;  %v1934_v8 = vrot.slane %v6080_v26, %v8058_v18 }
 0x283   : > { %v1966_v29 = vcombine.high %v1958_v45, %v1958_v45  ;;  %v1967_v31 = vcombine.high %v1965_v27, %v1965_v27  ;;  %v1972_v32 = vunpack.c.l.bf16 %v1958_v45  ;;  %v1974_v21 = vunpack.c.l.bf16 %v1965_v27  ;;  %v7269_v45 = vld [vmem:[#allocation6 + $0x348] sm:$0xff]   ;;  %v7270_v27 = vld [vmem:[#allocation6 + $0x410] sm:$0xff]  }
 0x284   : > { %v1935_v33 = vcombine.high %v1927_v28, %v1927_v28  ;;  %v1936_v34 = vcombine.high %v1934_v8, %v1934_v8  ;;  %v1941_v25 = vunpack.c.l.bf16 %v1927_v28  ;;  %v1943_v36 = vunpack.c.l.bf16 %v1934_v8  ;;  %v6991_v37 = vpop.f32.mrb[36].mxu1  ;;  %v7272_v8 = vld [vmem:[#allocation6 + $0x390] sm:$0xff]  }
 0x285   : > { %v1973_v38 = vunpack.c.l.bf16 %v1966_v29  ;;  %v1975_v40 = vunpack.c.l.bf16 %v1967_v31  ;;  %1977 = vst [vmem:[#allocation2 + $0x31] sm:$0xf] %v1972_v32  ;;  %1979 = vst [vmem:[#allocation2 + $0x41] sm:$0xf] %v1974_v21  ;;  %v1900_v19 = vpop.f32.mrb[37].mxu1  ;;  %v7271_v29 = vld [vmem:[#allocation6 + $0x3d0] sm:$0xff]  }
 0x286   : > { %v1942_v41 = vunpack.c.l.bf16 %v1935_v33  ;;  %v1944_v42 = vunpack.c.l.bf16 %v1936_v34  ;;  %1946 = vst [vmem:[#allocation2 + $0x9] sm:$0xf] %v1941_v25  ;;  %1948 = vst [vmem:[#allocation2 + $0x19] sm:$0xf] %v1943_v36  ;;  %v6992_v22 = vpop.f32.mrb[38].mxu1  ;;  %v7274_v31 = vld [vmem:[#allocation6 + $0x418] sm:$0xff]  }
 0x287   : > { %1978 = vst [vmem:[#allocation2 + $0x39] sm:$0xf] %v1973_v38  ;;  %1980 = vst [vmem:[#allocation2 + $0x49] sm:$0xf] %v1975_v40  ;;  %v1918_v44 = vpack.c.bf16 %v6992_v22, %v6991_v37  ;;  %v6083_v46 = vpack.c.bf16 %v6992_v22, %v6992_v22  ;;  %v1903_v47 = vpop.f32.mrb[39].mxu1  ;;  %v7273_v32 = vld [vmem:[#allocation6 + $0x350] sm:$0xff]  }
 0x288   : > { %1947 = vst [vmem:[#allocation2 + $0x11] sm:$0xf] %v1942_v41  ;;  %1949 = vst [vmem:[#allocation2 + $0x21] sm:$0xf] %v1944_v42  ;;  %v1917_v9 = vpack.c.bf16 %v1903_v47, %v1900_v19  ;;  %v6082_v48 = vpack.c.bf16 %v1903_v47, %v1903_v47  ;;  %v7276_v21 = vld [vmem:[#allocation6 + $0x398] sm:$0xff]   ;;  %v7280_v34 = vld [vmem:[#allocation6 + $0x420] sm:$0xff]  }
 0x289   : > { %v2020_v49 = vrot.slane %v1918_v44, %v8058_v18  ;;  %v2027_v50 = vrot.slane %v6083_v46, %v8058_v18  ;;  %v7275_v33 = vld [vmem:[#allocation6 + $0x3d8] sm:$0xff]   ;;  %v7282_v36 = vld [vmem:[#allocation6 + $0x3a0] sm:$0xff]   ;;  %v7284_v38 = vld [vmem:[#allocation6 + $0x428] sm:$0xff]  }
 0x28a   : > { %v1989_v51 = vrot.slane %v1917_v9, %v8058_v18  ;;  %v1996_v53 = vrot.slane %v6082_v48, %v8058_v18  ;;  %v7279_v25 = vld [vmem:[#allocation6 + $0x358] sm:$0xff]   ;;  %v7281_v37 = vld [vmem:[#allocation6 + $0x3e0] sm:$0xff]   ;;  %v7286_v19 = vld [vmem:[#allocation6 + $0x3a8] sm:$0xff]  }
 0x28b   : > { %v2028_v55 = vcombine.high %v2020_v49, %v2020_v49  ;;  %v2029_v56 = vcombine.high %v2027_v50, %v2027_v50  ;;  %v2034_v30 = vunpack.c.l.bf16 %v2020_v49  ;;  %v2036_v35 = vunpack.c.l.bf16 %v2027_v50  ;;  %v7283_v40 = vld [vmem:[#allocation6 + $0x360] sm:$0xff]   ;;  %v7285_v41 = vld [vmem:[#allocation6 + $0x3e8] sm:$0xff]   ;;  %v7288_v42 = vld [vmem:[#allocation6 + $0x430] sm:$0xff]  }
 0x28c   : > { %v1997_v58 = vcombine.high %v1989_v51, %v1989_v51  ;;  %v1998_v59 = vcombine.high %v1996_v53, %v1996_v53  ;;  %v2003_v39 = vunpack.c.l.bf16 %v1989_v51  ;;  %v2005_v61 = vunpack.c.l.bf16 %v1996_v53  ;;  %v7287_v22 = vld [vmem:[#allocation6 + $0x368] sm:$0xff]   ;;  %v7290_v44 = vld [vmem:[#allocation6 + $0x3b0] sm:$0xff]   ;;  %v7292_v47 = vld [vmem:[#allocation6 + $0x438] sm:$0xff]  }
 0x28d   : > { %v2035_v43 = vunpack.c.l.bf16 %v2028_v55  ;;  %v2037_v62 = vunpack.c.l.bf16 %v2029_v56  ;;  %2039 = vst [vmem:[#allocation2 + $0x81] sm:$0xf] %v2034_v30  ;;  %2041 = vst [vmem:[#allocation2 + $0x91] sm:$0xf] %v2036_v35  ;;  %v7289_v46 = vld [vmem:[#allocation6 + $0x3f0] sm:$0xff]   ;;  %v7294_v48 = vld [vmem:[#allocation6 + $0x3b8] sm:$0xff]  }
 0x28e   : > { %v2004_v63 = vunpack.c.l.bf16 %v1997_v58  ;;  %v2006_v1 = vunpack.c.l.bf16 %v1998_v59  ;;  %2008 = vst [vmem:[#allocation2 + $0x59] sm:$0xf] %v2003_v39  ;;  %2010 = vst [vmem:[#allocation2 + $0x69] sm:$0xf] %v2005_v61  ;;  %v7252_v3 = vld [vmem:[#allocation2 + $0x30] ss:$8 sps:$4 sm:$0xff]  }
 0x28f   : > { %2040 = vst [vmem:[#allocation2 + $0x89] sm:$0xf] %v2035_v43  ;;  %2042 = vst [vmem:[#allocation2 + $0x99] sm:$0xf] %v2037_v62  ;;  %v7253_v5 = vld [vmem:[#allocation2 + $0x40] ss:$8 sps:$4 sm:$0xff]  }
 0x290   : > { %2009 = vst [vmem:[#allocation2 + $0x61] sm:$0xf] %v2004_v63  ;;  %2011 = vst [vmem:[#allocation2 + $0x71] sm:$0xf] %v2006_v1  ;;  %v2096_v6 = vpack.c.bf16 %v7253_v5, %v7252_v3  ;;  %v7267_v10 = vld [vmem:[#allocation2 + $0x31] ss:$8 sps:$4 sm:$0xff]  }
 0x291   : > { %v7268_v52 = vld [vmem:[#allocation2 + $0x41] ss:$8 sps:$4 sm:$0xff]   ;;  %v7300_v35 = vld [vmem:[#allocation6 + $0x440] sm:$0xff]   ;;  %v7301_v59 = vld [vmem:[#allocation6 + $0x448] sm:$0xff]  }
 0x292   : > { %2820 = vmatprep.mubr.bf16.mxu1 %v2096_v6  ;;  %v2122_v26 = vpack.c.bf16 %v7268_v52, %v7267_v10  ;;  %v7291_v9 = vld [vmem:[#allocation6 + $0x370] sm:$0xff]   ;;  %v7293_v49 = vld [vmem:[#allocation6 + $0x3f8] sm:$0xff]   ;;  %v7304_v43 = vld [vmem:[#allocation6 + $0x460] sm:$0xff]  }
 0x293   : > { %v7295_v53 = vld [vmem:[#allocation6 + $0x378] sm:$0xff]   ;;  %v7299_v56 = vld [vmem:[#allocation2 + $0x19] ss:$8 sps:$4 sm:$0xff]   ;;  %v7313_v10 = vld [vmem:[#allocation6 + $0x500] sm:$0xff]  }
 0x294   : > { %v7255_v7 = vld [vmem:[#allocation2 + $0x79] ss:$8 sps:$4 sm:$0xff]   ;;  %v7298_v55 = vld [vmem:[#allocation2 + $0x9] ss:$8 sps:$4 sm:$0xff]  }
 0x295   : > { %v7258_v4 = vld [vmem:[#allocation2 + $0x51] ss:$8 sps:$4 sm:$0xff]   ;;  %v2109_v58 = vpack.c.bf16 %v7299_v56, %v7298_v55  ;;  %v7302_v39 = vld [vmem:[#allocation6 + $0x450] sm:$0xff]   ;;  %v7303_v61 = vld [vmem:[#allocation6 + $0x458] sm:$0xff]  }
 0x296   : > { %v7256_v12 = vld [vmem:[#allocation2 + $0x89] ss:$8 sps:$4 sm:$0xff]   ;;  %v7261_v16 = vld [vmem:[#allocation2 + $0x78] ss:$8 sps:$4 sm:$0xff]  }
 0x297   : > { %v7259_v57 = vld [vmem:[#allocation2 + $0x61] ss:$8 sps:$4 sm:$0xff]   ;;  %v2083_v15 = vpack.c.bf16 %v7256_v12, %v7255_v7  ;;  %v7297_v51 = vld [vmem:[#allocation2 + $0x90] ss:$8 sps:$4 sm:$0xff]  }
 0x298   : > { %v7262_v60 = vld [vmem:[#allocation2 + $0x88] ss:$8 sps:$4 sm:$0xff]   ;;  %v2070_v2 = vpack.c.bf16 %v7259_v57, %v7258_v4  ;;  %v7277_v23 = vld [vmem:[#allocation2 + $0x59] ss:$8 sps:$4 sm:$0xff]  }
 0x299   : > { %2821 = vmatmul.mubr.bf16.vlgmr.msra.gmra.mrb[40].mxu1 %v2083_v15  ;;  %v2056_v13 = vpack.c.bf16 %v7262_v60, %v7261_v16  ;;  %v7278_v24 = vld [vmem:[#allocation2 + $0x69] ss:$8 sps:$4 sm:$0xff]   ;;  %v7305_v62 = vld [vmem:[#allocation6 + $0x468] sm:$0xff]   ;;  %v7306_v63 = vld [vmem:[#allocation6 + $0x470] sm:$0xff]  }
 0x29a   : > { %6632 = vmatpush3.bf16.msra.mxu1 %v7257_v11  ;;  %2779 = vmatprep.mubr.bf16.mxu0 %v2070_v2  ;;  %v2148_v28 = vpack.c.bf16 %v7278_v24, %v7277_v23  ;;  %v7296_v50 = vld [vmem:[#allocation2 + $0x80] ss:$8 sps:$4 sm:$0xff]   ;;  %v7309_v5 = vld [vmem:[#allocation2 + $0x91] ss:$8 sps:$4 sm:$0xff]  }
 0x29b   : > { %2780 = vmatmul.mubr.bf16.vlgmr.msra.gmra.mrb[40].mxu0 %v2056_v13  ;;  %6633 = vmatprep.subr.bf16.mxu1 %v7264_v14  ;;  %v2135_v30 = vpack.c.bf16 %v7297_v51, %v7296_v50  ;;  %v7307_v1 = vld [vmem:[#allocation6 + $0x478] sm:$0xff]   ;;  %v7310_v7 = vld [vmem:[#allocation6 + $0x4c0] sm:$0xff]   ;;  %v7314_v52 = vld [vmem:[#allocation6 + $0x4c8] sm:$0xff]  }
 0x29c   : > { %6610 = vmatpush3.bf16.msra.mxu0 %v7263_v54  ;;  %2861 = vmatprep.mubr.bf16.mxu0 %v2122_v26  ;;  %v7308_v3 = vld [vmem:[#allocation2 + $0x81] ss:$8 sps:$4 sm:$0xff]   ;;  %v7311_v11 = vld [vmem:[#allocation6 + $0x540] sm:$0xff]   ;;  %v7315_v12 = vld [vmem:[#allocation6 + $0x548] sm:$0xff]  }
 0x29d   : > { %6611 = vmatprep.subr.bf16.mxu0 %v7266_v17  ;;  %2902 = vmatprep.mubr.bf16.mxu1 %v2148_v28  ;;  %v2161_v6 = vpack.c.bf16 %v7309_v5, %v7308_v3  ;;  %v7312_v4 = vld [vmem:[#allocation6 + $0x480] sm:$0xff]   ;;  %v7316_v14 = vld [vmem:[#allocation6 + $0x488] sm:$0xff]   ;;  %v7318_v54 = vld [vmem:[#allocation6 + $0x4d0] sm:$0xff]  }
 0x29e   : > { %6634 = vmatpush3.bf16.msra.mxu1 %v7265_v20  ;;  %v7317_v57 = vld [vmem:[#allocation6 + $0x508] sm:$0xff]   ;;  %v7319_v15 = vld [vmem:[#allocation6 + $0x550] sm:$0xff]   ;;  %v7322_v17 = vld [vmem:[#allocation6 + $0x4d8] sm:$0xff]  }
 0x29f   : > { %6635 = vmatprep.subr.bf16.mxu1 %v7270_v27  ;;  %v7320_v16 = vld [vmem:[#allocation6 + $0x490] sm:$0xff]   ;;  %v7323_v2 = vld [vmem:[#allocation6 + $0x558] sm:$0xff]   ;;  %v7326_v23 = vld [vmem:[#allocation6 + $0x4e0] sm:$0xff]  }
 0x2a0   : > { %6612 = vmatpush3.bf16.msra.mxu0 %v7269_v45  ;;  %v7321_v60 = vld [vmem:[#allocation6 + $0x510] sm:$0xff]   ;;  %v7324_v20 = vld [vmem:[#allocation6 + $0x498] sm:$0xff]   ;;  %v7327_v24 = vld [vmem:[#allocation6 + $0x560] sm:$0xff]  }
 0x2a1   : > { %6613 = vmatprep.subr.bf16.mxu0 %v7272_v8  ;;  %v7325_v13 = vld [vmem:[#allocation6 + $0x518] sm:$0xff]   ;;  %v7328_v26 = vld [vmem:[#allocation6 + $0x4a0] sm:$0xff]   ;;  %v7330_v27 = vld [vmem:[#allocation6 + $0x4e8] sm:$0xff]  }
 0x2a2   : > { %6636 = vmatpush3.bf16.msra.mxu1 %v7271_v29  ;;  %v7329_v45 = vld [vmem:[#allocation6 + $0x520] sm:$0xff]   ;;  %v7331_v28 = vld [vmem:[#allocation6 + $0x568] sm:$0xff]  }
 0x2a3   : > { %6637 = vmatprep.subr.bf16.mxu1 %v7274_v31  ;;  %v7332_v8 = vld [vmem:[#allocation6 + $0x4a8] sm:$0xff]   ;;  %v7334_v31 = vld [vmem:[#allocation6 + $0x4f0] sm:$0xff]  }
 0x2a4   : > { %6614 = vmatpush3.bf16.msra.mxu0 %v7273_v32  ;;  %v7333_v29 = vld [vmem:[#allocation6 + $0x528] sm:$0xff]   ;;  %v7335_v32 = vld [vmem:[#allocation6 + $0x570] sm:$0xff]  }
 0x2a5   : > { %6615 = vmatprep.subr.bf16.mxu0 %v7276_v21  ;;  %v7336_v21 = vld [vmem:[#allocation6 + $0x4b0] sm:$0xff]  }
 0x2a6   : > { %6638 = vmatpush3.bf16.msra.mxu1 %v7275_v33  ;;  %v7337_v33 = vld [vmem:[#allocation6 + $0x530] sm:$0xff]  }
 0x2a7   : > { %6639 = vmatprep.subr.bf16.mxu1 %v7280_v34  ;;  %v7338_v34 = vld [vmem:[#allocation6 + $0x4f8] sm:$0xff]  }
 0x2a8   : > { %6616 = vmatpush3.bf16.msra.mxu0 %v7279_v25  ;;  %v7339_v25 = vld [vmem:[#allocation6 + $0x578] sm:$0xff]  }
 0x2a9   : > { %6617 = vmatprep.subr.bf16.mxu0 %v7282_v36  ;;  %v7340_v36 = vld [vmem:[#allocation6 + $0x4b8] sm:$0xff]  }
 0x2aa   : > { %6640 = vmatpush3.bf16.msra.mxu1 %v7281_v37  ;;  %v7341_v37 = vld [vmem:[#allocation6 + $0x538] sm:$0xff]  }
 0x2ab   : > { %6641 = vmatprep.subr.bf16.mxu1 %v7284_v38  ;;  %v7346_v38 = vld [vmem:[#allocation6 + $0x5c0] sm:$0xff]  }
 0x2ac   : > { %6618 = vmatpush3.bf16.msra.mxu0 %v7283_v40  ;;  %v7347_v40 = vld [vmem:[#allocation6 + $0x640] sm:$0xff]  }
 0x2ad   : > { %6619 = vmatprep.subr.bf16.mxu0 %v7286_v19 }
 0x2ae   : > { %6642 = vmatpush3.bf16.msra.mxu1 %v7285_v41 }
 0x2af   : > { %6643 = vmatprep.subr.bf16.mxu1 %v7288_v42 }
 0x2b0   : > { %6620 = vmatpush3.bf16.msra.mxu0 %v7287_v22 }
 0x2b1   : > { %6621 = vmatprep.subr.bf16.mxu0 %v7290_v44 }
 0x2b2   : > { %6644 = vmatpush3.bf16.msra.mxu1 %v7289_v46  ;;  %v6084_v46 = vld [vmem:[#allocation8 + $0x1] ss:$0 sm:$0xff] }
 0x2b3   : > { %6645 = vmatprep.subr.bf16.mxu1 %v7292_v47 }
 0x2b4   : > { %6622 = vmatpush3.bf16.msra.mxu0 %v7291_v9 }
 0x2b5   : > { %6623 = vmatprep.subr.bf16.mxu0 %v7294_v48 }
 0x2b6   : > { %6646 = vmatpush3.bf16.msra.mxu1 %v7293_v49 }
 0x2b7   : > { %6662 = vmatprep.subr.bf16.mxu1 %v7310_v7 }
 0x2b8   : > { %6624 = vmatpush3.bf16.msra.mxu0 %v7295_v53 }
 0x2b9   : > { %2903 = vmatmul.mubr.bf16.vlgmr.msra.gmra.mrb[44].mxu1 %v2135_v30  ;;  %6993 = vmatprep.subr.bf16.mxu0 %v7687_v0 }
 0x2ba   : > { %6663 = vmatpush3.bf16.msra.mxu1 %v7312_v4 }
 0x2bb   : > { %2862 = vmatmul.mubr.bf16.vlgmr.msra.gmra.mrb[44].mxu0 %v2109_v58  ;;  %6664 = vmatprep.subr.bf16.mxu1 %v7314_v52 }
 0x2bc   : > { %6994 = vmatpush3.bf16.msra.mxu0 %v7300_v35  ;;  %7009 = vmatprep.mubr.msk.bf16.mxu0 %vm7689_vm4, %v7687_v0 }
 0x2bd   : > { %6995 = vmatprep.subr.bf16.mxu0 %v7687_v0 }
 0x2be   : > { %6665 = vmatpush3.bf16.msra.mxu1 %v7316_v14 }
 0x2bf   : > { %6666 = vmatprep.subr.bf16.mxu1 %v7318_v54 }
 0x2c0   : > { %6996 = vmatpush3.bf16.msra.mxu0 %v7301_v59 }
 0x2c1   : > { %6997 = vmatprep.subr.bf16.mxu0 %v7687_v0 }
 0x2c2   : > { %6667 = vmatpush3.bf16.msra.mxu1 %v7320_v16 }
 0x2c3   : > { %6668 = vmatprep.subr.bf16.mxu1 %v7322_v17 }
 0x2c4   : > { %6998 = vmatpush3.bf16.msra.mxu0 %v7302_v39 }
 0x2c5   : > { %6999 = vmatprep.subr.bf16.mxu0 %v7687_v0 }
 0x2c6   : > { %6669 = vmatpush3.bf16.msra.mxu1 %v7324_v20 }
 0x2c7   : > { %6670 = vmatprep.subr.bf16.mxu1 %v7326_v23 }
 0x2c8   : > { %7000 = vmatpush3.bf16.msra.mxu0 %v7303_v61 }
 0x2c9   : > { %7001 = vmatprep.subr.bf16.mxu0 %v7687_v0 }
 0x2ca   : > { %6671 = vmatpush3.bf16.msra.mxu1 %v7328_v26 }
 0x2cb   : > { %6672 = vmatprep.subr.bf16.mxu1 %v7330_v27 }
 0x2cc   : > { %7002 = vmatpush3.bf16.msra.mxu0 %v7304_v43 }
 0x2cd   : > { %7003 = vmatprep.subr.bf16.mxu0 %v7687_v0 }
 0x2ce   : > { %6673 = vmatpush3.bf16.msra.mxu1 %v7332_v8 }
 0x2cf   : > { %6674 = vmatprep.subr.bf16.mxu1 %v7334_v31 }
 0x2d0   : > { %7004 = vmatpush3.bf16.msra.mxu0 %v7305_v62 }
 0x2d1   : > { %7005 = vmatprep.subr.bf16.mxu0 %v7687_v0 }
 0x2d2   : > { %6675 = vmatpush3.bf16.msra.mxu1 %v7336_v21 }
 0x2d3   : > { %6676 = vmatprep.subr.bf16.mxu1 %v7338_v34 }
 0x2d4   : > { %7006 = vmatpush3.bf16.msra.mxu0 %v7306_v63 }
 0x2d5   : > { %7007 = vmatprep.subr.bf16.mxu0 %v7687_v0 }
 0x2d6   : > { %6677 = vmatpush3.bf16.msra.mxu1 %v7340_v36 }
 0x2d7   : > { %6706 = vmatprep.subr.bf16.mxu1 %v7346_v38  ;;  %v7353_v38 = vld [vmem:[#allocation6 + $0x600] sm:$0xff]  }
 0x2d8   : > { %7008 = vmatpush3.bf16.msra.mxu0 %v7307_v1 }
 0x2d9   : > { %6684 = vmatprep.subr.bf16.mxu0 %v7311_v11 }
 0x2db   : > { %7010 = vmatmul.mubr.bf16.vlgmr.msra.gmra.mrb[48].mxu0 %v2161_v6 }
 0x2dc   : > { %6685 = vmatpush3.bf16.msra.mxu0 %v7313_v10 }
 0x2dd   : > { %6686 = vmatprep.subr.bf16.mxu0 %v7315_v12 }
 0x2e0   : > { %6687 = vmatpush3.bf16.msra.mxu0 %v7317_v57 }
 0x2e1   : > { %6688 = vmatprep.subr.bf16.mxu0 %v7319_v15 }
 0x2e4   : > { %6689 = vmatpush3.bf16.msra.mxu0 %v7321_v60 }
 0x2e5   : > { %6690 = vmatprep.subr.bf16.mxu0 %v7323_v2 }
 0x2e8   : > { %6691 = vmatpush3.bf16.msra.mxu0 %v7325_v13 }
 0x2e9   : > { %6692 = vmatprep.subr.bf16.mxu0 %v7327_v24 }
 0x2ec   : > { %6693 = vmatpush3.bf16.msra.mxu0 %v7329_v45 }
 0x2ed   : > { %6694 = vmatprep.subr.bf16.mxu0 %v7331_v28 }
 0x2f0   : > { %6695 = vmatpush3.bf16.msra.mxu0 %v7333_v29 }
 0x2f1   : > { %6696 = vmatprep.subr.bf16.mxu0 %v7335_v32 }
 0x2f4   : > { %6697 = vmatpush3.bf16.msra.mxu0 %v7337_v33 }
 0x2f5   : > { %6698 = vmatprep.subr.bf16.mxu0 %v7339_v25  ;;  %v7352_v25 = vld [vmem:[#allocation6 + $0x580] sm:$0xff]  }
 0x2f8   : > { %6699 = vmatpush3.bf16.msra.mxu0 %v7341_v37 }
 0x2f9   : > { %6728 = vmatprep.subr.bf16.mxu0 %v7347_v40  ;;  %v7358_v40 = vld [vmem:[#allocation6 + $0x5c8] sm:$0xff]  }
 0x36c   : > { %v6603_v19 = vpop.f32.mrb[40].mxu1 }
 0x36d   : > { %v6604_v41 = vpop.f32.mrb[41].mxu1 }
 0x36e   : > { %v6581_v42 = vpop.f32.mrb[40].mxu0  ;;  %v6605_v22 = vadd.f32 %v6604_v41, %v6603_v19  ;;  %v6606_v44 = vpop.f32.mrb[42].mxu1 }
 0x36f   : > { %v6582_v47 = vpop.f32.mrb[41].mxu0  ;;  %v6607_v9 = vpop.f32.mrb[43].mxu1 }
 0x370   : > { %v6583_v48 = vadd.f32 %v6582_v47, %v6581_v42  ;;  %v6584_v49 = vpop.f32.mrb[42].mxu0  ;;  %v6608_v50 = vadd.f32 %v6607_v9, %v6606_v44  ;;  %v7359_v42 = vld [vmem:[#allocation6 + $0x648] sm:$0xff]  }
 0x371   : > { %v6585_v51 = vpop.f32.mrb[43].mxu0  ;;  %v7360_v9 = vld [vmem:[#allocation6 + $0x588] sm:$0xff]  }
 0x372   : > { %v2782_v53 = vadd.f32 %v6583_v48, %v6084_v46  ;;  %v6586_v55 = vadd.f32 %v6585_v51, %v6584_v49  ;;  %v7361_v48 = vld [vmem:[#allocation6 + $0x608] sm:$0xff]   ;;  %v7362_v49 = vld [vmem:[#allocation6 + $0x5d0] sm:$0xff]  }
 0x374   : > { %v2785_v56 = vadd.f32 %v6586_v55, %v6084_v46  ;;  %v2823_v30 = vadd.f32 %v6605_v22, %v2782_v53 }
 0x376   : > { %v2826_v35 = vadd.f32 %v6608_v50, %v2785_v56  ;;  %v7363_v56 = vld [vmem:[#allocation6 + $0x650] sm:$0xff]  }
 0x38c   : > { %v6647_v58 = vpop.f32.mrb[44].mxu1 }
 0x38d   : > { %v6648_v59 = vpop.f32.mrb[45].mxu1 }
 0x38e   : > { %v6649_v39 = vadd.f32 %v6648_v59, %v6647_v58  ;;  %v6625_v61 = vpop.f32.mrb[44].mxu0  ;;  %v6650_v43 = vpop.f32.mrb[46].mxu1  ;;  %v7366_v58 = vld [vmem:[#allocation6 + $0x5d8] sm:$0xff]  }
 0x38f   : > { %v6626_v62 = vpop.f32.mrb[45].mxu0  ;;  %v6651_v63 = vpop.f32.mrb[47].mxu1  ;;  %v7367_v59 = vld [vmem:[#allocation6 + $0x658] sm:$0xff]  }
 0x390   : > { %v6627_v1 = vadd.f32 %v6626_v62, %v6625_v61  ;;  %v6652_v3 = vadd.f32 %v6651_v63, %v6650_v43  ;;  %v6628_v5 = vpop.f32.mrb[46].mxu0  ;;  %v7369_v61 = vld [vmem:[#allocation6 + $0x618] sm:$0xff]   ;;  %v7370_v43 = vld [vmem:[#allocation6 + $0x5e0] sm:$0xff]  }
 0x391   : > { %v6629_v6 = vpop.f32.mrb[47].mxu0  ;;  %v7371_v62 = vld [vmem:[#allocation6 + $0x660] sm:$0xff]  }
 0x392   : > { %v2864_v7 = vadd.f32 %v6627_v1, %v2823_v30  ;;  %v6630_v11 = vadd.f32 %v6629_v6, %v6628_v5  ;;  %v7364_v30 = vld [vmem:[#allocation6 + $0x590] sm:$0xff]   ;;  %v7372_v63 = vld [vmem:[#allocation6 + $0x5a0] sm:$0xff]   ;;  %v7375_v5 = vld [vmem:[#allocation6 + $0x668] sm:$0xff]  }
 0x393   : > { %v7373_v1 = vld [vmem:[#allocation6 + $0x620] sm:$0xff]   ;;  %v7376_v6 = vld [vmem:[#allocation6 + $0x5a8] sm:$0xff]  }
 0x394   : > { %v2867_v4 = vadd.f32 %v6630_v11, %v2826_v35  ;;  %v2905_v10 = vadd.f32 %v6649_v39, %v2864_v7  ;;  %v7365_v35 = vld [vmem:[#allocation6 + $0x610] sm:$0xff]   ;;  %v7368_v39 = vld [vmem:[#allocation6 + $0x598] sm:$0xff]   ;;  %v7377_v7 = vld [vmem:[#allocation6 + $0x628] sm:$0xff]  }
 0x395   : > { %v7378_v11 = vld [vmem:[#allocation6 + $0x5f0] sm:$0xff]  }
 0x396   : > { %v2908_v52 = vadd.f32 %v6652_v3, %v2867_v4  ;;  %v7374_v3 = vld [vmem:[#allocation6 + $0x5e8] sm:$0xff]   ;;  %v7379_v4 = vld [vmem:[#allocation6 + $0x670] sm:$0xff]  }
 0x3ae   : > { %v2945_v12 = vpop.f32.mrb[48].mxu0 }
 0x3af   : > { %v2946_v14 = vadd.f32 %v2945_v12, %v2905_v10  ;;  %v7011_v57 = vpop.f32.mrb[49].mxu0  ;;  %v7380_v10 = vld [vmem:[#allocation6 + $0x5b0] sm:$0xff]   ;;  %v7382_v12 = vld [vmem:[#allocation6 + $0x5f8] sm:$0xff]  }
 0x3b0   : > { %v2948_v54 = vpop.f32.mrb[50].mxu0  ;;  %v7384_v57 = vld [vmem:[#allocation6 + $0x5b8] sm:$0xff]  }
 0x3b1   : > { %v2949_v15 = vadd.f32 %v2948_v54, %v2908_v52  ;;  %v7012_v16 = vpop.f32.mrb[51].mxu0  ;;  %v2952_v60 = vmax.f32 %v2946_v14, 0.0  ;;  %v7381_v52 = vld [vmem:[#allocation6 + $0x630] sm:$0xff]   ;;  %v7383_v14 = vld [vmem:[#allocation6 + $0x678] sm:$0xff]  }
 0x3b2   : > { %v7385_v54 = vld [vmem:[#allocation6 + $0x638] sm:$0xff]  }
 0x3b3   : > { %v2953_v17 = vmax.f32 %v2949_v15, 0.0 }
 0x3b5   : > { %v2954_v2 = vpack.c.bf16 %v2953_v17, %v2952_v60  ;;  %v6157_v20 = vpack.c.bf16 %v2953_v17, %v2953_v17 }
 0x3b7   : > { %v2963_v13 = vrot.slane %v2954_v2, %v8058_v18  ;;  %v2970_v23 = vrot.slane %v6157_v20, %v8058_v18  ;;  %v7390_v2 = vld [vmem:[#allocation6 + $0x680] sm:$0xff]  }
 0x3b9   : > { %v2971_v24 = vcombine.high %v2963_v13, %v2963_v13  ;;  %v2972_v26 = vcombine.high %v2970_v23, %v2970_v23  ;;  %v2977_v45 = vunpack.c.l.bf16 %v2963_v13  ;;  %v2979_v27 = vunpack.c.l.bf16 %v2970_v23  ;;  %v7391_v23 = vld [vmem:[#allocation6 + $0x688] sm:$0xff]  }
 0x3bb   : > { %v2978_v28 = vunpack.c.l.bf16 %v2971_v24  ;;  %v2980_v8 = vunpack.c.l.bf16 %v2972_v26  ;;  %2982 = vst [vmem:[#allocation3 + $0x9] sm:$0xf] %v2977_v45  ;;  %2984 = vst [vmem:[#allocation3 + $0x19] sm:$0xf] %v2979_v27  ;;  %v7392_v24 = vld [vmem:[#allocation6 + $0x690] sm:$0xff]   ;;  %v7393_v26 = vld [vmem:[#allocation6 + $0x698] sm:$0xff]  }
 0x3bc   : > { %v7394_v45 = vld [vmem:[#allocation6 + $0x6a0] sm:$0xff]   ;;  %v7395_v27 = vld [vmem:[#allocation6 + $0x6a8] sm:$0xff]  }
 0x3bd   : > { %2983 = vst [vmem:[#allocation3 + $0x11] sm:$0xf] %v2978_v28  ;;  %2985 = vst [vmem:[#allocation3 + $0x21] sm:$0xf] %v2980_v8  ;;  %v7396_v28 = vld [vmem:[#allocation6 + $0x6b0] sm:$0xff]   ;;  %v7397_v8 = vld [vmem:[#allocation6 + $0x6b8] sm:$0xff]  }
 0x3c2   : > { %v7342_v29 = vld [vmem:[#allocation3 + $0x1] ss:$8 sps:$4 sm:$0xff]  }
 0x3c3   : > { %v7348_v34 = vld [vmem:[#allocation3] ss:$8 sps:$4 sm:$0xff]  }
 0x3c4   : > { %v7343_v31 = vld [vmem:[#allocation3 + $0x11] ss:$8 sps:$4 sm:$0xff]   ;;  %v7350_v19 = vld [vmem:[#allocation3 + $0x2] ss:$8 sps:$4 sm:$0xff]  }
 0x3c5   : > { %v7344_v32 = vld [vmem:[#allocation3 + $0x8] ss:$8 sps:$4 sm:$0xff]   ;;  %v7345_v21 = vld [vmem:[#allocation3 + $0x18] ss:$8 sps:$4 sm:$0xff]   ;;  %v3011_v33 = vpack.c.bf16 %v7343_v31, %v7342_v29 }
 0x3c6   : > { %v3037_v36 = vpack.c.bf16 %v7345_v21, %v7344_v32  ;;  %v7349_v37 = vld [vmem:[#allocation3 + $0x10] ss:$8 sps:$4 sm:$0xff]   ;;  %v7357_v53 = vld [vmem:[#allocation3 + $0x21] ss:$8 sps:$4 sm:$0xff]  }
 0x3c7   : > { %3721 = vmatprep.mubr.bf16.mxu1 %v3011_v33  ;;  %v7351_v41 = vld [vmem:[#allocation3 + $0x12] ss:$8 sps:$4 sm:$0xff]   ;;  %v2998_v22 = vpack.c.bf16 %v7349_v37, %v7348_v34  ;;  %v7389_v17 = vld [vmem:[#allocation3 + $0x20] ss:$8 sps:$4 sm:$0xff]  }
 0x3c8   : > { %3762 = vmatprep.mubr.bf16.mxu0 %v3037_v36  ;;  %v3024_v44 = vpack.c.bf16 %v7351_v41, %v7350_v19  ;;  %v7354_v46 = vld [vmem:[#allocation3 + $0xa] ss:$8 sps:$4 sm:$0xff]   ;;  %v7355_v47 = vld [vmem:[#allocation3 + $0x1a] ss:$8 sps:$4 sm:$0xff]  }
 0x3c9   : > { %3722 = vmatmul.mubr.bf16.vlgmr.msra.gmra.mrb[48].mxu1 %v2998_v22  ;;  %v3063_v50 = vpack.c.bf16 %v7355_v47, %v7354_v46  ;;  %v7356_v51 = vld [vmem:[#allocation3 + $0x11] ss:$8 sps:$4 sm:$0xff]   ;;  %v7399_v31 = vld [vmem:[#allocation3 + $0x22] ss:$8 sps:$4 sm:$0xff]  }
 0x3ca   : > { %3763 = vmatmul.mubr.bf16.vlgmr.msra.gmra.mrb[52].mxu0 %v3024_v44  ;;  %6707 = vmatpush3.bf16.msra.mxu1 %v7352_v25  ;;  %v3090_v55 = vpack.c.bf16 %v7357_v53, %v7356_v51  ;;  %v7386_v15 = vld [vmem:[#allocation3 + $0x9] ss:$8 sps:$4 sm:$0xff]   ;;  %v7387_v16 = vld [vmem:[#allocation3 + $0x19] ss:$8 sps:$4 sm:$0xff]  }
 0x3cb   : > { %6729 = vmatpush3.bf16.msra.mxu0 %v7353_v38  ;;  %6708 = vmatprep.subr.bf16.mxu1 %v7358_v40  ;;  %v7388_v60 = vld [vmem:[#allocation3 + $0x10] ss:$8 sps:$4 sm:$0xff]   ;;  %v3050_v20 = vpack.c.bf16 %v7387_v16, %v7386_v15  ;;  %v7408_v19 = vld [vmem:[#allocation6 + $0x710] sm:$0xff]   ;;  %v7412_v44 = vld [vmem:[#allocation6 + $0x718] sm:$0xff]  }
 0x3cc   : > { %3803 = vmatprep.mubr.bf16.mxu1 %v3063_v50  ;;  %6730 = vmatprep.subr.bf16.mxu0 %v7359_v42  ;;  %v3077_v13 = vpack.c.bf16 %v7389_v17, %v7388_v60  ;;  %v7398_v29 = vld [vmem:[#allocation3 + $0x12] ss:$8 sps:$4 sm:$0xff]   ;;  %v7409_v41 = vld [vmem:[#allocation6 + $0x790] sm:$0xff]   ;;  %v7413_v46 = vld [vmem:[#allocation6 + $0x798] sm:$0xff]  }
 0x3cd   : > { %3844 = vmatprep.mubr.bf16.mxu0 %v3090_v55  ;;  %v3103_v32 = vpack.c.bf16 %v7399_v31, %v7398_v29  ;;  %v7400_v21 = vld [vmem:[#allocation6 + $0x700] sm:$0xff]   ;;  %v7404_v36 = vld [vmem:[#allocation6 + $0x708] sm:$0xff]   ;;  %v7410_v42 = vld [vmem:[#allocation6 + $0x6d0] sm:$0xff]  }
 0x3ce   : > { %6709 = vmatpush3.bf16.msra.mxu1 %v7360_v9  ;;  %v7401_v33 = vld [vmem:[#allocation6 + $0x780] sm:$0xff]   ;;  %v7405_v37 = vld [vmem:[#allocation6 + $0x788] sm:$0xff]   ;;  %v7411_v22 = vld [vmem:[#allocation6 + $0x750] sm:$0xff]  }
 0x3cf   : > { %6731 = vmatpush3.bf16.msra.mxu0 %v7361_v48  ;;  %6710 = vmatprep.subr.bf16.mxu1 %v7362_v49  ;;  %v7402_v34 = vld [vmem:[#allocation6 + $0x6c0] sm:$0xff]   ;;  %v7406_v38 = vld [vmem:[#allocation6 + $0x6c8] sm:$0xff]   ;;  %v7414_v47 = vld [vmem:[#allocation6 + $0x6d8] sm:$0xff]  }
 0x3d0   : > { %6732 = vmatprep.subr.bf16.mxu0 %v7363_v56  ;;  %v7403_v25 = vld [vmem:[#allocation6 + $0x740] sm:$0xff]   ;;  %v7407_v40 = vld [vmem:[#allocation6 + $0x748] sm:$0xff]   ;;  %v7415_v9 = vld [vmem:[#allocation6 + $0x758] sm:$0xff]  }
 0x3d1   : > { %v7416_v48 = vld [vmem:[#allocation6 + $0x720] sm:$0xff]   ;;  %v7420_v53 = vld [vmem:[#allocation6 + $0x728] sm:$0xff]  }
 0x3d2   : > { %6711 = vmatpush3.bf16.msra.mxu1 %v7364_v30  ;;  %v7417_v49 = vld [vmem:[#allocation6 + $0x7a0] sm:$0xff]   ;;  %v7421_v55 = vld [vmem:[#allocation6 + $0x7a8] sm:$0xff]  }
 0x3d3   : > { %6733 = vmatpush3.bf16.msra.mxu0 %v7365_v35  ;;  %6712 = vmatprep.subr.bf16.mxu1 %v7366_v58  ;;  %v7418_v50 = vld [vmem:[#allocation6 + $0x6e0] sm:$0xff]   ;;  %v7422_v56 = vld [vmem:[#allocation6 + $0x6e8] sm:$0xff]   ;;  %v7424_v35 = vld [vmem:[#allocation6 + $0x730] sm:$0xff]  }
 0x3d4   : > { %6734 = vmatprep.subr.bf16.mxu0 %v7367_v59  ;;  %v7419_v51 = vld [vmem:[#allocation6 + $0x760] sm:$0xff]   ;;  %v7423_v30 = vld [vmem:[#allocation6 + $0x768] sm:$0xff]   ;;  %v7425_v58 = vld [vmem:[#allocation6 + $0x7b0] sm:$0xff]  }
 0x3d5   : > { %v7426_v59 = vld [vmem:[#allocation6 + $0x6f0] sm:$0xff]  }
 0x3d6   : > { %6713 = vmatpush3.bf16.msra.mxu1 %v7368_v39  ;;  %v7427_v39 = vld [vmem:[#allocation6 + $0x770] sm:$0xff]  }
 0x3d7   : > { %6735 = vmatpush3.bf16.msra.mxu0 %v7369_v61  ;;  %6714 = vmatprep.subr.bf16.mxu1 %v7370_v43  ;;  %v7428_v61 = vld [vmem:[#allocation6 + $0x738] sm:$0xff]  }
 0x3d8   : > { %6736 = vmatprep.subr.bf16.mxu0 %v7371_v62  ;;  %v7429_v43 = vld [vmem:[#allocation6 + $0x7b8] sm:$0xff]  }
 0x3d9   : > { %v7430_v62 = vld [vmem:[#allocation6 + $0x6f8] sm:$0xff]  }
 0x3da   : > { %6715 = vmatpush3.bf16.msra.mxu1 %v7372_v63  ;;  %v7431_v63 = vld [vmem:[#allocation6 + $0x778] sm:$0xff]  }
 0x3db   : > { %6737 = vmatpush3.bf16.msra.mxu0 %v7373_v1  ;;  %6716 = vmatprep.subr.bf16.mxu1 %v7374_v3  ;;  %v7436_v1 = vld [vmem:[#allocation6 + $0x800] sm:$0xff]  }
 0x3dc   : > { %6738 = vmatprep.subr.bf16.mxu0 %v7375_v5  ;;  %v7437_v3 = vld [vmem:[#allocation6 + $0x880] sm:$0xff]  }
 0x3de   : > { %6717 = vmatpush3.bf16.msra.mxu1 %v7376_v6 }
 0x3df   : > { %6739 = vmatpush3.bf16.msra.mxu0 %v7377_v7  ;;  %6718 = vmatprep.subr.bf16.mxu1 %v7378_v11  ;;  %v6158_v7 = vld [vmem:[#allocation8 + $0x2] ss:$0 sm:$0xff] }
 0x3e0   : > { %6740 = vmatprep.subr.bf16.mxu0 %v7379_v4 }
 0x3e2   : > { %6719 = vmatpush3.bf16.msra.mxu1 %v7380_v10 }
 0x3e3   : > { %6741 = vmatpush3.bf16.msra.mxu0 %v7381_v52  ;;  %6720 = vmatprep.subr.bf16.mxu1 %v7382_v12 }
 0x3e4   : > { %6742 = vmatprep.subr.bf16.mxu0 %v7383_v14 }
 0x3e6   : > { %6721 = vmatpush3.bf16.msra.mxu1 %v7384_v57 }
 0x3e7   : > { %6743 = vmatpush3.bf16.msra.mxu0 %v7385_v54  ;;  %7013 = vmatprep.subr.bf16.mxu1 %v7687_v0 }
 0x3e8   : > { %6759 = vmatprep.subr.bf16.mxu0 %v7400_v21 }
 0x3e9   : > { %3804 = vmatmul.mubr.bf16.vlgmr.msra.gmra.mrb[52].mxu1 %v3050_v20 }
 0x3ea   : > { %3845 = vmatmul.mubr.bf16.vlgmr.msra.gmra.mrb[56].mxu0 %v3077_v13  ;;  %7014 = vmatpush3.bf16.msra.mxu1 %v7390_v2 }
 0x3eb   : > { %7015 = vmatprep.subr.bf16.mxu1 %v7687_v0  ;;  %7029 = vmatprep.mubr.msk.bf16.mxu1 %vm7689_vm4, %v7687_v0 }
 0x3ec   : > { %6760 = vmatpush3.bf16.msra.mxu0 %v7402_v34 }
 0x3ed   : > { %6761 = vmatprep.subr.bf16.mxu0 %v7404_v36 }
 0x3ee   : > { %7016 = vmatpush3.bf16.msra.mxu1 %v7391_v23 }
 0x3ef   : > { %7017 = vmatprep.subr.bf16.mxu1 %v7687_v0 }
 0x3f0   : > { %6762 = vmatpush3.bf16.msra.mxu0 %v7406_v38 }
 0x3f1   : > { %6763 = vmatprep.subr.bf16.mxu0 %v7408_v19 }
 0x3f2   : > { %7018 = vmatpush3.bf16.msra.mxu1 %v7392_v24 }
 0x3f3   : > { %7019 = vmatprep.subr.bf16.mxu1 %v7687_v0 }
 0x3f4   : > { %6764 = vmatpush3.bf16.msra.mxu0 %v7410_v42 }
 0x3f5   : > { %6765 = vmatprep.subr.bf16.mxu0 %v7412_v44 }
 0x3f6   : > { %7020 = vmatpush3.bf16.msra.mxu1 %v7393_v26 }
 0x3f7   : > { %7021 = vmatprep.subr.bf16.mxu1 %v7687_v0 }
 0x3f8   : > { %6766 = vmatpush3.bf16.msra.mxu0 %v7414_v47 }
 0x3f9   : > { %6767 = vmatprep.subr.bf16.mxu0 %v7416_v48 }
 0x3fa   : > { %7022 = vmatpush3.bf16.msra.mxu1 %v7394_v45 }
 0x3fb   : > { %7023 = vmatprep.subr.bf16.mxu1 %v7687_v0 }
 0x3fc   : > { %6768 = vmatpush3.bf16.msra.mxu0 %v7418_v50 }
 0x3fd   : > { %6769 = vmatprep.subr.bf16.mxu0 %v7420_v53 }
 0x3fe   : > { %7024 = vmatpush3.bf16.msra.mxu1 %v7395_v27 }
 0x3ff   : > { %7025 = vmatprep.subr.bf16.mxu1 %v7687_v0 }
 0x400   : > { %6770 = vmatpush3.bf16.msra.mxu0 %v7422_v56 }
 0x401   : > { %6771 = vmatprep.subr.bf16.mxu0 %v7424_v35 }
 0x402   : > { %7026 = vmatpush3.bf16.msra.mxu1 %v7396_v28 }
 0x403   : > { %7027 = vmatprep.subr.bf16.mxu1 %v7687_v0 }
 0x404   : > { %6772 = vmatpush3.bf16.msra.mxu0 %v7426_v59 }
 0x405   : > { %6773 = vmatprep.subr.bf16.mxu0 %v7428_v61 }
 0x406   : > { %7028 = vmatpush3.bf16.msra.mxu1 %v7397_v8 }
 0x407   : > { %6781 = vmatprep.subr.bf16.mxu1 %v7401_v33 }
 0x408   : > { %6774 = vmatpush3.bf16.msra.mxu0 %v7430_v62 }
 0x409   : > { %7030 = vmatmul.mubr.bf16.vlgmr.msra.gmra.mrb[56].mxu1 %v3103_v32  ;;  %6803 = vmatprep.subr.bf16.mxu0 %v7436_v1  ;;  %v7443_v1 = vld [vmem:[#allocation6 + $0x840] sm:$0xff]  }
 0x40a   : > { %6782 = vmatpush3.bf16.msra.mxu1 %v7403_v25 }
 0x40b   : > { %6783 = vmatprep.subr.bf16.mxu1 %v7405_v37 }
 0x40e   : > { %6784 = vmatpush3.bf16.msra.mxu1 %v7407_v40 }
 0x40f   : > { %6785 = vmatprep.subr.bf16.mxu1 %v7409_v41 }
 0x412   : > { %6786 = vmatpush3.bf16.msra.mxu1 %v7411_v22 }
 0x413   : > { %6787 = vmatprep.subr.bf16.mxu1 %v7413_v46 }
 0x416   : > { %6788 = vmatpush3.bf16.msra.mxu1 %v7415_v9 }
 0x417   : > { %6789 = vmatprep.subr.bf16.mxu1 %v7417_v49 }
 0x41a   : > { %6790 = vmatpush3.bf16.msra.mxu1 %v7419_v51 }
 0x41b   : > { %6791 = vmatprep.subr.bf16.mxu1 %v7421_v55 }
 0x41e   : > { %6792 = vmatpush3.bf16.msra.mxu1 %v7423_v30 }
 0x41f   : > { %6793 = vmatprep.subr.bf16.mxu1 %v7425_v58 }
 0x422   : > { %6794 = vmatpush3.bf16.msra.mxu1 %v7427_v39 }
 0x423   : > { %6795 = vmatprep.subr.bf16.mxu1 %v7429_v43  ;;  %v7442_v43 = vld [vmem:[#allocation6 + $0x7c0] sm:$0xff]  }
 0x426   : > { %6796 = vmatpush3.bf16.msra.mxu1 %v7431_v63 }
 0x427   : > { %6825 = vmatprep.subr.bf16.mxu1 %v7437_v3  ;;  %v7448_v3 = vld [vmem:[#allocation6 + $0x808] sm:$0xff]  }
 0x49c   : > { %v6678_v5 = vpop.f32.mrb[48].mxu1 }
 0x49d   : > { %v6700_v6 = vpop.f32.mrb[52].mxu0  ;;  %v6679_v11 = vpop.f32.mrb[49].mxu1 }
 0x49e   : > { %v6680_v4 = vadd.f32 %v6679_v11, %v6678_v5  ;;  %v6701_v10 = vpop.f32.mrb[53].mxu0  ;;  %v6681_v52 = vpop.f32.mrb[50].mxu1 }
 0x49f   : > { %v6702_v12 = vadd.f32 %v6701_v10, %v6700_v6  ;;  %v6703_v14 = vpop.f32.mrb[54].mxu0  ;;  %v6682_v57 = vpop.f32.mrb[51].mxu1 }
 0x4a0   : > { %v3724_v54 = vadd.f32 %v6680_v4, %v6158_v7  ;;  %v6683_v15 = vadd.f32 %v6682_v57, %v6681_v52  ;;  %v6704_v16 = vpop.f32.mrb[55].mxu0  ;;  %v7452_v57 = vld [vmem:[#allocation6 + $0x810] sm:$0xff]  }
 0x4a1   : > { %v6705_v60 = vadd.f32 %v6704_v16, %v6703_v14  ;;  %v7451_v14 = vld [vmem:[#allocation6 + $0x848] sm:$0xff]  }
 0x4a2   : > { %v3765_v17 = vadd.f32 %v6702_v12, %v3724_v54  ;;  %v3727_v2 = vadd.f32 %v6683_v15, %v6158_v7  ;;  %v7449_v7 = vld [vmem:[#allocation6 + $0x888] sm:$0xff]  }
 0x4a3   : > { %v7450_v12 = vld [vmem:[#allocation6 + $0x7c8] sm:$0xff]  }
 0x4a4   : > { %v3768_v20 = vadd.f32 %v6705_v60, %v3727_v2  ;;  %v7454_v2 = vld [vmem:[#allocation6 + $0x7d0] sm:$0xff]  }
 0x4bc   : > { %v6722_v13 = vpop.f32.mrb[52].mxu1 }
 0x4bd   : > { %v6744_v23 = vpop.f32.mrb[56].mxu0  ;;  %v6723_v24 = vpop.f32.mrb[53].mxu1 }
 0x4be   : > { %v6724_v26 = vadd.f32 %v6723_v24, %v6722_v13  ;;  %v6745_v45 = vpop.f32.mrb[57].mxu0  ;;  %v6725_v27 = vpop.f32.mrb[54].mxu1  ;;  %v7456_v13 = vld [vmem:[#allocation6 + $0x818] sm:$0xff]  }
 0x4bf   : > { %v6746_v28 = vadd.f32 %v6745_v45, %v6744_v23  ;;  %v6747_v8 = vpop.f32.mrb[58].mxu0  ;;  %v6726_v29 = vpop.f32.mrb[55].mxu1  ;;  %v7457_v23 = vld [vmem:[#allocation6 + $0x898] sm:$0xff]   ;;  %v7460_v45 = vld [vmem:[#allocation6 + $0x820] sm:$0xff]  }
 0x4c0   : > { %v3806_v31 = vadd.f32 %v6724_v26, %v3765_v17  ;;  %v6727_v32 = vadd.f32 %v6726_v29, %v6725_v27  ;;  %v6748_v21 = vpop.f32.mrb[59].mxu0  ;;  %v7453_v17 = vld [vmem:[#allocation6 + $0x890] sm:$0xff]   ;;  %v7458_v24 = vld [vmem:[#allocation6 + $0x7d8] sm:$0xff]   ;;  %v7461_v27 = vld [vmem:[#allocation6 + $0x8a0] sm:$0xff]  }
 0x4c1   : > { %v6749_v33 = vadd.f32 %v6748_v21, %v6747_v8  ;;  %v7459_v26 = vld [vmem:[#allocation6 + $0x858] sm:$0xff]   ;;  %v7463_v8 = vld [vmem:[#allocation6 + $0x860] sm:$0xff]   ;;  %v7464_v29 = vld [vmem:[#allocation6 + $0x828] sm:$0xff]  }
 0x4c2   : > { %v3809_v34 = vadd.f32 %v6727_v32, %v3768_v20  ;;  %v3847_v25 = vadd.f32 %v6746_v28, %v3806_v31  ;;  %v7455_v20 = vld [vmem:[#allocation6 + $0x850] sm:$0xff]   ;;  %v7462_v28 = vld [vmem:[#allocation6 + $0x7e0] sm:$0xff]   ;;  %v7465_v31 = vld [vmem:[#allocation6 + $0x8a8] sm:$0xff]  }
 0x4c3   : > { %v7466_v32 = vld [vmem:[#allocation6 + $0x7e8] sm:$0xff]  }
 0x4c4   : > { %v3850_v36 = vadd.f32 %v6749_v33, %v3809_v34  ;;  %v7467_v21 = vld [vmem:[#allocation6 + $0x868] sm:$0xff]   ;;  %v7468_v33 = vld [vmem:[#allocation6 + $0x830] sm:$0xff]  }
 0x4c5   : > { %v7469_v34 = vld [vmem:[#allocation6 + $0x8b0] sm:$0xff]  }
 0x4dc   : > { %v3887_v37 = vpop.f32.mrb[56].mxu1 }
 0x4dd   : > { %v3888_v38 = vadd.f32 %v3887_v37, %v3847_v25  ;;  %v7031_v40 = vpop.f32.mrb[57].mxu1  ;;  %v7470_v25 = vld [vmem:[#allocation6 + $0x7f0] sm:$0xff]   ;;  %v7472_v37 = vld [vmem:[#allocation6 + $0x838] sm:$0xff]  }
 0x4de   : > { %v3890_v19 = vpop.f32.mrb[58].mxu1  ;;  %v7474_v40 = vld [vmem:[#allocation6 + $0x7f8] sm:$0xff]  }
 0x4df   : > { %v3891_v41 = vadd.f32 %v3890_v19, %v3850_v36  ;;  %v7032_v42 = vpop.f32.mrb[59].mxu1  ;;  %v3894_v22 = vmax.f32 %v3888_v38, 0.0  ;;  %v7471_v36 = vld [vmem:[#allocation6 + $0x870] sm:$0xff]   ;;  %v7473_v38 = vld [vmem:[#allocation6 + $0x8b8] sm:$0xff]  }
 0x4e0   : > { %v7475_v19 = vld [vmem:[#allocation6 + $0x878] sm:$0xff]  }
 0x4e1   : > { %v3895_v44 = vmax.f32 %v3891_v41, 0.0 }
 0x4e3   : > { %v3896_v46 = vpack.c.bf16 %v3895_v44, %v3894_v22  ;;  %v6231_v47 = vpack.c.bf16 %v3895_v44, %v3895_v44 }
 0x4e5   : > { %v3905_v9 = vrot.slane %v3896_v46, %v8058_v18  ;;  %v3912_v48 = vrot.slane %v6231_v47, %v8058_v18  ;;  %v7480_v46 = vld [vmem:[#allocation6 + $0x8c0] sm:$0xff]  }
 0x4e7   : > { %v3913_v49 = vcombine.high %v3905_v9, %v3905_v9  ;;  %v3914_v50 = vcombine.high %v3912_v48, %v3912_v48  ;;  %v3919_v51 = vunpack.c.l.bf16 %v3905_v9  ;;  %v3921_v53 = vunpack.c.l.bf16 %v3912_v48  ;;  %v7481_v48 = vld [vmem:[#allocation6 + $0x8c8] sm:$0xff]  }
 0x4e9   : > { %v3920_v55 = vunpack.c.l.bf16 %v3913_v49  ;;  %v3922_v56 = vunpack.c.l.bf16 %v3914_v50  ;;  %3924 = vst [vmem:[#allocation4 + $0x9] sm:$0xf] %v3919_v51  ;;  %3926 = vst [vmem:[#allocation4 + $0x19] sm:$0xf] %v3921_v53  ;;  %v7482_v49 = vld [vmem:[#allocation6 + $0x8d0] sm:$0xff]   ;;  %v7483_v50 = vld [vmem:[#allocation6 + $0x8d8] sm:$0xff]  }
 0x4ea   : > { %v7484_v51 = vld [vmem:[#allocation6 + $0x8e0] sm:$0xff]   ;;  %v7485_v53 = vld [vmem:[#allocation6 + $0x8e8] sm:$0xff]  }
 0x4eb   : > { %3925 = vst [vmem:[#allocation4 + $0x11] sm:$0xf] %v3920_v55  ;;  %3927 = vst [vmem:[#allocation4 + $0x21] sm:$0xf] %v3922_v56  ;;  %v7486_v55 = vld [vmem:[#allocation6 + $0x8f0] sm:$0xff]   ;;  %v7487_v56 = vld [vmem:[#allocation6 + $0x8f8] sm:$0xff]  }
 0x4f0   : > { %v7432_v30 = vld [vmem:[#allocation4 + $0x1] ss:$8 sps:$4 sm:$0xff]  }
 0x4f1   : > { %v7438_v61 = vld [vmem:[#allocation4] ss:$8 sps:$4 sm:$0xff]  }
 0x4f2   : > { %v7433_v35 = vld [vmem:[#allocation4 + $0x11] ss:$8 sps:$4 sm:$0xff]   ;;  %v7440_v5 = vld [vmem:[#allocation4 + $0x2] ss:$8 sps:$4 sm:$0xff]  }
 0x4f3   : > { %v7434_v58 = vld [vmem:[#allocation4 + $0x8] ss:$8 sps:$4 sm:$0xff]   ;;  %v7435_v59 = vld [vmem:[#allocation4 + $0x18] ss:$8 sps:$4 sm:$0xff]   ;;  %v3953_v39 = vpack.c.bf16 %v7433_v35, %v7432_v30 }
 0x4f4   : > { %v3979_v62 = vpack.c.bf16 %v7435_v59, %v7434_v58  ;;  %v7439_v63 = vld [vmem:[#allocation4 + $0x10] ss:$8 sps:$4 sm:$0xff]   ;;  %v7447_v16 = vld [vmem:[#allocation4 + $0x21] ss:$8 sps:$4 sm:$0xff]  }
 0x4f5   : > { %4663 = vmatprep.mubr.bf16.mxu0 %v3953_v39  ;;  %v7441_v6 = vld [vmem:[#allocation4 + $0x12] ss:$8 sps:$4 sm:$0xff]   ;;  %v3940_v11 = vpack.c.bf16 %v7439_v63, %v7438_v61  ;;  %v7479_v44 = vld [vmem:[#allocation4 + $0x20] ss:$8 sps:$4 sm:$0xff]  }
 0x4f6   : > { %4704 = vmatprep.mubr.bf16.mxu1 %v3979_v62  ;;  %v3966_v4 = vpack.c.bf16 %v7441_v6, %v7440_v5  ;;  %v7444_v10 = vld [vmem:[#allocation4 + $0xa] ss:$8 sps:$4 sm:$0xff]   ;;  %v7445_v52 = vld [vmem:[#allocation4 + $0x1a] ss:$8 sps:$4 sm:$0xff]  }
 0x4f7   : > { %4664 = vmatmul.mubr.bf16.vlgmr.msra.gmra.mrb[60].mxu0 %v3940_v11  ;;  %v4005_v54 = vpack.c.bf16 %v7445_v52, %v7444_v10  ;;  %v7446_v15 = vld [vmem:[#allocation4 + $0x11] ss:$8 sps:$4 sm:$0xff]   ;;  %v7489_v35 = vld [vmem:[#allocation4 + $0x22] ss:$8 sps:$4 sm:$0xff]  }
 0x4f8   : > { %4705 = vmatmul.mubr.bf16.vlgmr.msra.gmra.mrb[60].mxu1 %v3966_v4  ;;  %6804 = vmatpush3.bf16.msra.mxu0 %v7442_v43  ;;  %v4032_v60 = vpack.c.bf16 %v7447_v16, %v7446_v15  ;;  %v7476_v41 = vld [vmem:[#allocation4 + $0x9] ss:$8 sps:$4 sm:$0xff]   ;;  %v7477_v42 = vld [vmem:[#allocation4 + $0x19] ss:$8 sps:$4 sm:$0xff]  }
 0x4f9   : > { %6826 = vmatpush3.bf16.msra.mxu1 %v7443_v1  ;;  %6805 = vmatprep.subr.bf16.mxu0 %v7448_v3  ;;  %v7478_v22 = vld [vmem:[#allocation4 + $0x10] ss:$8 sps:$4 sm:$0xff]   ;;  %v3992_v47 = vpack.c.bf16 %v7477_v42, %v7476_v41  ;;  %v7490_v59 = vld [vmem:[#allocation6 + $0x940] sm:$0xff]   ;;  %v7494_v62 = vld [vmem:[#allocation6 + $0x948] sm:$0xff]  }
 0x4fa   : > { %4745 = vmatprep.mubr.bf16.mxu0 %v4005_v54  ;;  %6827 = vmatprep.subr.bf16.mxu1 %v7449_v7  ;;  %v4019_v9 = vpack.c.bf16 %v7479_v44, %v7478_v22  ;;  %v7488_v30 = vld [vmem:[#allocation4 + $0x12] ss:$8 sps:$4 sm:$0xff]   ;;  %v7491_v39 = vld [vmem:[#allocation6 + $0x9c0] sm:$0xff]   ;;  %v7495_v63 = vld [vmem:[#allocation6 + $0x9c8] sm:$0xff]  }
 0x4fb   : > { %4786 = vmatprep.mubr.bf16.mxu1 %v4032_v60  ;;  %v4045_v58 = vpack.c.bf16 %v7489_v35, %v7488_v30  ;;  %v7492_v61 = vld [vmem:[#allocation6 + $0x900] sm:$0xff]   ;;  %v7496_v1 = vld [vmem:[#allocation6 + $0x908] sm:$0xff]   ;;  %v7498_v5 = vld [vmem:[#allocation6 + $0x950] sm:$0xff]  }
 0x4fc   : > { %6806 = vmatpush3.bf16.msra.mxu0 %v7450_v12  ;;  %v7493_v43 = vld [vmem:[#allocation6 + $0x980] sm:$0xff]   ;;  %v7497_v3 = vld [vmem:[#allocation6 + $0x988] sm:$0xff]   ;;  %v7499_v6 = vld [vmem:[#allocation6 + $0x9d0] sm:$0xff]  }
 0x4fd   : > { %6828 = vmatpush3.bf16.msra.mxu1 %v7451_v14  ;;  %6807 = vmatprep.subr.bf16.mxu0 %v7452_v57  ;;  %v7500_v7 = vld [vmem:[#allocation6 + $0x910] sm:$0xff]   ;;  %v7502_v4 = vld [vmem:[#allocation6 + $0x958] sm:$0xff]   ;;  %v7506_v14 = vld [vmem:[#allocation6 + $0x960] sm:$0xff]  }
 0x4fe   : > { %6829 = vmatprep.subr.bf16.mxu1 %v7453_v17  ;;  %v7501_v11 = vld [vmem:[#allocation6 + $0x990] sm:$0xff]   ;;  %v7503_v10 = vld [vmem:[#allocation6 + $0x9d8] sm:$0xff]   ;;  %v7507_v57 = vld [vmem:[#allocation6 + $0x9e0] sm:$0xff]  }
 0x4ff   : > { %v7504_v52 = vld [vmem:[#allocation6 + $0x918] sm:$0xff]   ;;  %v7508_v54 = vld [vmem:[#allocation6 + $0x920] sm:$0xff]   ;;  %v7510_v16 = vld [vmem:[#allocation6 + $0x968] sm:$0xff]  }
 0x500   : > { %6808 = vmatpush3.bf16.msra.mxu0 %v7454_v2  ;;  %v7505_v12 = vld [vmem:[#allocation6 + $0x998] sm:$0xff]   ;;  %v7509_v15 = vld [vmem:[#allocation6 + $0x9a0] sm:$0xff]   ;;  %v7511_v60 = vld [vmem:[#allocation6 + $0x9e8] sm:$0xff]  }
 0x501   : > { %6830 = vmatpush3.bf16.msra.mxu1 %v7455_v20  ;;  %6809 = vmatprep.subr.bf16.mxu0 %v7456_v13  ;;  %v7512_v17 = vld [vmem:[#allocation6 + $0x928] sm:$0xff]   ;;  %v7514_v20 = vld [vmem:[#allocation6 + $0x970] sm:$0xff]  }
 0x502   : > { %6831 = vmatprep.subr.bf16.mxu1 %v7457_v23  ;;  %v7513_v2 = vld [vmem:[#allocation6 + $0x9a8] sm:$0xff]   ;;  %v7515_v13 = vld [vmem:[#allocation6 + $0x9f0] sm:$0xff]  }
 0x503   : > { %v7516_v23 = vld [vmem:[#allocation6 + $0x930] sm:$0xff]  }
 0x504   : > { %6810 = vmatpush3.bf16.msra.mxu0 %v7458_v24  ;;  %v7517_v24 = vld [vmem:[#allocation6 + $0x9b0] sm:$0xff]  }
 0x505   : > { %6832 = vmatpush3.bf16.msra.mxu1 %v7459_v26  ;;  %6811 = vmatprep.subr.bf16.mxu0 %v7460_v45  ;;  %v7518_v26 = vld [vmem:[#allocation6 + $0x978] sm:$0xff]  }
 0x506   : > { %6833 = vmatprep.subr.bf16.mxu1 %v7461_v27  ;;  %v7519_v45 = vld [vmem:[#allocation6 + $0x9f8] sm:$0xff]  }
 0x507   : > { %v7520_v27 = vld [vmem:[#allocation6 + $0x938] sm:$0xff]  }
 0x508   : > { %6812 = vmatpush3.bf16.msra.mxu0 %v7462_v28  ;;  %v7521_v28 = vld [vmem:[#allocation6 + $0x9b8] sm:$0xff]  }
 0x509   : > { %6834 = vmatpush3.bf16.msra.mxu1 %v7463_v8  ;;  %6813 = vmatprep.subr.bf16.mxu0 %v7464_v29  ;;  %v7526_v8 = vld [vmem:[#allocation6 + $0xa40] sm:$0xff]  }
 0x50a   : > { %6835 = vmatprep.subr.bf16.mxu1 %v7465_v31  ;;  %v7527_v29 = vld [vmem:[#allocation6 + $0xac0] sm:$0xff]  }
 0x50c   : > { %6814 = vmatpush3.bf16.msra.mxu0 %v7466_v32 }
 0x50d   : > { %6836 = vmatpush3.bf16.msra.mxu1 %v7467_v21  ;;  %6815 = vmatprep.subr.bf16.mxu0 %v7468_v33  ;;  %v6232_v21 = vld [vmem:[#allocation8 + $0x3] ss:$0 sm:$0xff] }
 0x50e   : > { %6837 = vmatprep.subr.bf16.mxu1 %v7469_v34 }
 0x510   : > { %6816 = vmatpush3.bf16.msra.mxu0 %v7470_v25 }
 0x511   : > { %6838 = vmatpush3.bf16.msra.mxu1 %v7471_v36  ;;  %6817 = vmatprep.subr.bf16.mxu0 %v7472_v37 }
 0x512   : > { %6839 = vmatprep.subr.bf16.mxu1 %v7473_v38 }
 0x514   : > { %6818 = vmatpush3.bf16.msra.mxu0 %v7474_v40 }
 0x515   : > { %6840 = vmatpush3.bf16.msra.mxu1 %v7475_v19  ;;  %7033 = vmatprep.subr.bf16.mxu0 %v7687_v0 }
 0x516   : > { %6856 = vmatprep.subr.bf16.mxu1 %v7490_v59 }
 0x517   : > { %4746 = vmatmul.mubr.bf16.vlgmr.msra.gmra.mrb[64].mxu0 %v3992_v47 }
 0x518   : > { %4787 = vmatmul.mubr.bf16.vlgmr.msra.gmra.mrb[64].mxu1 %v4019_v9  ;;  %7034 = vmatpush3.bf16.msra.mxu0 %v7480_v46 }
 0x519   : > { %7035 = vmatprep.subr.bf16.mxu0 %v7687_v0  ;;  %7049 = vmatprep.mubr.msk.bf16.mxu0 %vm7689_vm4, %v7687_v0 }
 0x51a   : > { %6857 = vmatpush3.bf16.msra.mxu1 %v7492_v61 }
 0x51b   : > { %6858 = vmatprep.subr.bf16.mxu1 %v7494_v62 }
 0x51c   : > { %7036 = vmatpush3.bf16.msra.mxu0 %v7481_v48 }
 0x51d   : > { %7037 = vmatprep.subr.bf16.mxu0 %v7687_v0 }
 0x51e   : > { %6859 = vmatpush3.bf16.msra.mxu1 %v7496_v1 }
 0x51f   : > { %6860 = vmatprep.subr.bf16.mxu1 %v7498_v5 }
 0x520   : > { %7038 = vmatpush3.bf16.msra.mxu0 %v7482_v49 }
 0x521   : > { %7039 = vmatprep.subr.bf16.mxu0 %v7687_v0 }
 0x522   : > { %6861 = vmatpush3.bf16.msra.mxu1 %v7500_v7 }
 0x523   : > { %6862 = vmatprep.subr.bf16.mxu1 %v7502_v4 }
 0x524   : > { %7040 = vmatpush3.bf16.msra.mxu0 %v7483_v50 }
 0x525   : > { %7041 = vmatprep.subr.bf16.mxu0 %v7687_v0 }
 0x526   : > { %6863 = vmatpush3.bf16.msra.mxu1 %v7504_v52 }
 0x527   : > { %6864 = vmatprep.subr.bf16.mxu1 %v7506_v14 }
 0x528   : > { %7042 = vmatpush3.bf16.msra.mxu0 %v7484_v51 }
 0x529   : > { %7043 = vmatprep.subr.bf16.mxu0 %v7687_v0 }
 0x52a   : > { %6865 = vmatpush3.bf16.msra.mxu1 %v7508_v54 }
 0x52b   : > { %6866 = vmatprep.subr.bf16.mxu1 %v7510_v16 }
 0x52c   : > { %7044 = vmatpush3.bf16.msra.mxu0 %v7485_v53 }
 0x52d   : > { %7045 = vmatprep.subr.bf16.mxu0 %v7687_v0 }
 0x52e   : > { %6867 = vmatpush3.bf16.msra.mxu1 %v7512_v17 }
 0x52f   : > { %6868 = vmatprep.subr.bf16.mxu1 %v7514_v20 }
 0x530   : > { %7046 = vmatpush3.bf16.msra.mxu0 %v7486_v55 }
 0x531   : > { %7047 = vmatprep.subr.bf16.mxu0 %v7687_v0 }
 0x532   : > { %6869 = vmatpush3.bf16.msra.mxu1 %v7516_v23 }
 0x533   : > { %6870 = vmatprep.subr.bf16.mxu1 %v7518_v26 }
 0x534   : > { %7048 = vmatpush3.bf16.msra.mxu0 %v7487_v56 }
 0x535   : > { %6878 = vmatprep.subr.bf16.mxu0 %v7491_v39 }
 0x536   : > { %6871 = vmatpush3.bf16.msra.mxu1 %v7520_v27 }
 0x537   : > { %7050 = vmatmul.mubr.bf16.vlgmr.msra.gmra.mrb[68].mxu0 %v4045_v58  ;;  %6900 = vmatprep.subr.bf16.mxu1 %v7526_v8  ;;  %v7533_v8 = vld [vmem:[#allocation6 + $0xa80] sm:$0xff]  }
 0x538   : > { %6879 = vmatpush3.bf16.msra.mxu0 %v7493_v43 }
 0x539   : > { %6880 = vmatprep.subr.bf16.mxu0 %v7495_v63 }
 0x53c   : > { %6881 = vmatpush3.bf16.msra.mxu0 %v7497_v3 }
 0x53d   : > { %6882 = vmatprep.subr.bf16.mxu0 %v7499_v6 }
 0x540   : > { %6883 = vmatpush3.bf16.msra.mxu0 %v7501_v11 }
 0x541   : > { %6884 = vmatprep.subr.bf16.mxu0 %v7503_v10 }
 0x544   : > { %6885 = vmatpush3.bf16.msra.mxu0 %v7505_v12 }
 0x545   : > { %6886 = vmatprep.subr.bf16.mxu0 %v7507_v57 }
 0x548   : > { %6887 = vmatpush3.bf16.msra.mxu0 %v7509_v15 }
 0x549   : > { %6888 = vmatprep.subr.bf16.mxu0 %v7511_v60 }
 0x54c   : > { %6889 = vmatpush3.bf16.msra.mxu0 %v7513_v2 }
 0x54d   : > { %6890 = vmatprep.subr.bf16.mxu0 %v7515_v13 }
 0x550   : > { %6891 = vmatpush3.bf16.msra.mxu0 %v7517_v24 }
 0x551   : > { %6892 = vmatprep.subr.bf16.mxu0 %v7519_v45  ;;  %v7532_v45 = vld [vmem:[#allocation6 + $0xa00] sm:$0xff]  }
 0x554   : > { %6893 = vmatpush3.bf16.msra.mxu0 %v7521_v28 }
 0x555   : > { %6922 = vmatprep.subr.bf16.mxu0 %v7527_v29  ;;  %v7538_v29 = vld [vmem:[#allocation6 + $0xa48] sm:$0xff]  }
 0x5ca   : > { %v6775_v31 = vpop.f32.mrb[60].mxu0 }
 0x5cb   : > { %v6797_v32 = vpop.f32.mrb[60].mxu1  ;;  %v6776_v33 = vpop.f32.mrb[61].mxu0 }
 0x5cc   : > { %v6777_v34 = vadd.f32 %v6776_v33, %v6775_v31  ;;  %v6798_v25 = vpop.f32.mrb[61].mxu1  ;;  %v6778_v36 = vpop.f32.mrb[62].mxu0 }
 0x5cd   : > { %v6799_v37 = vadd.f32 %v6798_v25, %v6797_v32  ;;  %v6800_v38 = vpop.f32.mrb[62].mxu1  ;;  %v6779_v40 = vpop.f32.mrb[63].mxu0 }
 0x5ce   : > { %v4666_v19 = vadd.f32 %v6777_v34, %v6232_v21  ;;  %v6780_v41 = vadd.f32 %v6779_v40, %v6778_v36  ;;  %v6801_v42 = vpop.f32.mrb[63].mxu1  ;;  %v7542_v40 = vld [vmem:[#allocation6 + $0xa50] sm:$0xff]  }
 0x5cf   : > { %v6802_v22 = vadd.f32 %v6801_v42, %v6800_v38  ;;  %v7541_v38 = vld [vmem:[#allocation6 + $0xa88] sm:$0xff]  }
 0x5d0   : > { %v4707_v44 = vadd.f32 %v6799_v37, %v4666_v19  ;;  %v4669_v46 = vadd.f32 %v6780_v41, %v6232_v21  ;;  %v7539_v21 = vld [vmem:[#allocation6 + $0xac8] sm:$0xff]  }
 0x5d1   : > { %v7540_v37 = vld [vmem:[#allocation6 + $0xa08] sm:$0xff]  }
 0x5d2   : > { %v4710_v47 = vadd.f32 %v6802_v22, %v4669_v46  ;;  %v7544_v46 = vld [vmem:[#allocation6 + $0xa10] sm:$0xff]  }
 0x5ea   : > { %v6819_v9 = vpop.f32.mrb[64].mxu0 }
 0x5eb   : > { %v6841_v48 = vpop.f32.mrb[64].mxu1  ;;  %v6820_v49 = vpop.f32.mrb[65].mxu0 }
 0x5ec   : > { %v6821_v50 = vadd.f32 %v6820_v49, %v6819_v9  ;;  %v6842_v51 = vpop.f32.mrb[65].mxu1  ;;  %v6822_v53 = vpop.f32.mrb[66].mxu0  ;;  %v7546_v9 = vld [vmem:[#allocation6 + $0xa58] sm:$0xff]  }
 0x5ed   : > { %v6843_v55 = vadd.f32 %v6842_v51, %v6841_v48  ;;  %v6844_v56 = vpop.f32.mrb[66].mxu1  ;;  %v6823_v30 = vpop.f32.mrb[67].mxu0  ;;  %v7547_v48 = vld [vmem:[#allocation6 + $0xad8] sm:$0xff]   ;;  %v7550_v51 = vld [vmem:[#allocation6 + $0xa60] sm:$0xff]  }
 0x5ee   : > { %v4748_v35 = vadd.f32 %v6821_v50, %v4707_v44  ;;  %v6824_v58 = vadd.f32 %v6823_v30, %v6822_v53  ;;  %v6845_v59 = vpop.f32.mrb[67].mxu1  ;;  %v7543_v44 = vld [vmem:[#allocation6 + $0xad0] sm:$0xff]   ;;  %v7548_v49 = vld [vmem:[#allocation6 + $0xa18] sm:$0xff]   ;;  %v7551_v53 = vld [vmem:[#allocation6 + $0xae0] sm:$0xff]  }
 0x5ef   : > { %v6846_v39 = vadd.f32 %v6845_v59, %v6844_v56  ;;  %v7549_v50 = vld [vmem:[#allocation6 + $0xa98] sm:$0xff]   ;;  %v7553_v56 = vld [vmem:[#allocation6 + $0xaa0] sm:$0xff]   ;;  %v7554_v30 = vld [vmem:[#allocation6 + $0xa68] sm:$0xff]  }
 0x5f0   : > { %v4751_v61 = vadd.f32 %v6824_v58, %v4710_v47  ;;  %v4789_v43 = vadd.f32 %v6843_v55, %v4748_v35  ;;  %v7545_v47 = vld [vmem:[#allocation6 + $0xa90] sm:$0xff]   ;;  %v7552_v55 = vld [vmem:[#allocation6 + $0xa20] sm:$0xff]   ;;  %v7555_v35 = vld [vmem:[#allocation6 + $0xae8] sm:$0xff]  }
 0x5f1   : > { %v7556_v58 = vld [vmem:[#allocation6 + $0xa28] sm:$0xff]  }
 0x5f2   : > { %v4792_v62 = vadd.f32 %v6846_v39, %v4751_v61  ;;  %v7557_v59 = vld [vmem:[#allocation6 + $0xaa8] sm:$0xff]   ;;  %v7558_v39 = vld [vmem:[#allocation6 + $0xa70] sm:$0xff]  }
 0x5f3   : > { %v7559_v61 = vld [vmem:[#allocation6 + $0xaf0] sm:$0xff]  }
 0x60a   : > { %v4829_v63 = vpop.f32.mrb[68].mxu0 }
 0x60b   : > { %v4830_v1 = vadd.f32 %v4829_v63, %v4789_v43  ;;  %v7051_v3 = vpop.f32.mrb[69].mxu0  ;;  %v7560_v43 = vld [vmem:[#allocation6 + $0xa30] sm:$0xff]   ;;  %v7562_v63 = vld [vmem:[#allocation6 + $0xa78] sm:$0xff]  }
 0x60c   : > { %v4832_v5 = vpop.f32.mrb[70].mxu0  ;;  %v7564_v3 = vld [vmem:[#allocation6 + $0xa38] sm:$0xff]  }
 0x60d   : > { %v4833_v6 = vadd.f32 %v4832_v5, %v4792_v62  ;;  %v7052_v7 = vpop.f32.mrb[71].mxu0  ;;  %v4836_v11 = vmax.f32 %v4830_v1, 0.0  ;;  %v7561_v62 = vld [vmem:[#allocation6 + $0xab0] sm:$0xff]   ;;  %v7563_v1 = vld [vmem:[#allocation6 + $0xaf8] sm:$0xff]  }
 0x60e   : > { %v7565_v5 = vld [vmem:[#allocation6 + $0xab8] sm:$0xff]  }
 0x60f   : > { %v4837_v4 = vmax.f32 %v4833_v6, 0.0 }
 0x611   : > { %v4838_v10 = vpack.c.bf16 %v4837_v4, %v4836_v11  ;;  %v6305_v52 = vpack.c.bf16 %v4837_v4, %v4837_v4 }
 0x613   : > { %v4847_v12 = vrot.slane %v4838_v10, %v8058_v18  ;;  %v4854_v14 = vrot.slane %v6305_v52, %v8058_v18  ;;  %v7570_v10 = vld [vmem:[#allocation6 + $0xb00] sm:$0xff]  }
 0x615   : > { %v4855_v57 = vcombine.high %v4847_v12, %v4847_v12  ;;  %v4856_v54 = vcombine.high %v4854_v14, %v4854_v14  ;;  %v4861_v15 = vunpack.c.l.bf16 %v4847_v12  ;;  %v4863_v16 = vunpack.c.l.bf16 %v4854_v14  ;;  %v7571_v14 = vld [vmem:[#allocation6 + $0xb08] sm:$0xff]  }
 0x617   : > { %v4862_v60 = vunpack.c.l.bf16 %v4855_v57  ;;  %v4864_v17 = vunpack.c.l.bf16 %v4856_v54  ;;  %4866 = vst [vmem:[#allocation5 + $0x9] sm:$0xf] %v4861_v15  ;;  %4868 = vst [vmem:[#allocation5 + $0x19] sm:$0xf] %v4863_v16  ;;  %v7572_v57 = vld [vmem:[#allocation6 + $0xb10] sm:$0xff]   ;;  %v7573_v54 = vld [vmem:[#allocation6 + $0xb18] sm:$0xff]  }
 0x618   : > { %v7574_v15 = vld [vmem:[#allocation6 + $0xb20] sm:$0xff]   ;;  %v7575_v16 = vld [vmem:[#allocation6 + $0xb28] sm:$0xff]  }
 0x619   : > { %4867 = vst [vmem:[#allocation5 + $0x11] sm:$0xf] %v4862_v60  ;;  %4869 = vst [vmem:[#allocation5 + $0x21] sm:$0xf] %v4864_v17  ;;  %v7576_v60 = vld [vmem:[#allocation6 + $0xb30] sm:$0xff]   ;;  %v7577_v17 = vld [vmem:[#allocation6 + $0xb38] sm:$0xff]  }
 0x61e   : > { %v7522_v2 = vld [vmem:[#allocation5 + $0x1] ss:$8 sps:$4 sm:$0xff]  }
 0x61f   : > { %v7528_v26 = vld [vmem:[#allocation5] ss:$8 sps:$4 sm:$0xff]  }
 0x620   : > { %v7523_v20 = vld [vmem:[#allocation5 + $0x11] ss:$8 sps:$4 sm:$0xff]   ;;  %v7530_v31 = vld [vmem:[#allocation5 + $0x2] ss:$8 sps:$4 sm:$0xff]  }
 0x621   : > { %v7524_v13 = vld [vmem:[#allocation5 + $0x8] ss:$8 sps:$4 sm:$0xff]   ;;  %v7525_v23 = vld [vmem:[#allocation5 + $0x18] ss:$8 sps:$4 sm:$0xff]   ;;  %v4895_v24 = vpack.c.bf16 %v7523_v20, %v7522_v2 }
 0x622   : > { %v4921_v27 = vpack.c.bf16 %v7525_v23, %v7524_v13  ;;  %v7529_v28 = vld [vmem:[#allocation5 + $0x10] ss:$8 sps:$4 sm:$0xff]   ;;  %v7537_v42 = vld [vmem:[#allocation5 + $0x21] ss:$8 sps:$4 sm:$0xff]  }
 0x623   : > { %5605 = vmatprep.mubr.bf16.mxu1 %v4895_v24  ;;  %v7531_v32 = vld [vmem:[#allocation5 + $0x12] ss:$8 sps:$4 sm:$0xff]   ;;  %v4882_v33 = vpack.c.bf16 %v7529_v28, %v7528_v26  ;;  %v7569_v4 = vld [vmem:[#allocation5 + $0x20] ss:$8 sps:$4 sm:$0xff]  }
 0x624   : > { %5646 = vmatprep.mubr.bf16.mxu0 %v4921_v27  ;;  %v4908_v34 = vpack.c.bf16 %v7531_v32, %v7530_v31  ;;  %v7534_v25 = vld [vmem:[#allocation5 + $0xa] ss:$8 sps:$4 sm:$0xff]   ;;  %v7535_v36 = vld [vmem:[#allocation5 + $0x1a] ss:$8 sps:$4 sm:$0xff]  }
 0x625   : > { %5606 = vmatmul.mubr.bf16.vlgmr.msra.gmra.mrb[68].mxu1 %v4882_v33  ;;  %v4947_v19 = vpack.c.bf16 %v7535_v36, %v7534_v25  ;;  %v7536_v41 = vld [vmem:[#allocation5 + $0x11] ss:$8 sps:$4 sm:$0xff]   ;;  %v7579_v20 = vld [vmem:[#allocation5 + $0x22] ss:$8 sps:$4 sm:$0xff]  }
 0x626   : > { %5647 = vmatmul.mubr.bf16.vlgmr.msra.gmra.mrb[72].mxu0 %v4908_v34  ;;  %6901 = vmatpush3.bf16.msra.mxu1 %v7532_v45  ;;  %v4974_v22 = vpack.c.bf16 %v7537_v42, %v7536_v41  ;;  %v7566_v6 = vld [vmem:[#allocation5 + $0x9] ss:$8 sps:$4 sm:$0xff]   ;;  %v7567_v7 = vld [vmem:[#allocation5 + $0x19] ss:$8 sps:$4 sm:$0xff]  }
 0x627   : > { %6923 = vmatpush3.bf16.msra.mxu0 %v7533_v8  ;;  %6902 = vmatprep.subr.bf16.mxu1 %v7538_v29  ;;  %v7568_v11 = vld [vmem:[#allocation5 + $0x10] ss:$8 sps:$4 sm:$0xff]   ;;  %v4934_v52 = vpack.c.bf16 %v7567_v7, %v7566_v6  ;;  %v6306_v26 = vld [vmem:[#allocation8 + $0x4] ss:$0 sm:$0xff] }
 0x628   : > { %5687 = vmatprep.mubr.bf16.mxu1 %v4947_v19  ;;  %6924 = vmatprep.subr.bf16.mxu0 %v7539_v21  ;;  %v4961_v12 = vpack.c.bf16 %v7569_v4, %v7568_v11  ;;  %v7578_v2 = vld [vmem:[#allocation5 + $0x12] ss:$8 sps:$4 sm:$0xff]  }
 0x629   : > { %5728 = vmatprep.mubr.bf16.mxu0 %v4974_v22  ;;  %v4987_v13 = vpack.c.bf16 %v7579_v20, %v7578_v2 }
 0x62a   : > { %6903 = vmatpush3.bf16.msra.mxu1 %v7540_v37 }
 0x62b   : > { %6925 = vmatpush3.bf16.msra.mxu0 %v7541_v38  ;;  %6904 = vmatprep.subr.bf16.mxu1 %v7542_v40 }
 0x62c   : > { %6926 = vmatprep.subr.bf16.mxu0 %v7543_v44 }
 0x62e   : > { %6905 = vmatpush3.bf16.msra.mxu1 %v7544_v46 }
 0x62f   : > { %6927 = vmatpush3.bf16.msra.mxu0 %v7545_v47  ;;  %6906 = vmatprep.subr.bf16.mxu1 %v7546_v9 }
 0x630   : > { %6928 = vmatprep.subr.bf16.mxu0 %v7547_v48 }
 0x632   : > { %6907 = vmatpush3.bf16.msra.mxu1 %v7548_v49 }
 0x633   : > { %6929 = vmatpush3.bf16.msra.mxu0 %v7549_v50  ;;  %6908 = vmatprep.subr.bf16.mxu1 %v7550_v51 }
 0x634   : > { %6930 = vmatprep.subr.bf16.mxu0 %v7551_v53 }
 0x636   : > { %6909 = vmatpush3.bf16.msra.mxu1 %v7552_v55 }
 0x637   : > { %6931 = vmatpush3.bf16.msra.mxu0 %v7553_v56  ;;  %6910 = vmatprep.subr.bf16.mxu1 %v7554_v30 }
 0x638   : > { %6932 = vmatprep.subr.bf16.mxu0 %v7555_v35 }
 0x63a   : > { %6911 = vmatpush3.bf16.msra.mxu1 %v7556_v58 }
 0x63b   : > { %6933 = vmatpush3.bf16.msra.mxu0 %v7557_v59  ;;  %6912 = vmatprep.subr.bf16.mxu1 %v7558_v39 }
 0x63c   : > { %6934 = vmatprep.subr.bf16.mxu0 %v7559_v61 }
 0x63e   : > { %6913 = vmatpush3.bf16.msra.mxu1 %v7560_v43 }
 0x63f   : > { %6935 = vmatpush3.bf16.msra.mxu0 %v7561_v62  ;;  %6914 = vmatprep.subr.bf16.mxu1 %v7562_v63 }
 0x640   : > { %6936 = vmatprep.subr.bf16.mxu0 %v7563_v1 }
 0x642   : > { %6915 = vmatpush3.bf16.msra.mxu1 %v7564_v3 }
 0x643   : > { %6937 = vmatpush3.bf16.msra.mxu0 %v7565_v5  ;;  %7053 = vmatprep.subr.bf16.mxu1 %v7687_v0 }
 0x645   : > { %5688 = vmatmul.mubr.bf16.vlgmr.msra.gmra.mrb[72].mxu1 %v4934_v52 }
 0x646   : > { %5729 = vmatmul.mubr.bf16.vlgmr.msra.gmra.mrb[76].mxu0 %v4961_v12  ;;  %7054 = vmatpush3.bf16.msra.mxu1 %v7570_v10 }
 0x647   : > { %7055 = vmatprep.subr.bf16.mxu1 %v7687_v0  ;;  %7069 = vmatprep.mubr.msk.bf16.mxu1 %vm7689_vm4, %v7687_v0 }
 0x64a   : > { %7056 = vmatpush3.bf16.msra.mxu1 %v7571_v14 }
 0x64b   : > { %7057 = vmatprep.subr.bf16.mxu1 %v7687_v0 }
 0x64e   : > { %7058 = vmatpush3.bf16.msra.mxu1 %v7572_v57 }
 0x64f   : > { %7059 = vmatprep.subr.bf16.mxu1 %v7687_v0 }
 0x652   : > { %7060 = vmatpush3.bf16.msra.mxu1 %v7573_v54 }
 0x653   : > { %7061 = vmatprep.subr.bf16.mxu1 %v7687_v0 }
 0x656   : > { %7062 = vmatpush3.bf16.msra.mxu1 %v7574_v15 }
 0x657   : > { %7063 = vmatprep.subr.bf16.mxu1 %v7687_v0 }
 0x65a   : > { %7064 = vmatpush3.bf16.msra.mxu1 %v7575_v16 }
 0x65b   : > { %7065 = vmatprep.subr.bf16.mxu1 %v7687_v0 }
 0x65e   : > { %7066 = vmatpush3.bf16.msra.mxu1 %v7576_v60 }
 0x65f   : > { %7067 = vmatprep.subr.bf16.mxu1 %v7687_v0 }
 0x662   : > { %7068 = vmatpush3.bf16.msra.mxu1 %v7577_v17 }
 0x665   : > { %7070 = vmatmul.mubr.bf16.vlgmr.msra.gmra.mrb[76].mxu1 %v4987_v13 }
 0x6f8   : > { %v6872_v23 = vpop.f32.mrb[68].mxu1 }
 0x6f9   : > { %v6894_v24 = vpop.f32.mrb[72].mxu0  ;;  %v6873_v45 = vpop.f32.mrb[69].mxu1 }
 0x6fa   : > { %v6874_v27 = vadd.f32 %v6873_v45, %v6872_v23  ;;  %v6895_v28 = vpop.f32.mrb[73].mxu0  ;;  %v6875_v8 = vpop.f32.mrb[70].mxu1 }
 0x6fb   : > { %v6896_v29 = vadd.f32 %v6895_v28, %v6894_v24  ;;  %v6897_v31 = vpop.f32.mrb[74].mxu0  ;;  %v6876_v32 = vpop.f32.mrb[71].mxu1 }
 0x6fc   : > { %v5608_v21 = vadd.f32 %v6874_v27, %v6306_v26  ;;  %v6877_v33 = vadd.f32 %v6876_v32, %v6875_v8  ;;  %v6898_v34 = vpop.f32.mrb[75].mxu0 }
 0x6fd   : > { %v6899_v25 = vadd.f32 %v6898_v34, %v6897_v31 }
 0x6fe   : > { %v5649_v0 = vadd.f32 %v6896_v29, %v5608_v21  ;;  %v5611_v36 = vadd.f32 %v6877_v33, %v6306_v26 }
 0x700   : > { %v5652_v37 = vadd.f32 %v6899_v25, %v5611_v36 }
 0x718   : > { %v6916_v38 = vpop.f32.mrb[72].mxu1 }
 0x719   : > { %v6938_v40 = vpop.f32.mrb[76].mxu0  ;;  %v6917_v19 = vpop.f32.mrb[73].mxu1 }
 0x71a   : > { %v6918_v41 = vadd.f32 %v6917_v19, %v6916_v38  ;;  %v6939_v42 = vpop.f32.mrb[77].mxu0  ;;  %v6919_v22 = vpop.f32.mrb[74].mxu1 }
 0x71b   : > { %v6940_v44 = vadd.f32 %v6939_v42, %v6938_v40  ;;  %v6941_v46 = vpop.f32.mrb[78].mxu0  ;;  %v6920_v47 = vpop.f32.mrb[75].mxu1 }
 0x71c   : > { %v5690_v9 = vadd.f32 %v6918_v41, %v5649_v0  ;;  %v6921_v48 = vadd.f32 %v6920_v47, %v6919_v22  ;;  %v6942_v49 = vpop.f32.mrb[79].mxu0 }
 0x71d   : > { %v6943_v50 = vadd.f32 %v6942_v49, %v6941_v46 }
 0x71e   : > { %v5693_v51 = vadd.f32 %v6921_v48, %v5652_v37  ;;  %v5731_v53 = vadd.f32 %v6940_v44, %v5690_v9 }
 0x720   : > { %v5734_v55 = vadd.f32 %v6943_v50, %v5693_v51 }
 0x738   : > { %v5771_v56 = vpop.f32.mrb[76].mxu1 }
 0x739   : > { %v5772_v30 = vadd.f32 %v5771_v56, %v5731_v53  ;;  %v7071_v35 = vpop.f32.mrb[77].mxu1 }
 0x73a   : > { %v5774_v58 = vpop.f32.mrb[78].mxu1 }
 0x73b   : > { %v5775_v59 = vadd.f32 %v5774_v58, %v5734_v55  ;;  %v7072_v39 = vpop.f32.mrb[79].mxu1  ;;  %v5778_v61 = vmax.f32 %v5772_v30, 0.0 }
 0x73d   : > { %v5779_v43 = vmax.f32 %v5775_v59, 0.0 }
 0x73f   : > { %v5780_v62 = vpack.c.bf16 %v5779_v43, %v5778_v61  ;;  %v6379_v63 = vpack.c.bf16 %v5779_v43, %v5779_v43 }
 0x741   : > { %v5789_v1 = vrot.slane %v5780_v62, %v8058_v18  ;;  %v5796_v3 = vrot.slane %v6379_v63, %v8058_v18  ;;  %6380 = vst.sshfl [vmem:[%s241_s25] sm:$0x3 pattern:$0x76325410] %v5780_v62 }
 0x742   : > { %6381 = vst.sshfl [vmem:[%s241_s25 + $0x4] sm:$0x3 pattern:$0x76325410] %v6379_v63 }
 0x743   : > { %v5797_v5 = vcombine.high %v5789_v1, %v5789_v1  ;;  %v5798_v6 = vcombine.high %v5796_v3, %v5796_v3 }
 0x745   : > { %5804 = vst [vmem:[%s241_s25 + $0x2] sm:$0x3] %v5797_v5  ;;  %5806 = vst [vmem:[%s241_s25 + $0x6] sm:$0x3] %v5798_v6 }
 0x746 PF: > { %s16_s15 = sadd.s32 1, %s7678_s15  }
 0x747   : > { %p13_p5 = scmp.ge.s32.totalorder %s16_s15, 4  }
 0x749   :  { %15 = sbr.rel (!%p13_p5) target bundleno = 2 (0x2), region = 104 }
 0x750   :  { %5828 = vsyncpa [#allocation7], 1 }
 0x751   :  { %5830 = vsyncpa [#allocation7 + $0x1], 1 }
 0x752   :  { %5831 = vsyncpa [#allocation9], 1 }

</bundles_post_ra>
